<compile_context>
chip_gen: v7x
topology: tpu7x:2x2x1
jax: 0.10.0
libtpu: 0.0.40
codegen_flags: <defaults>
</compile_context>

<pallas_src>
import functools

import jax
import jax.numpy as jnp
from jax.experimental import pallas as pl
from jax.experimental.pallas import tpu as pltpu

LANE = 128


def _round_up(a, b):
    return (a + b - 1) // b * b


def _bit_reverse(x, bits):
    r = 0
    for _ in range(bits):
        r = (r << 1) | (x & 1)
        x >>= 1
    return r


def _pad_col_blocks(w, h, hp, nblocks):
    """Zero-pad each h-wide column block of w out to a full hp(=128)-lane slab."""
    out = jnp.zeros((w.shape[0], nblocks * hp), w.dtype)
    for k in range(nblocks):
        out = out.at[:, k * hp:k * hp + h].set(w[:, k * h:(k + 1) * h])
    return out


def _pad_u_rows(u, h, hp):
    """Zero-pad the contraction (row) dim of u from h to hp."""
    return jnp.zeros((hp, u.shape[1]), u.dtype).at[:h, :].set(u)


# -----------------------------------------------------------------------------
# Fused kernel: leaves (weighted-mean -> W_iou -> cell) + whole tree walk.
# Block shapes (per batch tile of tb trees, leaves in bit-reversed order):
#   emb:(L,tb,S,X) wts:(L,tb,S) c0:(L,tb,Hp) w_iou:(X,3Hp) b_iou:(1,3Hp)
#   u_cat:(2Hp,5Hp) b_u:(1,5Hp)  ->  root:(tb,Hp)
# -----------------------------------------------------------------------------
def _tree_lstm_kernel(emb_ref, wts_ref, c0_ref, w_iou_ref, b_iou_ref,
                      u_cat_ref, b_u_ref, root_ref, *, depth, h_pad,
                      compute_dtype):
    L, tb, S, X = emb_ref.shape
    hp = h_pad
    m0 = L * tb

    # ---- leaves: weighted mean of subtoken embeddings -> W_iou -> cell -------
    # TODO(synk): nn.Dropout is identity here (inference semantics).
    emb = emb_ref[...].astype(jnp.float32).reshape(m0, S, X)
    wts = wts_ref[...].reshape(m0, S)                    # pre-normalized weights
    mean = jnp.sum(emb * wts[:, :, None], axis=1)        # (m0, X) f32
    z = (jnp.dot(mean.astype(compute_dtype), w_iou_ref[...],
                 preferred_element_type=jnp.float32)
         + b_iou_ref[...])                               # (m0, 3Hp) f32
    i = jax.nn.sigmoid(z[:, 0 * hp:1 * hp])              # lane-tile aligned slices
    o = jax.nn.sigmoid(z[:, 1 * hp:2 * hp])
    u = jnp.tanh(z[:, 2 * hp:3 * hp])
    c = i * u + c0_ref[...].reshape(m0, hp)
    h = o * jnp.tanh(c)
    h = h.reshape(L, tb, hp)                             # leaf-major frontier
    c = c.reshape(L, tb, hp)

    # ---- bottom-up tree walk, frontier kept VMEM/vreg resident ---------------
    # NOTE: SSA carry is fine here -- live frontier data is geometrically
    # bounded by ~4x the leaf level (tiny vs VMEM even at large tb/depth).
    u_cat = u_cat_ref[...]                               # (2Hp, 5Hp)
    b_u = b_u_ref[...]                                   # (1, 5Hp) f32
    for _ in range(depth):                               # static unroll over levels
        half = h.shape[0] // 2
        h_l = h[:half].reshape(half * tb, hp)            # leading-dim slice+merge: free
        h_r = h[half:].reshape(half * tb, hp)
        c_l = c[:half].reshape(half * tb, hp)
        c_r = c[half:].reshape(half * tb, hp)
        h_cat = jnp.concatenate([h_l.astype(compute_dtype),
                                 h_r.astype(compute_dtype)], axis=-1)  # (M, 2Hp)
        z = (jnp.dot(h_cat, u_cat, preferred_element_type=jnp.float32)
             + b_u)                                      # (M, 5Hp) f32
        f_l = jax.nn.sigmoid(z[:, 0 * hp:1 * hp])
        f_r = jax.nn.sigmoid(z[:, 1 * hp:2 * hp])
        ii = jax.nn.sigmoid(z[:, 2 * hp:3 * hp])
        oo = jax.nn.sigmoid(z[:, 3 * hp:4 * hp])
        uu = jnp.tanh(z[:, 4 * hp:5 * hp])
        c_new = f_l * c_l + f_r * c_r + ii * uu          # DGL reduce + apply_node
        h_new = oo * jnp.tanh(c_new)
        h = h_new.reshape(half, tb, hp)
        c = c_new.reshape(half, tb, hp)
    root_ref[...] = h[0]                                 # frontier of size 1 = root


# -----------------------------------------------------------------------------
# Wrapper: weight prep, leaf gather in bit-reversed order, batch tiling.
# Batch of perfect binary trees (root = node 0, children of i are 2i+1 / 2i+2).
# -----------------------------------------------------------------------------
def binary_tree_lstm_forward(params, indices, mask, h0, c0, *, batch, depth,
                             compute_dtype=jnp.bfloat16):
    del h0  # every node's h is overwritten by apply_node_func before being read
    h_size = c0.shape[1]
    hp = _round_up(h_size, LANE)
    nodes_per_tree = 2 ** (depth + 1) - 1
    num_leaves = 2 ** depth
    seq = indices.shape[1]
    x_size = params["emb"].shape[1]

    # --- weights: pad each H-wide column block to a 128-lane slab; fuse -------
    # TODO(synk): with H < 128 this per-gate padding wastes MXU columns; a
    # contiguous-gate packing (3H->128, 5H->256) would need non-tile-aligned
    # lane slices -- kept the aligned scheme for robust lowering.
    w_iou_pad = _pad_col_blocks(params["w_iou"], h_size, hp, 3).astype(compute_dtype)
    b_iou_pad = _pad_col_blocks(params["b_iou"], h_size, hp, 3)              # f32
    u_all = jnp.concatenate([params["u_f_w"], params["u_iou"]], axis=1)      # (2H, 5H)
    b_all = jnp.concatenate([params["u_f_b"], params["b_iou"]], axis=1)      # (1, 5H)
    u_top = _pad_u_rows(_pad_col_blocks(u_all[:h_size], h_size, hp, 5), h_size, hp)
    u_bot = _pad_u_rows(_pad_col_blocks(u_all[h_size:], h_size, hp, 5), h_size, hp)
    u_cat_pad = jnp.concatenate([u_top, u_bot], axis=0).astype(compute_dtype)  # (2Hp,5Hp)
    b_u_pad = _pad_col_blocks(b_all, h_size, hp, 5)                          # (1,5Hp) f32

    # --- leaf gather, leaf-major in bit-reversed frontier order ---------------
    leaf_local = jnp.array(
        [2 ** depth - 1 + _bit_reverse(p, depth) for p in range(num_leaves)],
        jnp.int32)
    offsets = jnp.arange(batch, dtype=jnp.int32) * nodes_per_tree
    leaf_idx = (leaf_local[:, None] + offsets[None, :]).reshape(-1)    # (L*B,)

    emb_tab = params["emb"].astype(compute_dtype)
    emb_leaf = emb_tab[indices[leaf_idx]].reshape(num_leaves, batch, seq, x_size)
    maskf = mask[leaf_idx].astype(jnp.float32)                          # (L*B, S)
    lens = jnp.sum(maskf, axis=1, keepdims=True)
    # nan_to_num(0/0 -> 0): empty nodes get all-zero weights -> mean = 0
    wts = (maskf / jnp.where(lens > 0.0, lens, 1.0)).reshape(num_leaves, batch, seq)
    c0_leaf = jnp.pad(c0[leaf_idx], ((0, 0), (0, hp - h_size)))
    c0_leaf = c0_leaf.reshape(num_leaves, batch, hp)

    # --- batch tiling: largest tb (mult of 8) within a VMEM budget ------------
    b8 = _round_up(batch, 8)
    per_tree = (2 * (num_leaves * seq * LANE * 4          # emb block (dbl-buffered, lane-padded)
                     + num_leaves * LANE * 4              # weights block
                     + num_leaves * hp * 4)               # c0 block
                + 10 * num_leaves * hp * 4)               # live frontier / z intermediates
    fixed = 2 * (w_iou_pad.size + u_cat_pad.size) * 4 + 8 * hp * 4
    budget = 40 * 1024 * 1024                             # headroom for v7x (64 MiB VMEM)
    tb = 8
    while tb * 2 <= b8 and (tb * 2) * per_tree + fixed <= budget:
        tb *= 2
    if b8 // tb < 2 and b8 >= 16:                         # keep both v7x TCs busy
        tb = max(8, tb // 2)
    b_pad = _round_up(b8, tb)
    if b_pad != batch:
        pad = b_pad - batch
        emb_leaf = jnp.pad(emb_leaf, ((0, 0), (0, pad), (0, 0), (0, 0)))
        wts = jnp.pad(wts, ((0, 0), (0, pad), (0, 0)))
        c0_leaf = jnp.pad(c0_leaf, ((0, 0), (0, pad), (0, 0)))
    vmem_limit = int(min(max(tb * per_tree + fixed + (8 << 20), 32 << 20), 48 << 20))

    root = pl.pallas_call(
        functools.partial(_tree_lstm_kernel, depth=depth, h_pad=hp,
                          compute_dtype=compute_dtype),
        grid=(b_pad // tb,),
        in_specs=[
            pl.BlockSpec((num_leaves, tb, seq, x_size), lambda b: (0, b, 0, 0)),
            pl.BlockSpec((num_leaves, tb, seq), lambda b: (0, b, 0)),
            pl.BlockSpec((num_leaves, tb, hp), lambda b: (0, b, 0)),
            pl.BlockSpec((x_size, 3 * hp), lambda b: (0, 0)),
            pl.BlockSpec((1, 3 * hp), lambda b: (0, 0)),
            pl.BlockSpec((2 * hp, 5 * hp), lambda b: (0, 0)),
            pl.BlockSpec((1, 5 * hp), lambda b: (0, 0)),
        ],
        out_specs=pl.BlockSpec((tb, hp), lambda b: (b, 0)),
        out_shape=jax.ShapeDtypeStruct((b_pad, hp), jnp.float32),
        compiler_params=pltpu.CompilerParams(
            dimension_semantics=("parallel",),
            vmem_limit_bytes=vmem_limit),
    )(emb_leaf, wts, c0_leaf, w_iou_pad, b_iou_pad, u_cat_pad, b_u_pad)
    return root[:batch, :h_size]


# -----------------------------------------------------------------------------
# Pure-JAX reference (same math, no Pallas) for the correctness check.
# -----------------------------------------------------------------------------
def reference_forward(params, indices, mask, h0, c0, *, batch, depth):
    del h0
    nodes_per_tree = 2 ** (depth + 1) - 1
    N = batch * nodes_per_tree
    H = c0.shape[1]
    maskf = mask.astype(jnp.float32)

    emb = params["emb"][indices] * maskf[:, :, None]
    mean = jnp.nan_to_num(emb.sum(1) / maskf.sum(1, keepdims=True), nan=0.0)
    iou_all = mean @ params["w_iou"]

    h = jnp.zeros((N, H), jnp.float32)
    c = jnp.zeros((N, H), jnp.float32)
    offsets = jnp.arange(batch) * nodes_per_tree

    def apply_node(iou, c_in):
        iou = iou + params["b_iou"]
        i, o, u = jnp.split(iou, 3, axis=1)
        cc = jax.nn.sigmoid(i) * jnp.tanh(u) + c_in
        return jax.nn.sigmoid(o) * jnp.tanh(cc), cc

    leaf_local = jnp.arange(2 ** depth - 1, nodes_per_tree)
    leaf_idx = (offsets[:, None] + leaf_local[None, :]).reshape(-1)
    h_leaf, c_leaf = apply_node(iou_all[leaf_idx], c0[leaf_idx])
    h = h.at[leaf_idx].set(h_leaf)
    c = c.at[leaf_idx].set(c_leaf)

    for level in range(depth - 1, -1, -1):
        local = jnp.arange(2 ** level - 1, 2 ** (level + 1) - 1)
        node_idx = (offsets[:, None] + local[None, :]).reshape(-1)
        li = (offsets[:, None] + (2 * local + 1)[None, :]).reshape(-1)
        ri = (offsets[:, None] + (2 * local + 2)[None, :]).reshape(-1)
        h_cat = jnp.concatenate([h[li], h[ri]], axis=1)
        f = jax.nn.sigmoid(h_cat @ params["u_f_w"] + params["u_f_b"])
        c_red = f[:, :H] * c[li] + f[:, H:] * c[ri]
        iou = h_cat @ params["u_iou"]          # DGL reduce overwrites W_iou term
        h_new, c_new = apply_node(iou, c_red)
        h = h.at[node_idx].set(h_new)
        c = c.at[node_idx].set(c_new)

    return h[offsets]


# -----------------------------------------------------------------------------
if __name__ == "__main__":
    NUM_VOCABS = 64
    X_SIZE = 32      # x_size
    H_SIZE = 32      # h_size
    SEQ = 8          # subtokens per node
    BATCH = 2        # number of trees
    DEPTH = 3        # perfect binary tree depth -> 15 nodes/tree
    NODES_PER_TREE = 2 ** (DEPTH + 1) - 1
    N = BATCH * NODES_PER_TREE

    key = jax.random.PRNGKey(0)
    k_emb, k_w, k_ui, k_ufw, k_ufb, k_idx, k_h, k_c = jax.random.split(key, 8)

    # Deterministic parameter init (shapes match the nn.Module __init__);
    # all Linear weights stored transposed: (in_features, out_features).
    params = {
        "emb":   jax.random.normal(k_emb, (NUM_VOCABS, X_SIZE), jnp.float32),
        "w_iou": jax.random.normal(k_w, (X_SIZE, 3 * H_SIZE), jnp.float32)
                 * (1.0 / jnp.sqrt(X_SIZE)),
        "u_iou": jax.random.normal(k_ui, (2 * H_SIZE, 3 * H_SIZE), jnp.float32)
                 * (1.0 / jnp.sqrt(2 * H_SIZE)),
        "b_iou": jnp.zeros((1, 3 * H_SIZE), jnp.float32),
        "u_f_w": jax.random.normal(k_ufw, (2 * H_SIZE, 2 * H_SIZE), jnp.float32)
                 * (1.0 / jnp.sqrt(2 * H_SIZE)),
        "u_f_b": jax.random.normal(k_ufb, (1, 2 * H_SIZE), jnp.float32) * 0.1,
    }

    indices = jax.random.randint(k_idx, (N, SEQ), 0, NUM_VOCABS, dtype=jnp.int32)
    lengths = (jnp.arange(N) * 3) % (SEQ + 1)          # some nodes have 0 subtokens
    mask = (jnp.arange(SEQ)[None, :] < lengths[:, None]).astype(jnp.float32)
    h0 = jax.random.normal(k_h, (N, H_SIZE), jnp.float32)
    c0 = jax.random.normal(k_c, (N, H_SIZE), jnp.float32)

    # f32 path: exact correctness gate.
    fwd_f32 = jax.jit(functools.partial(binary_tree_lstm_forward, batch=BATCH,
                                        depth=DEPTH, compute_dtype=jnp.float32))
    out_f32 = jax.block_until_ready(fwd_f32(params, indices, mask, h0, c0))

    # bf16 MXU path: the production/perf configuration (looser tolerance).
    fwd_bf16 = jax.jit(functools.partial(binary_tree_lstm_forward, batch=BATCH,
                                         depth=DEPTH, compute_dtype=jnp.bfloat16))
    out_bf16 = jax.block_until_ready(fwd_bf16(params, indices, mask, h0, c0))

    ref = jax.block_until_ready(
        reference_forward(params, indices, mask, h0, c0, batch=BATCH, depth=DEPTH))

    assert out_f32.shape == (BATCH, H_SIZE), out_f32.shape
    assert jnp.allclose(out_f32, ref, atol=1e-5, rtol=1e-5), (
        "f32 mismatch", float(jnp.max(jnp.abs(out_f32 - ref))))
    assert jnp.allclose(out_bf16, ref, atol=1e-1, rtol=1e-1), (
        "bf16 mismatch", float(jnp.max(jnp.abs(out_bf16 - ref))))
    print("KERNEL_OK")
</pallas_src>

<mosaic_0001>
module attributes {stable_mosaic.version = 11 : i64} {
  func.func @_tree_lstm_kernel(%arg0: i32, %arg1: memref<8x8x8x32xf32, #tpu.memory_space<vmem>>, %arg2: memref<8x8x8xf32, #tpu.memory_space<vmem>>, %arg3: memref<8x8x128xf32, #tpu.memory_space<vmem>>, %arg4: memref<32x384xf32, #tpu.memory_space<vmem>>, %arg5: memref<1x384xf32, #tpu.memory_space<vmem>>, %arg6: memref<256x640xf32, #tpu.memory_space<vmem>>, %arg7: memref<1x640xf32, #tpu.memory_space<vmem>>, %arg8: memref<8x128xf32, #tpu.memory_space<vmem>>) attributes {dimension_semantics = [#tpu.dimension_semantics<parallel>], iteration_bounds = array<i64: 1>, scalar_prefetch = 0 : i64, scratch_operands = 0 : i64, tpu.core_type = #tpu.core_type<tc>, window_params = [{transform_indices = @transform_0, window_bounds = array<i64: 8, 8, 8, 32>}, {transform_indices = @transform_1, window_bounds = array<i64: 8, 8, 8>}, {transform_indices = @transform_2, window_bounds = array<i64: 8, 8, 128>}, {pipeline_mode = #tpu.pipeline_mode<synchronous>, transform_indices = @transform_3, window_bounds = array<i64: 32, 384>}, {pipeline_mode = #tpu.pipeline_mode<synchronous>, transform_indices = @transform_4, window_bounds = array<i64: 1, 384>}, {pipeline_mode = #tpu.pipeline_mode<synchronous>, transform_indices = @transform_5, window_bounds = array<i64: 256, 640>}, {pipeline_mode = #tpu.pipeline_mode<synchronous>, transform_indices = @transform_6, window_bounds = array<i64: 1, 640>}, {transform_indices = @transform_7, window_bounds = array<i64: 8, 128>}]} {
    %c0 = arith.constant 0 : index
    %c0_0 = arith.constant 0 : index
    %c0_1 = arith.constant 0 : index
    %c0_2 = arith.constant 0 : index
    %0 = vector.load %arg1[%c0, %c0_0, %c0_1, %c0_2] : memref<8x8x8x32xf32, #tpu.memory_space<vmem>>, vector<8x8x8x32xf32>
    %1 = vector.shape_cast %0 : vector<8x8x8x32xf32> to vector<64x8x32xf32>
    %c0_3 = arith.constant 0 : index
    %c0_4 = arith.constant 0 : index
    %c0_5 = arith.constant 0 : index
    %2 = vector.load %arg2[%c0_3, %c0_4, %c0_5] : memref<8x8x8xf32, #tpu.memory_space<vmem>>, vector<8x8x8xf32>
    %3 = vector.shape_cast %2 : vector<8x8x8xf32> to vector<64x8xf32>
    %4 = vector.shape_cast %3 : vector<64x8xf32> to vector<64x8x1xf32>
    %5 = vector.broadcast %4 : vector<64x8x1xf32> to vector<64x8x32xf32>
    %6 = arith.mulf %1, %5 : vector<64x8x32xf32>
    %cst = arith.constant dense<0.000000e+00> : vector<64x32xf32>
    %7 = vector.multi_reduction <add>, %6, %cst [1] : vector<64x8x32xf32> to vector<64x32xf32>
    %c0_6 = arith.constant 0 : index
    %c0_7 = arith.constant 0 : index
    %8 = vector.load %arg4[%c0_6, %c0_7] : memref<32x384xf32, #tpu.memory_space<vmem>>, vector<32x384xf32>
    %cst_8 = arith.constant dense<0.000000e+00> : vector<64x384xf32>
    %9 = tpu.matmul %7, %8, %cst_8 {dimension_numbers = #tpu.dot_dimension_numbers<[1], [0], [0], [1], [0, 0, 1, 1], [], []>} : vector<64x32xf32>, vector<32x384xf32>, vector<64x384xf32> -> vector<64x384xf32>
    %c0_9 = arith.constant 0 : index
    %c0_10 = arith.constant 0 : index
    %10 = vector.load %arg5[%c0_9, %c0_10] : memref<1x384xf32, #tpu.memory_space<vmem>>, vector<1x384xf32>
    %11 = vector.broadcast %10 : vector<1x384xf32> to vector<64x384xf32>
    %12 = arith.addf %9, %11 : vector<64x384xf32>
    %13 = vector.extract_strided_slice %12 {offsets = [0, 0], sizes = [64, 128], strides = [1, 1]} : vector<64x384xf32> to vector<64x128xf32>
    %14 = arith.negf %13 : vector<64x128xf32>
    %15 = math.exp %14 : vector<64x128xf32>
    %cst_11 = arith.constant 1.000000e+00 : f32
    %16 = vector.broadcast %cst_11 : f32 to vector<64x128xf32>
    %17 = arith.addf %16, %15 : vector<64x128xf32>
    %18 = arith.divf %16, %17 : vector<64x128xf32>
    %19 = vector.extract_strided_slice %12 {offsets = [0, 128], sizes = [64, 128], strides = [1, 1]} : vector<64x384xf32> to vector<64x128xf32>
    %20 = arith.negf %19 : vector<64x128xf32>
    %21 = math.exp %20 : vector<64x128xf32>
    %cst_12 = arith.constant 1.000000e+00 : f32
    %22 = vector.broadcast %cst_12 : f32 to vector<64x128xf32>
    %23 = arith.addf %22, %21 : vector<64x128xf32>
    %24 = arith.divf %22, %23 : vector<64x128xf32>
    %25 = vector.extract_strided_slice %12 {offsets = [0, 256], sizes = [64, 128], strides = [1, 1]} : vector<64x384xf32> to vector<64x128xf32>
    %26 = math.tanh %25 : vector<64x128xf32>
    %27 = arith.mulf %18, %26 : vector<64x128xf32>
    %c0_13 = arith.constant 0 : index
    %c0_14 = arith.constant 0 : index
    %c0_15 = arith.constant 0 : index
    %28 = vector.load %arg3[%c0_13, %c0_14, %c0_15] : memref<8x8x128xf32, #tpu.memory_space<vmem>>, vector<8x8x128xf32>
    %29 = vector.shape_cast %28 : vector<8x8x128xf32> to vector<64x128xf32>
    %30 = arith.addf %27, %29 : vector<64x128xf32>
    %31 = math.tanh %30 : vector<64x128xf32>
    %32 = arith.mulf %24, %31 : vector<64x128xf32>
    %33 = vector.shape_cast %32 : vector<64x128xf32> to vector<8x8x128xf32>
    %34 = vector.shape_cast %30 : vector<64x128xf32> to vector<8x8x128xf32>
    %c0_16 = arith.constant 0 : index
    %c0_17 = arith.constant 0 : index
    %35 = vector.load %arg6[%c0_16, %c0_17] : memref<256x640xf32, #tpu.memory_space<vmem>>, vector<256x640xf32>
    %c0_18 = arith.constant 0 : index
    %c0_19 = arith.constant 0 : index
    %36 = vector.load %arg7[%c0_18, %c0_19] : memref<1x640xf32, #tpu.memory_space<vmem>>, vector<1x640xf32>
    %37 = vector.extract_strided_slice %33 {offsets = [0, 0, 0], sizes = [4, 8, 128], strides = [1, 1, 1]} : vector<8x8x128xf32> to vector<4x8x128xf32>
    %38 = vector.shape_cast %37 : vector<4x8x128xf32> to vector<32x128xf32>
    %39 = vector.extract_strided_slice %33 {offsets = [4, 0, 0], sizes = [4, 8, 128], strides = [1, 1, 1]} : vector<8x8x128xf32> to vector<4x8x128xf32>
    %40 = vector.shape_cast %39 : vector<4x8x128xf32> to vector<32x128xf32>
    %41 = vector.extract_strided_slice %34 {offsets = [0, 0, 0], sizes = [4, 8, 128], strides = [1, 1, 1]} : vector<8x8x128xf32> to vector<4x8x128xf32>
    %42 = vector.shape_cast %41 : vector<4x8x128xf32> to vector<32x128xf32>
    %43 = vector.extract_strided_slice %34 {offsets = [4, 0, 0], sizes = [4, 8, 128], strides = [1, 1, 1]} : vector<8x8x128xf32> to vector<4x8x128xf32>
    %44 = vector.shape_cast %43 : vector<4x8x128xf32> to vector<32x128xf32>
    %45 = tpu.concatenate %38, %40 in 1 : vector<32x128xf32>, vector<32x128xf32> -> vector<32x256xf32>
    %cst_20 = arith.constant dense<0.000000e+00> : vector<32x640xf32>
    %46 = tpu.matmul %45, %35, %cst_20 {dimension_numbers = #tpu.dot_dimension_numbers<[1], [0], [0], [1], [0, 0, 1, 1], [], []>} : vector<32x256xf32>, vector<256x640xf32>, vector<32x640xf32> -> vector<32x640xf32>
    %47 = vector.broadcast %36 : vector<1x640xf32> to vector<32x640xf32>
    %48 = arith.addf %46, %47 : vector<32x640xf32>
    %49 = vector.extract_strided_slice %48 {offsets = [0, 0], sizes = [32, 128], strides = [1, 1]} : vector<32x640xf32> to vector<32x128xf32>
    %50 = arith.negf %49 : vector<32x128xf32>
    %51 = math.exp %50 : vector<32x128xf32>
    %cst_21 = arith.constant 1.000000e+00 : f32
    %52 = vector.broadcast %cst_21 : f32 to vector<32x128xf32>
    %53 = arith.addf %52, %51 : vector<32x128xf32>
    %54 = arith.divf %52, %53 : vector<32x128xf32>
    %55 = vector.extract_strided_slice %48 {offsets = [0, 128], sizes = [32, 128], strides = [1, 1]} : vector<32x640xf32> to vector<32x128xf32>
    %56 = arith.negf %55 : vector<32x128xf32>
    %57 = math.exp %56 : vector<32x128xf32>
    %cst_22 = arith.constant 1.000000e+00 : f32
    %58 = vector.broadcast %cst_22 : f32 to vector<32x128xf32>
    %59 = arith.addf %58, %57 : vector<32x128xf32>
    %60 = arith.divf %58, %59 : vector<32x128xf32>
    %61 = vector.extract_strided_slice %48 {offsets = [0, 256], sizes = [32, 128], strides = [1, 1]} : vector<32x640xf32> to vector<32x128xf32>
    %62 = arith.negf %61 : vector<32x128xf32>
    %63 = math.exp %62 : vector<32x128xf32>
    %cst_23 = arith.constant 1.000000e+00 : f32
    %64 = vector.broadcast %cst_23 : f32 to vector<32x128xf32>
    %65 = arith.addf %64, %63 : vector<32x128xf32>
    %66 = arith.divf %64, %65 : vector<32x128xf32>
    %67 = vector.extract_strided_slice %48 {offsets = [0, 384], sizes = [32, 128], strides = [1, 1]} : vector<32x640xf32> to vector<32x128xf32>
    %68 = arith.negf %67 : vector<32x128xf32>
    %69 = math.exp %68 : vector<32x128xf32>
    %cst_24 = arith.constant 1.000000e+00 : f32
    %70 = vector.broadcast %cst_24 : f32 to vector<32x128xf32>
    %71 = arith.addf %70, %69 : vector<32x128xf32>
    %72 = arith.divf %70, %71 : vector<32x128xf32>
    %73 = vector.extract_strided_slice %48 {offsets = [0, 512], sizes = [32, 128], strides = [1, 1]} : vector<32x640xf32> to vector<32x128xf32>
    %74 = math.tanh %73 : vector<32x128xf32>
    %75 = arith.mulf %54, %42 : vector<32x128xf32>
    %76 = arith.mulf %60, %44 : vector<32x128xf32>
    %77 = arith.addf %75, %76 : vector<32x128xf32>
    %78 = arith.mulf %66, %74 : vector<32x128xf32>
    %79 = arith.addf %77, %78 : vector<32x128xf32>
    %80 = math.tanh %79 : vector<32x128xf32>
    %81 = arith.mulf %72, %80 : vector<32x128xf32>
    %82 = vector.shape_cast %81 : vector<32x128xf32> to vector<4x8x128xf32>
    %83 = vector.shape_cast %79 : vector<32x128xf32> to vector<4x8x128xf32>
    %84 = vector.extract_strided_slice %82 {offsets = [0, 0, 0], sizes = [2, 8, 128], strides = [1, 1, 1]} : vector<4x8x128xf32> to vector<2x8x128xf32>
    %85 = vector.shape_cast %84 : vector<2x8x128xf32> to vector<16x128xf32>
    %86 = vector.extract_strided_slice %82 {offsets = [2, 0, 0], sizes = [2, 8, 128], strides = [1, 1, 1]} : vector<4x8x128xf32> to vector<2x8x128xf32>
    %87 = vector.shape_cast %86 : vector<2x8x128xf32> to vector<16x128xf32>
    %88 = vector.extract_strided_slice %83 {offsets = [0, 0, 0], sizes = [2, 8, 128], strides = [1, 1, 1]} : vector<4x8x128xf32> to vector<2x8x128xf32>
    %89 = vector.shape_cast %88 : vector<2x8x128xf32> to vector<16x128xf32>
    %90 = vector.extract_strided_slice %83 {offsets = [2, 0, 0], sizes = [2, 8, 128], strides = [1, 1, 1]} : vector<4x8x128xf32> to vector<2x8x128xf32>
    %91 = vector.shape_cast %90 : vector<2x8x128xf32> to vector<16x128xf32>
    %92 = tpu.concatenate %85, %87 in 1 : vector<16x128xf32>, vector<16x128xf32> -> vector<16x256xf32>
    %cst_25 = arith.constant dense<0.000000e+00> : vector<16x640xf32>
    %93 = tpu.matmul %92, %35, %cst_25 {dimension_numbers = #tpu.dot_dimension_numbers<[1], [0], [0], [1], [0, 0, 1, 1], [], []>} : vector<16x256xf32>, vector<256x640xf32>, vector<16x640xf32> -> vector<16x640xf32>
    %94 = vector.broadcast %36 : vector<1x640xf32> to vector<16x640xf32>
    %95 = arith.addf %93, %94 : vector<16x640xf32>
    %96 = vector.extract_strided_slice %95 {offsets = [0, 0], sizes = [16, 128], strides = [1, 1]} : vector<16x640xf32> to vector<16x128xf32>
    %97 = arith.negf %96 : vector<16x128xf32>
    %98 = math.exp %97 : vector<16x128xf32>
    %cst_26 = arith.constant 1.000000e+00 : f32
    %99 = vector.broadcast %cst_26 : f32 to vector<16x128xf32>
    %100 = arith.addf %99, %98 : vector<16x128xf32>
    %101 = arith.divf %99, %100 : vector<16x128xf32>
    %102 = vector.extract_strided_slice %95 {offsets = [0, 128], sizes = [16, 128], strides = [1, 1]} : vector<16x640xf32> to vector<16x128xf32>
    %103 = arith.negf %102 : vector<16x128xf32>
    %104 = math.exp %103 : vector<16x128xf32>
    %cst_27 = arith.constant 1.000000e+00 : f32
    %105 = vector.broadcast %cst_27 : f32 to vector<16x128xf32>
    %106 = arith.addf %105, %104 : vector<16x128xf32>
    %107 = arith.divf %105, %106 : vector<16x128xf32>
    %108 = vector.extract_strided_slice %95 {offsets = [0, 256], sizes = [16, 128], strides = [1, 1]} : vector<16x640xf32> to vector<16x128xf32>
    %109 = arith.negf %108 : vector<16x128xf32>
    %110 = math.exp %109 : vector<16x128xf32>
    %cst_28 = arith.constant 1.000000e+00 : f32
    %111 = vector.broadcast %cst_28 : f32 to vector<16x128xf32>
    %112 = arith.addf %111, %110 : vector<16x128xf32>
    %113 = arith.divf %111, %112 : vector<16x128xf32>
    %114 = vector.extract_strided_slice %95 {offsets = [0, 384], sizes = [16, 128], strides = [1, 1]} : vector<16x640xf32> to vector<16x128xf32>
    %115 = arith.negf %114 : vector<16x128xf32>
    %116 = math.exp %115 : vector<16x128xf32>
    %cst_29 = arith.constant 1.000000e+00 : f32
    %117 = vector.broadcast %cst_29 : f32 to vector<16x128xf32>
    %118 = arith.addf %117, %116 : vector<16x128xf32>
    %119 = arith.divf %117, %118 : vector<16x128xf32>
    %120 = vector.extract_strided_slice %95 {offsets = [0, 512], sizes = [16, 128], strides = [1, 1]} : vector<16x640xf32> to vector<16x128xf32>
    %121 = math.tanh %120 : vector<16x128xf32>
    %122 = arith.mulf %101, %89 : vector<16x128xf32>
    %123 = arith.mulf %107, %91 : vector<16x128xf32>
    %124 = arith.addf %122, %123 : vector<16x128xf32>
    %125 = arith.mulf %113, %121 : vector<16x128xf32>
    %126 = arith.addf %124, %125 : vector<16x128xf32>
    %127 = math.tanh %126 : vector<16x128xf32>
    %128 = arith.mulf %119, %127 : vector<16x128xf32>
    %129 = vector.shape_cast %128 : vector<16x128xf32> to vector<2x8x128xf32>
    %130 = vector.shape_cast %126 : vector<16x128xf32> to vector<2x8x128xf32>
    %131 = vector.extract_strided_slice %129 {offsets = [0, 0, 0], sizes = [1, 8, 128], strides = [1, 1, 1]} : vector<2x8x128xf32> to vector<1x8x128xf32>
    %132 = vector.shape_cast %131 : vector<1x8x128xf32> to vector<8x128xf32>
    %133 = vector.extract_strided_slice %129 {offsets = [1, 0, 0], sizes = [1, 8, 128], strides = [1, 1, 1]} : vector<2x8x128xf32> to vector<1x8x128xf32>
    %134 = vector.shape_cast %133 : vector<1x8x128xf32> to vector<8x128xf32>
    %135 = vector.extract_strided_slice %130 {offsets = [0, 0, 0], sizes = [1, 8, 128], strides = [1, 1, 1]} : vector<2x8x128xf32> to vector<1x8x128xf32>
    %136 = vector.shape_cast %135 : vector<1x8x128xf32> to vector<8x128xf32>
    %137 = vector.extract_strided_slice %130 {offsets = [1, 0, 0], sizes = [1, 8, 128], strides = [1, 1, 1]} : vector<2x8x128xf32> to vector<1x8x128xf32>
    %138 = vector.shape_cast %137 : vector<1x8x128xf32> to vector<8x128xf32>
    %139 = tpu.concatenate %132, %134 in 1 : vector<8x128xf32>, vector<8x128xf32> -> vector<8x256xf32>
    %cst_30 = arith.constant dense<0.000000e+00> : vector<8x640xf32>
    %140 = tpu.matmul %139, %35, %cst_30 {dimension_numbers = #tpu.dot_dimension_numbers<[1], [0], [0], [1], [0, 0, 1, 1], [], []>} : vector<8x256xf32>, vector<256x640xf32>, vector<8x640xf32> -> vector<8x640xf32>
    %141 = vector.broadcast %36 : vector<1x640xf32> to vector<8x640xf32>
    %142 = arith.addf %140, %141 : vector<8x640xf32>
    %143 = vector.extract_strided_slice %142 {offsets = [0, 0], sizes = [8, 128], strides = [1, 1]} : vector<8x640xf32> to vector<8x128xf32>
    %144 = arith.negf %143 : vector<8x128xf32>
    %145 = math.exp %144 : vector<8x128xf32>
    %cst_31 = arith.constant 1.000000e+00 : f32
    %146 = vector.broadcast %cst_31 : f32 to vector<8x128xf32>
    %147 = arith.addf %146, %145 : vector<8x128xf32>
    %148 = arith.divf %146, %147 : vector<8x128xf32>
    %149 = vector.extract_strided_slice %142 {offsets = [0, 128], sizes = [8, 128], strides = [1, 1]} : vector<8x640xf32> to vector<8x128xf32>
    %150 = arith.negf %149 : vector<8x128xf32>
    %151 = math.exp %150 : vector<8x128xf32>
    %cst_32 = arith.constant 1.000000e+00 : f32
    %152 = vector.broadcast %cst_32 : f32 to vector<8x128xf32>
    %153 = arith.addf %152, %151 : vector<8x128xf32>
    %154 = arith.divf %152, %153 : vector<8x128xf32>
    %155 = vector.extract_strided_slice %142 {offsets = [0, 256], sizes = [8, 128], strides = [1, 1]} : vector<8x640xf32> to vector<8x128xf32>
    %156 = arith.negf %155 : vector<8x128xf32>
    %157 = math.exp %156 : vector<8x128xf32>
    %cst_33 = arith.constant 1.000000e+00 : f32
    %158 = vector.broadcast %cst_33 : f32 to vector<8x128xf32>
    %159 = arith.addf %158, %157 : vector<8x128xf32>
    %160 = arith.divf %158, %159 : vector<8x128xf32>
    %161 = vector.extract_strided_slice %142 {offsets = [0, 384], sizes = [8, 128], strides = [1, 1]} : vector<8x640xf32> to vector<8x128xf32>
    %162 = arith.negf %161 : vector<8x128xf32>
    %163 = math.exp %162 : vector<8x128xf32>
    %cst_34 = arith.constant 1.000000e+00 : f32
    %164 = vector.broadcast %cst_34 : f32 to vector<8x128xf32>
    %165 = arith.addf %164, %163 : vector<8x128xf32>
    %166 = arith.divf %164, %165 : vector<8x128xf32>
    %167 = vector.extract_strided_slice %142 {offsets = [0, 512], sizes = [8, 128], strides = [1, 1]} : vector<8x640xf32> to vector<8x128xf32>
    %168 = math.tanh %167 : vector<8x128xf32>
    %169 = arith.mulf %148, %136 : vector<8x128xf32>
    %170 = arith.mulf %154, %138 : vector<8x128xf32>
    %171 = arith.addf %169, %170 : vector<8x128xf32>
    %172 = arith.mulf %160, %168 : vector<8x128xf32>
    %173 = arith.addf %171, %172 : vector<8x128xf32>
    %174 = math.tanh %173 : vector<8x128xf32>
    %175 = arith.mulf %166, %174 : vector<8x128xf32>
    %176 = vector.shape_cast %175 : vector<8x128xf32> to vector<1x8x128xf32>
    %177 = vector.shape_cast %176 : vector<1x8x128xf32> to vector<8x128xf32>
    %c0_35 = arith.constant 0 : index
    %c0_36 = arith.constant 0 : index
    %178 = vector.load %arg8[%c0_35, %c0_36] : memref<8x128xf32, #tpu.memory_space<vmem>>, vector<8x128xf32>
    tpu.vector_store %arg8[%c0_35, %c0_36], %177 {strides = array<i32>} : memref<8x128xf32, #tpu.memory_space<vmem>>, vector<8x128xf32>,
    return
  }
  func.func @transform_0(%arg0: i32) -> (i32, i32, i32, i32) {
    %c0_i32 = arith.constant 0 : i32
    %c0_i32_0 = arith.constant 0 : i32
    %c0_i32_1 = arith.constant 0 : i32
    %c0_i32_2 = arith.constant 0 : i32
    return %c0_i32, %arg0, %c0_i32_0, %c0_i32_1 : i32, i32, i32, i32
  }
  func.func @transform_1(%arg0: i32) -> (i32, i32, i32) {
    %c0_i32 = arith.constant 0 : i32
    %c0_i32_0 = arith.constant 0 : i32
    %c0_i32_1 = arith.constant 0 : i32
    return %c0_i32, %arg0, %c0_i32_0 : i32, i32, i32
  }
  func.func @transform_2(%arg0: i32) -> (i32, i32, i32) {
    %c0_i32 = arith.constant 0 : i32
    %c0_i32_0 = arith.constant 0 : i32
    %c0_i32_1 = arith.constant 0 : i32
    return %c0_i32, %arg0, %c0_i32_0 : i32, i32, i32
  }
  func.func @transform_3(%arg0: i32) -> (i32, i32) {
    %c0_i32 = arith.constant 0 : i32
    %c0_i32_0 = arith.constant 0 : i32
    %c0_i32_1 = arith.constant 0 : i32
    return %c0_i32, %c0_i32_0 : i32, i32
  }
  func.func @transform_4(%arg0: i32) -> (i32, i32) {
    %c0_i32 = arith.constant 0 : i32
    %c0_i32_0 = arith.constant 0 : i32
    %c0_i32_1 = arith.constant 0 : i32
    return %c0_i32, %c0_i32_0 : i32, i32
  }
  func.func @transform_5(%arg0: i32) -> (i32, i32) {
    %c0_i32 = arith.constant 0 : i32
    %c0_i32_0 = arith.constant 0 : i32
    %c0_i32_1 = arith.constant 0 : i32
    return %c0_i32, %c0_i32_0 : i32, i32
  }
  func.func @transform_6(%arg0: i32) -> (i32, i32) {
    %c0_i32 = arith.constant 0 : i32
    %c0_i32_0 = arith.constant 0 : i32
    %c0_i32_1 = arith.constant 0 : i32
    return %c0_i32, %c0_i32_0 : i32, i32
  }
  func.func @transform_7(%arg0: i32) -> (i32, i32) {
    %c0_i32 = arith.constant 0 : i32
    %c0_i32_0 = arith.constant 0 : i32
    return %arg0, %c0_i32 : i32, i32
  }
}

</mosaic_0001>

<bundles_post_ra>
// kernel: binary_tree_lstm_forward.1
= control target key start
LH: loop header
LB: loop body
LE: loop exit
PB: predicated region body
PF: predicated region fallthrough
CT: control target
= control target key end

     0   :  { %v98_v0 = vlaneseq  ;;  %v3655_v53 = vmov 0.0   ;;  %vm610_vm0 = vcmask 261120   ;;  %vm1152_vm1 = vcmask 1041409   ;;  %s5397_s1 = inlined_call_operand.vmem [shape: f32[8,8,8], index: 1, kind: input, shape index: {}]   ;;  %s5398_s3 = inlined_call_operand.vmem [shape: f32[32,384], index: 3, kind: input, shape index: {}]   ;;  %s5399_s0 = inlined_call_operand.vmem [shape: f32[8,8,8,32], index: 0, kind: input, shape index: {}]   ;;  %s5400_s5 = inlined_call_operand.vmem [shape: f32[256,640], index: 5, kind: input, shape index: {}]   ;;  %s5401_s4 = inlined_call_operand.vmem [shape: f32[1,384], index: 4, kind: input, shape index: {}]   ;;  %s5402_s2 = inlined_call_operand.vmem [shape: f32[8,8,128], index: 2, kind: input, shape index: {}]   ;;  %s5403_s6 = inlined_call_operand.vmem [shape: f32[1,640], index: 6, kind: input, shape index: {}]   ;;  %s5404_s7 = inlined_call_operand.vmem [shape: f32[8,128], index: 7, kind: output, shape index: {}]  }
   0x1   :  { %v90_v2 = vld [vmem:[%s5397_s1] sm:$0xff]  ;;  %v3720_v15 = vld [vmem:[%s5397_s1 + $0x8] sm:$0xff]  ;;  %v3744_v24 = vld [vmem:[%s5397_s1 + $0x30] sm:$0xff]  ;;  %1295 = vmatprep.mubr.f32.mxu0 %v3655_v53  ;;  %vm1154_vm2 = vcmask 1042434   ;;  %vm1156_vm3 = vcmask 1043459   ;;  %vm1158_vm4 = vcmask 1044484  }
   0x2   :  { %v99_v1 = vshrl.u32 %v98_v0, 7  ;;  %v3733_v20 = vld [vmem:[%s5397_s1 + $0x28] sm:$0xff]  ;;  %v3754_v28 = vld [vmem:[%s5397_s1 + $0x38] sm:$0xff]  ;;  %v1063_v35 = vld [vmem:[%s5398_s3 + $0x20] sm:$0xff]  ;;  %vm1160_vm5 = vcmask 1045509   ;;  %vm1162_vm6 = vcmask 1046534  }
   0x3   :  { %v1060_v34 = vld [vmem:[%s5398_s3 + $0x8] sm:$0xff]  ;;  %v1059_v37 = vld [vmem:[%s5398_s3] sm:$0xff]  ;;  %v1062_v38 = vld [vmem:[%s5398_s3 + $0x18] sm:$0xff]  ;;  %vm1164_vm7 = vcmask 1047559  }
   0x4   :  { %v3699_v3 = vsub.s32 2, %v99_v1  ;;  %v3701_v4 = vsub.s32 0, %v99_v1  ;;  %v3703_v5 = vsub.s32 3, %v99_v1  ;;  %v3705_v6 = vsub.s32 1, %v99_v1  ;;  %v1066_v42 = vld [vmem:[%s5398_s3 + $0x38] sm:$0xff]  ;;  %v1069_v43 = vld [vmem:[%s5398_s3 + $0x50] sm:$0xff] }
   0x5   :  { %v3711_v11 = vsub.s32 5, %v99_v1  ;;  %v3713_v12 = vsub.s32 4, %v99_v1  ;;  %v3726_v18 = vsub.s32 6, %v99_v1  ;;  %v3728_v19 = vsub.s32 7, %v99_v1  ;;  %v1065_v45 = vld [vmem:[%s5398_s3 + $0x30] sm:$0xff]  ;;  %v1068_v46 = vld [vmem:[%s5398_s3 + $0x48] sm:$0xff] }
   0x6   :  { %5500 = vst [vmem:[#allocation2_spill] sm:$0xff] %v3699_v3  ;;  %5501 = vst [vmem:[#allocation3_spill] sm:$0xff] %v3701_v4  ;;  %v115_v7 = vrot.slane %v90_v2, %v3699_v3  ;;  %v101_v8 = vrot.slane %v90_v2, %v3701_v4  ;;  %v122_v9 = vrot.slane %v90_v2, %v3703_v5  ;;  %v92_v50 = vld [vmem:[%s5397_s1 + $0x10] sm:$0xff]  ;;  %v93_v60 = vld [vmem:[%s5397_s1 + $0x18] sm:$0xff] }
   0x7   :  { %5502 = vst [vmem:[#allocation4_spill] sm:$0xff] %v3703_v5  ;;  %5503 = vst [vmem:[#allocation5_spill] sm:$0xff] %v3705_v6  ;;  %v108_v10 = vrot.slane %v90_v2, %v3705_v6  ;;  %v136_v13 = vrot.slane %v90_v2, %v3711_v11  ;;  %v129_v14 = vrot.slane %v90_v2, %v3713_v12 }
   0x8   :  { %117 = vbcast.lane.b32.xlu1 %v115_v7, 256  ;;  %103 = vbcast.lane.b32.xlu0 %v101_v8, 256  ;;  %5504 = vst [vmem:[#allocation6_spill] sm:$0xff] %v3713_v12  ;;  %v164_v16 = vrot.slane %v3720_v15, %v3705_v6  ;;  %v157_v17 = vrot.slane %v3720_v15, %v3701_v4  ;;  %v1061_v7 = vld [vmem:[%s5398_s3 + $0x10] sm:$0xff]  ;;  %v1064_v8 = vld [vmem:[%s5398_s3 + $0x28] sm:$0xff] }
   0x9   :  { %v416_v21 = vrot.slane %v3733_v20, %v3711_v11  ;;  %v430_v22 = vrot.slane %v3733_v20, %v3728_v19  ;;  %v423_v23 = vrot.slane %v3733_v20, %v3726_v18  ;;  %v472_v25 = vrot.slane %v3744_v24, %v3711_v11 }
   0xa   :  { %v171_v26 = vrot.slane %v3720_v15, %v3699_v3  ;;  %v143_v27 = vrot.slane %v90_v2, %v3726_v18  ;;  %v479_v29 = vrot.slane %v3744_v24, %v3726_v18  ;;  %v486_v30 = vrot.slane %v3744_v24, %v3728_v19 }
   0xb   :  { %v528_v31 = vrot.slane %v3754_v28, %v3711_v11  ;;  %v542_v32 = vrot.slane %v3754_v28, %v3728_v19  ;;  %v535_v33 = vrot.slane %v3754_v28, %v3726_v18  ;;  %v2922_v36 = vpack.c.bf16 %v1063_v35, %v1060_v34 }
   0xc   :  { %124 = vbcast.lane.b32.xlu1 %v122_v9, 256  ;;  %110 = vbcast.lane.b32.xlu0 %v108_v10, 256  ;;  %v178_v39 = vrot.slane %v3720_v15, %v3703_v5  ;;  %v150_v40 = vrot.slane %v90_v2, %v3728_v19  ;;  %v2924_v41 = vpack.c.bf16 %v1062_v38, %v1059_v37 }
   0xd   :  { %2923 = vmatprep.subr.bf16.mxu0 %v2922_v36  ;;  %v2926_v44 = vpack.c.bf16 %v1069_v43, %v1066_v42  ;;  %v192_v47 = vrot.slane %v3720_v15, %v3711_v11  ;;  %v185_v48 = vrot.slane %v3720_v15, %v3713_v12  ;;  %v2928_v49 = vpack.c.bf16 %v1068_v46, %v1065_v45 }
   0xe   :  { %2925 = vmatpush1.bf16.msra.mxu0 %v2924_v41  ;;  %v220_v51 = vrot.slane %v92_v50, %v3705_v6  ;;  %v213_v52 = vrot.slane %v92_v50, %v3701_v4  ;;  %v227_v54 = vrot.slane %v92_v50, %v3699_v3  ;;  %v199_v55 = vrot.slane %v3720_v15, %v3726_v18 }
   0xf   :  { %2927 = vmatprep.subr.bf16.mxu0 %v2926_v44  ;;  %v234_v56 = vrot.slane %v92_v50, %v3703_v5  ;;  %v206_v57 = vrot.slane %v3720_v15, %v3728_v19  ;;  %v248_v58 = vrot.slane %v92_v50, %v3711_v11  ;;  %v241_v59 = vrot.slane %v92_v50, %v3713_v12  ;;  %v1070_v15 = vld [vmem:[%s5398_s3 + $0x58] sm:$0xff] }
  0x10   :  { %138 = vbcast.lane.b32.xlu1 %v136_v13, 256  ;;  %131 = vbcast.lane.b32.xlu0 %v129_v14, 256  ;;  %v276_v61 = vrot.slane %v93_v60, %v3705_v6  ;;  %v269_v62 = vrot.slane %v93_v60, %v3701_v4  ;;  %v283_v63 = vrot.slane %v93_v60, %v3699_v3  ;;  %v1067_v14 = vld [vmem:[%s5398_s3 + $0x40] sm:$0xff] }
  0x11   :  { %v255_v0 = vrot.slane %v92_v50, %v3726_v18  ;;  %v290_v1 = vrot.slane %v93_v60, %v3703_v5  ;;  %v262_v2 = vrot.slane %v92_v50, %v3728_v19  ;;  %v2930_v9 = vpack.c.bf16 %v1064_v8, %v1061_v7  ;;  %v31_v8 = vld [vmem:[%s5399_s0 + $0x28] sm:$0xff] }
  0x12   :  { %2929 = vmatpush1.bf16.msra.mxu0 %v2928_v49  ;;  %v304_v10 = vrot.slane %v93_v60, %v3711_v11  ;;  %v297_v13 = vrot.slane %v93_v60, %v3713_v12  ;;  %v311_v35 = vrot.slane %v93_v60, %v3726_v18  ;;  %v318_v37 = vrot.slane %v93_v60, %v3728_v19 }
  0x13   :  { %2931 = vmatprep.subr.bf16.mxu1 %v2930_v9  ;;  %v388_v42 = vrot.slane %v3733_v20, %v3705_v6  ;;  %v381_v43 = vrot.slane %v3733_v20, %v3701_v4  ;;  %v402_v44 = vrot.slane %v3733_v20, %v3703_v5  ;;  %v395_v45 = vrot.slane %v3733_v20, %v3699_v3 }
  0x14   :  { %166 = vbcast.lane.b32.xlu1 %v164_v16, 256  ;;  %159 = vbcast.lane.b32.xlu0 %v157_v17, 256  ;;  %v94_v16 = vld [vmem:[%s5397_s1 + $0x20] sm:$0xff]  ;;  %v2934_v17 = vpack.c.bf16 %v1070_v15, %v1067_v14  ;;  %v409_v46 = vrot.slane %v3733_v20, %v3713_v12  ;;  %v451_v49 = vrot.slane %v3744_v24, %v3699_v3 }
  0x15   :  { %2933 = vmatpush3.bf16.msra.mxu1 %v2930_v9  ;;  %v339_v34 = vrot.slane %v94_v16, %v3699_v3  ;;  %v346_v36 = vrot.slane %v94_v16, %v3703_v5  ;;  %v360_v38 = vrot.slane %v94_v16, %v3711_v11  ;;  %v367_v41 = vrot.slane %v94_v16, %v3726_v18  ;;  %v30_v9 = vld [vmem:[%s5399_s0 + $0x20] sm:$0xff]  ;;  %v32_v18 = vld [vmem:[%s5399_s0 + $0x30] sm:$0xff] }
  0x16   :  { %2935 = vmatprep.subr.bf16.mxu1 %v2934_v17  ;;  %v465_v20 = vrot.slane %v3744_v24, %v3713_v12  ;;  %v507_v50 = vrot.slane %v3754_v28, %v3699_v3 }
  0x18   :  { %173 = vbcast.lane.b32.xlu1 %v171_v26, 256  ;;  %145 = vbcast.lane.b32.xlu0 %v143_v27, 256  ;;  %v332_v26 = vrot.slane %v94_v16, %v3705_v6  ;;  %v325_v27 = vrot.slane %v94_v16, %v3701_v4 }
  0x19   :  { %2937 = vmatpush3.bf16.msra.mxu1 %v2934_v17 }
  0x1c   :  { %180 = vbcast.lane.b32.xlu1 %v178_v39, 256  ;;  %152 = vbcast.lane.b32.xlu0 %v150_v40, 256  ;;  %v353_v39 = vrot.slane %v94_v16, %v3713_v12  ;;  %v374_v40 = vrot.slane %v94_v16, %v3728_v19 }
  0x20   :  { %194 = vbcast.lane.b32.xlu1 %v192_v47, 256  ;;  %187 = vbcast.lane.b32.xlu0 %v185_v48, 256  ;;  %v444_v47 = vrot.slane %v3744_v24, %v3705_v6  ;;  %v437_v48 = vrot.slane %v3744_v24, %v3701_v4 }
  0x24   :  { %222 = vbcast.lane.b32.xlu1 %v220_v51, 256  ;;  %215 = vbcast.lane.b32.xlu0 %v213_v52, 256  ;;  %v26_v51 = vld [vmem:[%s5399_s0] sm:$0xff]  ;;  %v514_v52 = vrot.slane %v3754_v28, %v3703_v5 }
  0x28   :  { %229 = vbcast.lane.b32.xlu1 %v227_v54, 256  ;;  %201 = vbcast.lane.b32.xlu0 %v199_v55, 256 }
  0x2c   :  { %236 = vbcast.lane.b32.xlu1 %v234_v56, 256  ;;  %208 = vbcast.lane.b32.xlu0 %v206_v57, 256 }
  0x30   :  { %250 = vbcast.lane.b32.xlu1 %v248_v58, 256  ;;  %243 = vbcast.lane.b32.xlu0 %v241_v59, 256  ;;  %v27_v58 = vld [vmem:[%s5399_s0 + $0x8] sm:$0xff]  ;;  %v521_v59 = vrot.slane %v3754_v28, %v3713_v12 }
  0x34   :  { %278 = vbcast.lane.b32.xlu1 %v276_v61, 256  ;;  %271 = vbcast.lane.b32.xlu0 %v269_v62, 256 }
  0x38   :  { %285 = vbcast.lane.b32.xlu1 %v283_v63, 256  ;;  %257 = vbcast.lane.b32.xlu0 %v255_v0, 256 }
  0x3c   :  { %292 = vbcast.lane.b32.xlu1 %v290_v1, 256  ;;  %264 = vbcast.lane.b32.xlu0 %v262_v2, 256 }
  0x40   :  { %306 = vbcast.lane.b32.xlu1 %v304_v10, 256  ;;  %299 = vbcast.lane.b32.xlu0 %v297_v13, 256 }
  0x44   :  { %334 = vbcast.lane.b32.xlu1 %v332_v26, 256  ;;  %327 = vbcast.lane.b32.xlu0 %v325_v27, 256 }
  0x48   :  { %341 = vbcast.lane.b32.xlu1 %v339_v34, 256  ;;  %313 = vbcast.lane.b32.xlu0 %v311_v35, 256 }
  0x4c   :  { %348 = vbcast.lane.b32.xlu1 %v346_v36, 256  ;;  %320 = vbcast.lane.b32.xlu0 %v318_v37, 256 }
  0x50   :  { %362 = vbcast.lane.b32.xlu1 %v360_v38, 256  ;;  %355 = vbcast.lane.b32.xlu0 %v353_v39, 256  ;;  %v35_v38 = vld [vmem:[%s5399_s0 + $0x48] sm:$0xff]  ;;  %v34_v39 = vld [vmem:[%s5399_s0 + $0x40] sm:$0xff] }
  0x54   :  { %376 = vbcast.lane.b32.xlu1 %v374_v40, 256  ;;  %369 = vbcast.lane.b32.xlu0 %v367_v41, 256 }
  0x58   :  { %390 = vbcast.lane.b32.xlu1 %v388_v42, 256  ;;  %383 = vbcast.lane.b32.xlu0 %v381_v43, 256 }
  0x5c   :  { %404 = vbcast.lane.b32.xlu1 %v402_v44, 256  ;;  %397 = vbcast.lane.b32.xlu0 %v395_v45, 256 }
  0x60   :  { %418 = vbcast.lane.b32.xlu1 %v416_v21, 256  ;;  %411 = vbcast.lane.b32.xlu0 %v409_v46, 256  ;;  %v458_v21 = vrot.slane %v3744_v24, %v3703_v5 }
  0x64   :  { %432 = vbcast.lane.b32.xlu1 %v430_v22, 256  ;;  %425 = vbcast.lane.b32.xlu0 %v423_v23, 256  ;;  %v500_v22 = vrot.slane %v3754_v28, %v3705_v6  ;;  %v493_v23 = vrot.slane %v3754_v28, %v3701_v4 }
  0x68   :  { %446 = vbcast.lane.b32.xlu1 %v444_v47, 256  ;;  %439 = vbcast.lane.b32.xlu0 %v437_v48, 256 }
  0x6c   :  { %460 = vbcast.lane.b32.xlu1 %v458_v21, 256  ;;  %453 = vbcast.lane.b32.xlu0 %v451_v49, 256 }
  0x70   :  { %474 = vbcast.lane.b32.xlu1 %v472_v25, 256  ;;  %467 = vbcast.lane.b32.xlu0 %v465_v20, 256  ;;  %v28_v25 = vld [vmem:[%s5399_s0 + $0x10] sm:$0xff] }
  0x74   :  { %502 = vbcast.lane.b32.xlu1 %v500_v22, 256  ;;  %495 = vbcast.lane.b32.xlu0 %v493_v23, 256  ;;  %v36_v23 = vld [vmem:[%s5399_s0 + $0x50] sm:$0xff] }
  0x78   :  { %509 = vbcast.lane.b32.xlu1 %v507_v50, 256  ;;  %481 = vbcast.lane.b32.xlu0 %v479_v29, 256  ;;  %v29_v29 = vld [vmem:[%s5399_s0 + $0x18] sm:$0xff] }
  0x7a   :  { %v118_v54 = vpop.permute.xlu1 %117  ;;  %v104_v55 = vpop.permute.xlu0 %103 }
  0x7b   :  { %v548_v56 = vmul.f32 %v118_v54, %v28_v25  ;;  %v546_v57 = vmul.f32 %v104_v55, %v26_v51 }
  0x7c   :  { %516 = vbcast.lane.b32.xlu1 %v514_v52, 256  ;;  %488 = vbcast.lane.b32.xlu0 %v486_v30, 256 }
  0x7d   :  { %v625_v60 = vsel %vm610_vm0, %v548_v56, 0.0  ;;  %v611_v61 = vsel %vm610_vm0, %v546_v57, 0.0 }
  0x7e   :  { %v626_v62 = vrot.slane %v625_v60, 4  ;;  %v612_v63 = vrot.slane %v611_v61, 4  ;;  %v125_v0 = vpop.permute.xlu1 %124  ;;  %v111_v24 = vpop.permute.xlu0 %110 }
  0x7f   :  { %v549_v30 = vmul.f32 %v125_v0, %v29_v29  ;;  %v547_v1 = vmul.f32 %v111_v24, %v27_v58 }
  0x80   :  { %v627_v2 = vadd.f32 %v626_v62, %v625_v60  ;;  %v613_v7 = vadd.f32 %v612_v63, %v611_v61  ;;  %530 = vbcast.lane.b32.xlu1 %v528_v31, 256  ;;  %523 = vbcast.lane.b32.xlu0 %v521_v59, 256 }
  0x81   :  { %v632_v10 = vsel %vm610_vm0, %v549_v30, 0.0  ;;  %v618_v13 = vsel %vm610_vm0, %v547_v1, 0.0 }
  0x82   :  { %v628_v14 = vrot.slane %v627_v2, 2  ;;  %v614_v15 = vrot.slane %v613_v7, 2  ;;  %v633_v16 = vrot.slane %v632_v10, 4  ;;  %v619_v17 = vrot.slane %v618_v13, 4  ;;  %v139_v26 = vpop.permute.xlu1 %138  ;;  %v132_v11 = vpop.permute.xlu0 %131 }
  0x83   :  { %v551_v31 = vmul.f32 %v139_v26, %v31_v8  ;;  %v550_v27 = vmul.f32 %v132_v11, %v30_v9 }
  0x84   :  { %v629_v34 = vadd.f32 %v628_v14, %v627_v2  ;;  %v615_v35 = vadd.f32 %v614_v15, %v613_v7  ;;  %v634_v36 = vadd.f32 %v633_v16, %v632_v10  ;;  %v620_v37 = vadd.f32 %v619_v17, %v618_v13  ;;  %544 = vbcast.lane.b32.xlu1 %v542_v32, 256  ;;  %v37_v7 = vld [vmem:[%s5399_s0 + $0x58] sm:$0xff] }
  0x85   :  { %v646_v40 = vsel %vm610_vm0, %v551_v31, 0.0  ;;  %v639_v41 = vsel %vm610_vm0, %v550_v27, 0.0  ;;  %537 = vbcast.lane.b32.xlu0 %v535_v33, 256  ;;  %v33_v16 = vld [vmem:[%s5399_s0 + $0x38] sm:$0xff] }
  0x86   :  { %v630_v42 = vrot.slane %v629_v34, 1  ;;  %v635_v19 = vrot.slane %v634_v36, 2  ;;  %v621_v32 = vrot.slane %v620_v37, 2  ;;  %v167_v43 = vpop.permute.xlu1 %166  ;;  %v160_v44 = vpop.permute.xlu0 %159  ;;  %v647_v45 = vrot.slane %v646_v40, 4 }
  0x87   :  { %v640_v46 = vrot.slane %v639_v41, 4  ;;  %v555_v47 = vmul.f32 %v167_v43, %v35_v38  ;;  %v554_v48 = vmul.f32 %v160_v44, %v34_v39  ;;  %v616_v49 = vrot.slane %v615_v35, 1 }
  0x88   :  { %v631_v21 = vadd.f32 %v630_v42, %v629_v34  ;;  %v636_v20 = vadd.f32 %v635_v19, %v634_v36  ;;  %v622_v22 = vadd.f32 %v621_v32, %v620_v37  ;;  %v648_v28 = vadd.f32 %v647_v45, %v646_v40  ;;  %v39_v36 = vld [vmem:[%s5399_s0 + $0x68] sm:$0xff]  ;;  %v38_v45 = vld [vmem:[%s5399_s0 + $0x60] sm:$0xff] }
  0x89   :  { %v641_v33 = vadd.f32 %v640_v46, %v639_v41  ;;  %v674_v50 = vsel %vm610_vm0, %v555_v47, 0.0  ;;  %v667_v25 = vsel %vm610_vm0, %v554_v48, 0.0  ;;  %v617_v61 = vadd.f32 %v616_v49, %v615_v35 }
  0x8a   :  { %v637_v51 = vrot.slane %v636_v20, 1  ;;  %v623_v52 = vrot.slane %v622_v22, 1  ;;  %v675_v54 = vrot.slane %v674_v50, 4  ;;  %v668_v55 = vrot.slane %v667_v25, 4  ;;  %v174_v56 = vpop.permute.xlu1 %173  ;;  %v146_v57 = vpop.permute.xlu0 %145 }
  0x8b   :  { %v649_v29 = vrot.slane %v648_v28, 2  ;;  %v642_v58 = vrot.slane %v641_v33, 2  ;;  %v556_v59 = vmul.f32 %v174_v56, %v36_v23  ;;  %v552_v60 = vmul.f32 %v146_v57, %v32_v18  ;;  %v43_v18 = vld [vmem:[%s5399_s0 + $0x88] sm:$0xff] }
  0x8c   :  { %v624_v62 = vadd.f32 %v623_v52, %v622_v22  ;;  %v676_v63 = vadd.f32 %v675_v54, %v674_v50  ;;  %v669_v0 = vadd.f32 %v668_v55, %v667_v25  ;;  %v3951_v17 = vadd.f32 %v637_v51, %v636_v20 }
  0x8d   :  { %v650_v24 = vadd.f32 %v649_v29, %v648_v28  ;;  %v643_v30 = vadd.f32 %v642_v58, %v641_v33  ;;  %v681_v1 = vsel %vm610_vm0, %v556_v59, 0.0  ;;  %v653_v2 = vsel %vm610_vm0, %v552_v60, 0.0  ;;  %v42_v29 = vld [vmem:[%s5399_s0 + $0x80] sm:$0xff] }
  0x8e   :  { %v1153_v8 = vsel %vm1152_vm1, %v624_v62, %v617_v61  ;;  %v677_v9 = vrot.slane %v676_v63, 2  ;;  %v670_v10 = vrot.slane %v669_v0, 2  ;;  %v682_v13 = vrot.slane %v681_v1, 4  ;;  %v181_v14 = vpop.permute.xlu1 %180  ;;  %v153_v15 = vpop.permute.xlu0 %152 }
  0x8f   :  { %v3954_v26 = vsel %vm1154_vm2, %v631_v21, %v1153_v8  ;;  %v654_v11 = vrot.slane %v653_v2, 4  ;;  %v557_v35 = vmul.f32 %v181_v14, %v37_v7  ;;  %v651_v37 = vrot.slane %v650_v24, 1 }
  0x90   :  { %v678_v31 = vadd.f32 %v677_v9, %v676_v63  ;;  %v671_v27 = vadd.f32 %v670_v10, %v669_v0  ;;  %v683_v34 = vadd.f32 %v682_v13, %v681_v1  ;;  %v644_v38 = vrot.slane %v643_v30, 1  ;;  %v44_v1 = vld [vmem:[%s5399_s0 + $0x90] sm:$0xff] }
  0x91   :  { %v655_v39 = vadd.f32 %v654_v11, %v653_v2  ;;  %v553_v40 = vmul.f32 %v153_v15, %v33_v16  ;;  %v688_v32 = vsel %vm610_vm0, %v557_v35, 0.0  ;;  %v3968_v51 = vadd.f32 %v651_v37, %v650_v24  ;;  %v40_v11 = vld [vmem:[%s5399_s0 + $0x70] sm:$0xff] }
  0x92   :  { %v679_v41 = vrot.slane %v678_v31, 1  ;;  %v672_v42 = vrot.slane %v671_v27, 1  ;;  %v684_v19 = vrot.slane %v683_v34, 2  ;;  %v195_v43 = vpop.permute.xlu1 %194  ;;  %v188_v44 = vpop.permute.xlu0 %187  ;;  %v689_v47 = vrot.slane %v688_v32, 4 }
  0x93   :  { %v656_v46 = vrot.slane %v655_v39, 2  ;;  %v660_v48 = vsel %vm610_vm0, %v553_v40, 0.0  ;;  %v559_v21 = vmul.f32 %v195_v43, %v39_v36  ;;  %v558_v25 = vmul.f32 %v188_v44, %v38_v45 }
  0x94   :  { %v680_v49 = vadd.f32 %v679_v41, %v678_v31  ;;  %v673_v20 = vadd.f32 %v672_v42, %v671_v27  ;;  %v685_v22 = vadd.f32 %v684_v19, %v683_v34  ;;  %v661_v23 = vrot.slane %v660_v48, 4 }
  0x95   :  { %v657_v28 = vadd.f32 %v656_v46, %v655_v39  ;;  %v690_v33 = vadd.f32 %v689_v47, %v688_v32  ;;  %v702_v50 = vsel %vm610_vm0, %v559_v21, 0.0  ;;  %v3973_v58 = vadd.f32 %v644_v38, %v643_v30  ;;  %v45_v47 = vld [vmem:[%s5399_s0 + $0x98] sm:$0xff] }
  0x96   :  { %v686_v52 = vrot.slane %v685_v22, 1  ;;  %v662_v54 = vadd.f32 %v661_v23, %v660_v48  ;;  %v703_v55 = vrot.slane %v702_v50, 4  ;;  %v223_v56 = vpop.permute.xlu1 %222  ;;  %v216_v57 = vpop.permute.xlu0 %215  ;;  %v695_v60 = vsel %vm610_vm0, %v558_v25, 0.0  ;;  %v41_v21 = vld [vmem:[%s5399_s0 + $0x78] sm:$0xff] }
  0x97   :  { %v691_v59 = vrot.slane %v690_v33, 2  ;;  %v563_v61 = vmul.f32 %v223_v56, %v43_v18  ;;  %v1166_v62 = vsel %vm1152_vm1, %v680_v49, %v673_v20  ;;  %v696_v24 = vrot.slane %v695_v60, 4 }
  0x98   :  { %v663_v63 = vrot.slane %v662_v54, 2  ;;  %v704_v0 = vadd.f32 %v703_v55, %v702_v50  ;;  %v658_v2 = vrot.slane %v657_v28, 1  ;;  %v562_v30 = vmul.f32 %v216_v57, %v42_v29 }
  0x99   :  { %v692_v7 = vadd.f32 %v691_v59, %v690_v33  ;;  %v730_v8 = vsel %vm610_vm0, %v563_v61, 0.0  ;;  %v687_v9 = vadd.f32 %v686_v52, %v685_v22  ;;  %v697_v14 = vadd.f32 %v696_v24, %v695_v60  ;;  %v47_v61 = vld [vmem:[%s5399_s0 + $0xa8] sm:$0xff] }
  0x9a   :  { %v664_v10 = vadd.f32 %v663_v63, %v662_v54  ;;  %v705_v13 = vrot.slane %v704_v0, 2  ;;  %v230_v15 = vpop.permute.xlu1 %229  ;;  %v202_v16 = vpop.permute.xlu0 %201  ;;  %v731_v27 = vrot.slane %v730_v8, 4  ;;  %v723_v34 = vsel %vm610_vm0, %v562_v30, 0.0 }
  0x9b   :  { %v693_v31 = vrot.slane %v692_v7, 1  ;;  %v564_v35 = vmul.f32 %v230_v15, %v44_v1  ;;  %v698_v38 = vrot.slane %v697_v14, 2  ;;  %v724_v39 = vrot.slane %v723_v34, 4 }
  0x9c   :  { %v665_v36 = vrot.slane %v664_v10, 1  ;;  %v706_v37 = vadd.f32 %v705_v13, %v704_v0  ;;  %v732_v41 = vadd.f32 %v731_v27, %v730_v8  ;;  %v560_v19 = vmul.f32 %v202_v16, %v40_v11 }
  0x9d   :  { %v694_v40 = vadd.f32 %v693_v31, %v692_v7  ;;  %v737_v42 = vsel %vm610_vm0, %v564_v35, 0.0  ;;  %v1167_v32 = vsel %vm1154_vm2, %v687_v9, %v1166_v62  ;;  %v659_v43 = vadd.f32 %v658_v2, %v657_v28 }
  0x9e   :  { %v699_v44 = vadd.f32 %v698_v38, %v697_v14  ;;  %v725_v45 = vadd.f32 %v724_v39, %v723_v34  ;;  %v237_v46 = vpop.permute.xlu1 %236  ;;  %v209_v48 = vpop.permute.xlu0 %208  ;;  %v666_v49 = vadd.f32 %v665_v36, %v664_v10  ;;  %v733_v20 = vrot.slane %v732_v41, 2 }
  0x9f   :  { %v738_v22 = vrot.slane %v737_v42, 4  ;;  %v709_v23 = vsel %vm610_vm0, %v560_v19, 0.0  ;;  %v3995_v18 = vsel %vm1156_vm3, %v694_v40, %v1167_v32  ;;  %v707_v28 = vrot.slane %v706_v37, 1 }
  0xa0   :  { %v726_v33 = vrot.slane %v725_v45, 2  ;;  %v710_v50 = vrot.slane %v709_v23, 4  ;;  %v734_v25 = vadd.f32 %v733_v20, %v732_v41  ;;  %v565_v54 = vmul.f32 %v237_v46, %v45_v47  ;;  %v52_v46 = vld [vmem:[%s5399_s0 + $0xd0] sm:$0xff] }
  0xa1   :  { %v739_v52 = vadd.f32 %v738_v22, %v737_v42  ;;  %v561_v55 = vmul.f32 %v209_v48, %v41_v21  ;;  %v700_v56 = vrot.slane %v699_v44, 1  ;;  %v1157_v59 = vsel %vm1156_vm3, %v3951_v17, %v3954_v26  ;;  %v46_v17 = vld [vmem:[%s5399_s0 + $0xa0] sm:$0xff]  ;;  %v51_v42 = vld [vmem:[%s5399_s0 + $0xc8] sm:$0xff] }
  0xa2   :  { %v727_v57 = vadd.f32 %v726_v33, %v725_v45  ;;  %v711_v29 = vadd.f32 %v710_v50, %v709_v23  ;;  %v251_v60 = vpop.permute.xlu1 %250  ;;  %v244_v62 = vpop.permute.xlu0 %243  ;;  %v735_v63 = vrot.slane %v734_v25, 1  ;;  %v744_v24 = vsel %vm610_vm0, %v565_v54, 0.0 }
  0xa3   :  { %v740_v0 = vrot.slane %v739_v52, 2  ;;  %v716_v1 = vsel %vm610_vm0, %v561_v55, 0.0  ;;  %v745_v8 = vrot.slane %v744_v24, 4  ;;  %v1159_v10 = vsel %vm1158_vm4, %v3973_v58, %v1157_v59 }
  0xa4   :  { %v728_v2 = vrot.slane %v727_v57, 1  ;;  %v712_v7 = vrot.slane %v711_v29, 2  ;;  %v717_v30 = vrot.slane %v716_v1, 4  ;;  %v736_v26 = vadd.f32 %v735_v63, %v734_v25 }
  0xa5   :  { %v741_v9 = vadd.f32 %v740_v0, %v739_v52  ;;  %v567_v13 = vmul.f32 %v251_v60, %v47_v61  ;;  %v746_v16 = vadd.f32 %v745_v8, %v744_v24  ;;  %v4010_v34 = vadd.f32 %v707_v28, %v706_v37  ;;  %v53_v8 = vld [vmem:[%s5399_s0 + $0xd8] sm:$0xff] }
  0xa6   :  { %v729_v14 = vadd.f32 %v728_v2, %v727_v57  ;;  %v713_v15 = vadd.f32 %v712_v7, %v711_v29  ;;  %v718_v11 = vadd.f32 %v717_v30, %v716_v1  ;;  %v279_v31 = vpop.permute.xlu1 %278  ;;  %v272_v27 = vpop.permute.xlu0 %271  ;;  %v566_v38 = vmul.f32 %v244_v62, %v46_v17  ;;  %v49_v30 = vld [vmem:[%s5399_s0 + $0xb8] sm:$0xff] }
  0xa7   :  { %v742_v35 = vrot.slane %v741_v9, 1  ;;  %v758_v36 = vsel %vm610_vm0, %v567_v13, 0.0  ;;  %v4013_v39 = vadd.f32 %v700_v56, %v699_v44  ;;  %v747_v40 = vrot.slane %v746_v16, 2  ;;  %v50_v44 = vld [vmem:[%s5399_s0 + $0xc0] sm:$0xff] }
  0xa8   :  { %v719_v41 = vrot.slane %v718_v11, 2  ;;  %v1161_v58 = vsel %vm1160_vm5, %v3968_v51, %v1159_v10  ;;  %v1173_v19 = vsel %vm1152_vm1, %v736_v26, %v729_v14  ;;  %v759_v32 = vrot.slane %v758_v36, 4 }
  0xa9   :  { %v1163_v37 = vsel %vm1162_vm6, %v659_v43, %v1161_v58  ;;  %v751_v45 = vsel %vm610_vm0, %v566_v38, 0.0  ;;  %v714_v51 = vrot.slane %v713_v15, 1  ;;  %v748_v47 = vadd.f32 %v747_v40, %v746_v16  ;;  %v48_v43 = vld [vmem:[%s5399_s0 + $0xb0] sm:$0xff] }
  0xaa   :  { %v720_v48 = vadd.f32 %v719_v41, %v718_v11  ;;  %v1165_v21 = vsel %vm1164_vm7, %v666_v49, %v1163_v37  ;;  %v286_v20 = vpop.permute.xlu1 %285  ;;  %v258_v22 = vpop.permute.xlu0 %257  ;;  %v743_v23 = vadd.f32 %v742_v35, %v741_v9  ;;  %v760_v28 = vadd.f32 %v759_v32, %v758_v36 }
  0xab   :  { %2713 = vmatmul.mubr.msk.f32.vlgmr.msra.gmra.mrb[0].mxu0 %vm610_vm0, %v1165_v21  ;;  %2910 = vmatprep.mubr.msk.f32.mxu1 %vm610_vm0, %v1165_v21  ;;  %v752_v33 = vrot.slane %v751_v45, 4  ;;  %v571_v50 = vmul.f32 %v279_v31, %v51_v42  ;;  %v749_v25 = vrot.slane %v748_v47, 1  ;;  %v570_v54 = vmul.f32 %v272_v27, %v50_v44 }
  0xac   :  { %v721_v52 = vrot.slane %v720_v48, 1  ;;  %v572_v55 = vmul.f32 %v286_v20, %v52_v46  ;;  %1301 = vmatprep.mubr.f32.mxu0 %v3655_v53  ;;  %v761_v49 = vrot.slane %v760_v28, 2  ;;  %v568_v29 = vmul.f32 %v258_v22, %v48_v43 }
  0xad   :  { %v753_v56 = vadd.f32 %v752_v33, %v751_v45  ;;  %v786_v57 = vsel %vm610_vm0, %v571_v50, 0.0  ;;  %v715_v59 = vadd.f32 %v714_v51, %v713_v15  ;;  %v750_v60 = vadd.f32 %v749_v25, %v748_v47 }
  0xae   :  { %v787_v61 = vrot.slane %v786_v57, 4  ;;  %v779_v62 = vsel %vm610_vm0, %v570_v54, 0.0  ;;  %v293_v63 = vpop.permute.xlu1 %292  ;;  %v265_v0 = vpop.permute.xlu0 %264  ;;  %v762_v24 = vadd.f32 %v761_v49, %v760_v28  ;;  %v793_v7 = vsel %vm610_vm0, %v572_v55, 0.0  ;;  %v54_v54 = vld [vmem:[%s5399_s0 + $0xe0] sm:$0xff] }
  0xaf   :  { %v754_v1 = vrot.slane %v753_v56, 2  ;;  %v780_v2 = vrot.slane %v779_v62, 4  ;;  %v1174_v17 = vsel %vm1154_vm2, %v743_v23, %v1173_v19  ;;  %v794_v9 = vrot.slane %v793_v7, 4 }
  0xb0   :  { %v788_v26 = vadd.f32 %v787_v61, %v786_v57  ;;  %v765_v10 = vsel %vm610_vm0, %v568_v29, 0.0  ;;  %v722_v13 = vadd.f32 %v721_v52, %v720_v48  ;;  %v573_v27 = vmul.f32 %v293_v63, %v53_v8  ;;  %v55_v52 = vld [vmem:[%s5399_s0 + $0xe8] sm:$0xff] }
  0xb1   :  { %v755_v14 = vadd.f32 %v754_v1, %v753_v56  ;;  %v781_v15 = vadd.f32 %v780_v2, %v779_v62  ;;  %v766_v16 = vrot.slane %v765_v10, 4  ;;  %v795_v31 = vadd.f32 %v794_v9, %v793_v7 }
  0xb2   :  { %v789_v11 = vrot.slane %v788_v26, 2  ;;  %v569_v35 = vmul.f32 %v265_v0, %v49_v30  ;;  %v307_v36 = vpop.permute.xlu1 %306  ;;  %v300_v38 = vpop.permute.xlu0 %299  ;;  %v4048_v40 = vsel %vm1156_vm3, %v750_v60, %v1174_v17  ;;  %v763_v41 = vrot.slane %v762_v24, 1  ;;  %v58_v30 = vld [vmem:[%s5399_s0 + $0x100] sm:$0xff]  ;;  %v60_v17 = vld [vmem:[%s5399_s0 + $0x110] sm:$0xff] }
  0xb3   :  { %v782_v58 = vrot.slane %v781_v15, 2  ;;  %v767_v42 = vadd.f32 %v766_v16, %v765_v10  ;;  %v796_v37 = vrot.slane %v795_v31, 2  ;;  %v800_v32 = vsel %vm610_vm0, %v573_v27, 0.0 }
  0xb4   :  { %v790_v19 = vadd.f32 %v789_v11, %v788_v26  ;;  %v772_v45 = vsel %vm610_vm0, %v569_v35, 0.0  ;;  %v756_v44 = vrot.slane %v755_v14, 1  ;;  %v801_v47 = vrot.slane %v800_v32, 4 }
  0xb5   :  { %v783_v46 = vadd.f32 %v782_v58, %v781_v15  ;;  %v768_v51 = vrot.slane %v767_v42, 2  ;;  %v797_v21 = vadd.f32 %v796_v37, %v795_v31  ;;  %v773_v20 = vrot.slane %v772_v45, 4 }
  0xb6   :  { %v791_v48 = vrot.slane %v790_v19, 1  ;;  %v1169_v22 = vsel %vm1158_vm4, %v4013_v39, %v3995_v18  ;;  %v335_v43 = vpop.permute.xlu1 %334  ;;  %v328_v23 = vpop.permute.xlu0 %327  ;;  %v802_v50 = vadd.f32 %v801_v47, %v800_v32  ;;  %v59_v39 = vld [vmem:[%s5399_s0 + $0x108] sm:$0xff]  ;;  %v4067_v57 = vadd.f32 %v763_v41, %v762_v24 }
  0xb7   :  { %v784_v28 = vrot.slane %v783_v46, 1  ;;  %v769_v33 = vadd.f32 %v768_v51, %v767_v42  ;;  %v1170_v25 = vsel %vm1160_vm5, %v4010_v34, %v1169_v22  ;;  %v798_v49 = vrot.slane %v797_v21, 1 }
  0xb8   :  { %v792_v55 = vadd.f32 %v791_v48, %v790_v19  ;;  %v774_v56 = vadd.f32 %v773_v20, %v772_v45  ;;  %v1171_v18 = vsel %vm1162_vm6, %v715_v59, %v1170_v25  ;;  %v803_v29 = vrot.slane %v802_v50, 2  ;;  %v61_v45 = vld [vmem:[%s5399_s0 + $0x118] sm:$0xff] }
  0xb9   :  { %v785_v34 = vadd.f32 %v784_v28, %v783_v46  ;;  %v1172_v60 = vsel %vm1164_vm7, %v722_v13, %v1171_v18  ;;  %v770_v61 = vrot.slane %v769_v33, 1  ;;  %v575_v63 = vmul.f32 %v307_v36, %v55_v52 }
  0xba   :  { %v775_v62 = vrot.slane %v774_v56, 2  ;;  %2714 = vmatmul.mubr.msk.f32.gmra.mrb[2].mxu0 %vm610_vm0, %v1172_v60  ;;  %2911 = vmatmul.mubr.msk.f32.vlgmr.msra.gmra.mrb[0].mxu1 %vm610_vm0, %v1172_v60  ;;  %v574_v0 = vmul.f32 %v300_v38, %v54_v54  ;;  %v342_v1 = vpop.permute.xlu1 %341  ;;  %v314_v59 = vpop.permute.xlu0 %313  ;;  %v4072_v2 = vadd.f32 %v756_v44, %v755_v14  ;;  %v799_v7 = vadd.f32 %v798_v49, %v797_v21  ;;  %v56_v14 = vld [vmem:[%s5399_s0 + $0xf0] sm:$0xff] }
  0xbb   :  { %v804_v8 = vadd.f32 %v803_v29, %v802_v50  ;;  %v579_v24 = vmul.f32 %v335_v43, %v59_v39  ;;  %1307 = vmatprep.mubr.f32.mxu0 %v3655_v53  ;;  %v1180_v26 = vsel %vm1152_vm1, %v792_v55, %v785_v34  ;;  %v814_v10 = vsel %vm610_vm0, %v575_v63, 0.0  ;;  %v57_v43 = vld [vmem:[%s5399_s0 + $0xf8] sm:$0xff] }
  0xbc   :  { %v776_v9 = vadd.f32 %v775_v62, %v774_v56  ;;  %v807_v13 = vsel %vm610_vm0, %v574_v0, 0.0  ;;  %v815_v16 = vrot.slane %v814_v10, 4  ;;  %v4088_v27 = vadd.f32 %v770_v61, %v769_v33 }
  0xbd   :  { %v805_v15 = vrot.slane %v804_v8, 1  ;;  %v808_v11 = vrot.slane %v807_v13, 4  ;;  %v842_v31 = vsel %vm610_vm0, %v579_v24, 0.0  ;;  %v578_v36 = vmul.f32 %v328_v23, %v58_v30 }
  0xbe   :  { %v843_v35 = vrot.slane %v842_v31, 4  ;;  %v580_v38 = vmul.f32 %v342_v1, %v60_v17  ;;  %v349_v41 = vpop.permute.xlu1 %348  ;;  %v321_v58 = vpop.permute.xlu0 %320  ;;  %v1181_v42 = vsel %vm1154_vm2, %v799_v7, %v1180_v26  ;;  %v816_v19 = vadd.f32 %v815_v16, %v814_v10 }
  0xbf   :  { %v809_v37 = vadd.f32 %v808_v11, %v807_v13  ;;  %v576_v32 = vmul.f32 %v314_v59, %v56_v14  ;;  %v777_v44 = vrot.slane %v776_v9, 1  ;;  %v835_v51 = vsel %vm610_vm0, %v578_v36, 0.0 }
  0xc0   :  { %v844_v46 = vadd.f32 %v843_v35, %v842_v31  ;;  %v849_v47 = vsel %vm610_vm0, %v580_v38, 0.0  ;;  %v806_v48 = vadd.f32 %v805_v15, %v804_v8  ;;  %v817_v21 = vrot.slane %v816_v19, 2  ;;  %v63_v8 = vld [vmem:[%s5399_s0 + $0x128] sm:$0xff] }
  0xc1   :  { %v810_v20 = vrot.slane %v809_v37, 2  ;;  %v836_v22 = vrot.slane %v835_v51, 4  ;;  %v850_v28 = vrot.slane %v849_v47, 4  ;;  %v821_v33 = vsel %vm610_vm0, %v576_v32, 0.0 }
  0xc2   :  { %v845_v23 = vrot.slane %v844_v46, 2  ;;  %v581_v50 = vmul.f32 %v349_v41, %v61_v45  ;;  %v363_v25 = vpop.permute.xlu1 %362  ;;  %v356_v52 = vpop.permute.xlu0 %355  ;;  %v818_v54 = vadd.f32 %v817_v21, %v816_v19  ;;  %v822_v56 = vrot.slane %v821_v33, 4  ;;  %v62_v19 = vld [vmem:[%s5399_s0 + $0x120] sm:$0xff]  ;;  %v64_v21 = vld [vmem:[%s5399_s0 + $0x130] sm:$0xff] }
  0xc3   :  { %v811_v55 = vadd.f32 %v810_v20, %v809_v37  ;;  %v837_v49 = vadd.f32 %v836_v22, %v835_v51  ;;  %v851_v39 = vadd.f32 %v850_v28, %v849_v47  ;;  %v577_v29 = vmul.f32 %v321_v58, %v57_v43  ;;  %v67_v20 = vld [vmem:[%s5399_s0 + $0x148] sm:$0xff] }
  0xc4   :  { %v846_v18 = vadd.f32 %v845_v23, %v844_v46  ;;  %v856_v34 = vsel %vm610_vm0, %v581_v50, 0.0  ;;  %v4102_v60 = vsel %vm1156_vm3, %v806_v48, %v1181_v42  ;;  %v778_v61 = vadd.f32 %v777_v44, %v776_v9 }
  0xc5   :  { %v838_v62 = vrot.slane %v837_v49, 2  ;;  %v823_v63 = vadd.f32 %v822_v56, %v821_v33  ;;  %v852_v1 = vrot.slane %v851_v39, 2  ;;  %v857_v59 = vrot.slane %v856_v34, 4 }
  0xc6   :  { %v847_v0 = vrot.slane %v846_v18, 1  ;;  %v828_v7 = vsel %vm610_vm0, %v577_v29, 0.0  ;;  %v377_v24 = vpop.permute.xlu1 %376  ;;  %v370_v30 = vpop.permute.xlu0 %369  ;;  %v819_v17 = vrot.slane %v818_v54, 1  ;;  %v812_v26 = vrot.slane %v811_v55, 1 }
  0xc7   :  { %v839_v10 = vadd.f32 %v838_v62, %v837_v49  ;;  %v824_v13 = vrot.slane %v823_v63, 2  ;;  %v853_v15 = vadd.f32 %v852_v1, %v851_v39  ;;  %v858_v9 = vadd.f32 %v857_v59, %v856_v34  ;;  %v66_v62 = vld [vmem:[%s5399_s0 + $0x140] sm:$0xff] }
  0xc8   :  { %v848_v14 = vadd.f32 %v847_v0, %v846_v18  ;;  %v829_v16 = vrot.slane %v828_v7, 4  ;;  %v1176_v35 = vsel %vm1158_vm4, %v4072_v2, %v4048_v40  ;;  %v583_v36 = vmul.f32 %v363_v25, %v63_v8  ;;  %v65_v2 = vld [vmem:[%s5399_s0 + $0x138] sm:$0xff]  ;;  %v68_v8 = vld [vmem:[%s5399_s0 + $0x150] sm:$0xff] }
  0xc9   :  { %v840_v11 = vrot.slane %v839_v10, 1  ;;  %v825_v31 = vadd.f32 %v824_v13, %v823_v63  ;;  %v854_v38 = vrot.slane %v853_v15, 1  ;;  %v859_v41 = vrot.slane %v858_v9, 2 }
  0xca   :  { %v830_v58 = vadd.f32 %v829_v16, %v828_v7  ;;  %v1177_v42 = vsel %vm1160_vm5, %v4067_v57, %v1176_v35  ;;  %v391_v37 = vpop.permute.xlu1 %390  ;;  %v384_v32 = vpop.permute.xlu0 %383  ;;  %v870_v40 = vsel %vm610_vm0, %v583_v36, 0.0  ;;  %v4131_v22 = vadd.f32 %v812_v26, %v811_v55  ;;  %v69_v7 = vld [vmem:[%s5399_s0 + $0x158] sm:$0xff] }
  0xcb   :  { %v841_v45 = vadd.f32 %v840_v11, %v839_v10  ;;  %v826_v44 = vrot.slane %v825_v31, 1  ;;  %v1178_v46 = vsel %vm1162_vm6, %v4088_v27, %v1177_v42  ;;  %v855_v51 = vadd.f32 %v854_v38, %v853_v15 }
  0xcc   :  { %v860_v47 = vadd.f32 %v859_v41, %v858_v9  ;;  %v831_v57 = vrot.slane %v830_v58, 2  ;;  %v1179_v48 = vsel %vm1164_vm7, %v778_v61, %v1178_v46  ;;  %v4129_v27 = vadd.f32 %v819_v17, %v818_v54 }
  0xcd   :  { %2715 = vmatmul.mubr.msk.f32.gmra.mrb[4].mxu0 %vm610_vm0, %v1179_v48  ;;  %2913 = vmatprep.mubr.msk.f32.mxu1 %vm610_vm0, %v1179_v48  ;;  %v871_v43 = vrot.slane %v870_v40, 4  ;;  %v582_v23 = vmul.f32 %v356_v52, %v62_v19  ;;  %v1187_v28 = vsel %vm1152_vm1, %v848_v14, %v841_v45  ;;  %v585_v25 = vmul.f32 %v377_v24, %v65_v2 }
  0xce   :  { %v861_v33 = vrot.slane %v860_v47, 1  ;;  %v832_v50 = vadd.f32 %v831_v57, %v830_v58  ;;  %v405_v49 = vpop.permute.xlu1 %404  ;;  %v398_v56 = vpop.permute.xlu0 %397  ;;  %1313 = vmatprep.mubr.f32.mxu0 %v3655_v53  ;;  %v584_v55 = vmul.f32 %v370_v30, %v64_v21  ;;  %v587_v39 = vmul.f32 %v391_v37, %v67_v20 }
  0xcf   :  { %v872_v18 = vadd.f32 %v871_v43, %v870_v40  ;;  %v863_v54 = vsel %vm610_vm0, %v582_v23, 0.0  ;;  %v1188_v34 = vsel %vm1154_vm2, %v855_v51, %v1187_v28  ;;  %v4139_v29 = vadd.f32 %v826_v44, %v825_v31 }
  0xd0   :  { %v864_v61 = vrot.slane %v863_v54, 4  ;;  %v884_v52 = vsel %vm610_vm0, %v585_v25, 0.0  ;;  %v877_v1 = vsel %vm610_vm0, %v584_v55, 0.0  ;;  %v898_v59 = vsel %vm610_vm0, %v587_v39, 0.0  ;;  %v71_v25 = vld [vmem:[%s5399_s0 + $0x168] sm:$0xff] }
  0xd1   :  { %v873_v63 = vrot.slane %v872_v18, 2  ;;  %v885_v0 = vrot.slane %v884_v52, 4  ;;  %v862_v24 = vadd.f32 %v861_v33, %v860_v47  ;;  %v833_v30 = vrot.slane %v832_v50, 1 }
  0xd2   :  { %v865_v17 = vadd.f32 %v864_v61, %v863_v54  ;;  %v878_v26 = vrot.slane %v877_v1, 4  ;;  %v419_v10 = vpop.permute.xlu1 %418  ;;  %v412_v13 = vpop.permute.xlu0 %411  ;;  %v899_v9 = vrot.slane %v898_v59, 4  ;;  %v586_v16 = vmul.f32 %v384_v32, %v66_v62 }
  0xd3   :  { %v874_v14 = vadd.f32 %v873_v63, %v872_v18  ;;  %v886_v15 = vadd.f32 %v885_v0, %v884_v52  ;;  %v589_v35 = vmul.f32 %v405_v49, %v69_v7  ;;  %v588_v36 = vmul.f32 %v398_v56, %v68_v8  ;;  %v70_v63 = vld [vmem:[%s5399_s0 + $0x160] sm:$0xff] }
  0xd4   :  { %v866_v11 = vrot.slane %v865_v17, 2  ;;  %v879_v31 = vadd.f32 %v878_v26, %v877_v1  ;;  %v900_v58 = vadd.f32 %v899_v9, %v898_v59  ;;  %v891_v42 = vsel %vm610_vm0, %v586_v16, 0.0 }
  0xd5   :  { %v875_v38 = vrot.slane %v874_v14, 1  ;;  %v887_v41 = vrot.slane %v886_v15, 2  ;;  %v892_v45 = vrot.slane %v891_v42, 4  ;;  %v912_v44 = vsel %vm610_vm0, %v589_v35, 0.0 }
  0xd6   :  { %v867_v19 = vadd.f32 %v866_v11, %v865_v17  ;;  %v880_v37 = vrot.slane %v879_v31, 2  ;;  %v433_v46 = vpop.permute.xlu1 %432  ;;  %v426_v40 = vpop.permute.xlu0 %425  ;;  %v1189_v2 = vsel %vm1156_vm3, %v862_v24, %v1188_v34  ;;  %v901_v32 = vrot.slane %v900_v58, 2 }
  0xd7   :  { %v888_v51 = vadd.f32 %v887_v41, %v886_v15  ;;  %v913_v47 = vrot.slane %v912_v44, 4  ;;  %v893_v21 = vadd.f32 %v892_v45, %v891_v42  ;;  %v905_v20 = vsel %vm610_vm0, %v588_v36, 0.0 }
  0xd8   :  { %v868_v57 = vrot.slane %v867_v19, 1  ;;  %v881_v48 = vadd.f32 %v880_v37, %v879_v31  ;;  %v902_v23 = vadd.f32 %v901_v32, %v900_v58  ;;  %v906_v33 = vrot.slane %v905_v20, 4  ;;  %v74_v37 = vld [vmem:[%s5399_s0 + $0x180] sm:$0xff] }
  0xd9   :  { %v889_v43 = vrot.slane %v888_v51, 1  ;;  %v914_v28 = vadd.f32 %v913_v47, %v912_v44  ;;  %v834_v49 = vadd.f32 %v833_v30, %v832_v50  ;;  %v876_v56 = vadd.f32 %v875_v38, %v874_v14  ;;  %v72_v30 = vld [vmem:[%s5399_s0 + $0x170] sm:$0xff] }
  0xda   :  { %v894_v18 = vrot.slane %v893_v21, 2  ;;  %v1183_v54 = vsel %vm1158_vm4, %v4131_v22, %v4102_v60  ;;  %v447_v55 = vpop.permute.xlu1 %446  ;;  %v440_v39 = vpop.permute.xlu0 %439  ;;  %v869_v34 = vadd.f32 %v868_v57, %v867_v19  ;;  %v882_v61 = vrot.slane %v881_v48, 1  ;;  %v73_v60 = vld [vmem:[%s5399_s0 + $0x178] sm:$0xff]  ;;  %v75_v19 = vld [vmem:[%s5399_s0 + $0x188] sm:$0xff] }
  0xdb   :  { %v915_v52 = vrot.slane %v914_v28, 2  ;;  %v907_v62 = vadd.f32 %v906_v33, %v905_v20  ;;  %v890_v0 = vadd.f32 %v889_v43, %v888_v51  ;;  %v1184_v50 = vsel %vm1160_vm5, %v4129_v27, %v1183_v54  ;;  %v76_v54 = vld [vmem:[%s5399_s0 + $0x190] sm:$0xff] }
  0xdc   :  { %v895_v1 = vadd.f32 %v894_v18, %v893_v21  ;;  %v591_v59 = vmul.f32 %v419_v10, %v71_v25  ;;  %v903_v22 = vrot.slane %v902_v23, 1  ;;  %v1185_v24 = vsel %vm1162_vm6, %v4139_v29, %v1184_v50  ;;  %v77_v18 = vld [vmem:[%s5399_s0 + $0x198] sm:$0xff] }
  0xdd   :  { %v916_v7 = vadd.f32 %v915_v52, %v914_v28  ;;  %v908_v8 = vrot.slane %v907_v62, 2  ;;  %v1186_v26 = vsel %vm1164_vm7, %v834_v49, %v1185_v24  ;;  %v590_v10 = vmul.f32 %v412_v13, %v70_v63 }
  0xde   :  { %v896_v17 = vrot.slane %v895_v1, 1  ;;  %v926_v27 = vsel %vm610_vm0, %v591_v59, 0.0  ;;  %v461_v14 = vpop.permute.xlu1 %460  ;;  %v454_v15 = vpop.permute.xlu0 %453  ;;  %2716 = vmatmul.mubr.msk.f32.gmra.mrb[6].mxu0 %vm610_vm0, %v1186_v26  ;;  %2914 = vmatmul.mubr.msk.f32.gmra.mrb[2].mxu1 %vm610_vm0, %v1186_v26  ;;  %v593_v29 = vmul.f32 %v433_v46, %v73_v60  ;;  %v883_v31 = vadd.f32 %v882_v61, %v881_v48 }
  0xdf   :  { %v917_v9 = vrot.slane %v916_v7, 1  ;;  %v909_v16 = vadd.f32 %v908_v8, %v907_v62  ;;  %v927_v11 = vrot.slane %v926_v27, 4  ;;  %v919_v35 = vsel %vm610_vm0, %v590_v10, 0.0  ;;  %1319 = vmatprep.mubr.f32.mxu0 %v3655_v53 }
  0xe0   :  { %v592_v36 = vmul.f32 %v426_v40, %v72_v30  ;;  %v1190_v38 = vsel %vm1158_vm4, %v869_v34, %v1189_v2  ;;  %v904_v41 = vadd.f32 %v903_v22, %v902_v23  ;;  %v920_v42 = vrot.slane %v919_v35, 4 }
  0xe1   :  { %v910_v13 = vrot.slane %v909_v16, 1  ;;  %v928_v58 = vadd.f32 %v927_v11, %v926_v27  ;;  %v897_v45 = vadd.f32 %v896_v17, %v895_v1  ;;  %v4189_v44 = vadd.f32 %v917_v9, %v916_v7  ;;  %v79_v17 = vld [vmem:[%s5399_s0 + $0x1a8] sm:$0xff] }
  0xe2   :  { %v940_v46 = vsel %vm610_vm0, %v593_v29, 0.0  ;;  %v933_v40 = vsel %vm610_vm0, %v592_v36, 0.0  ;;  %v475_v2 = vpop.permute.xlu1 %474  ;;  %v468_v51 = vpop.permute.xlu0 %467  ;;  %v921_v47 = vadd.f32 %v920_v42, %v919_v35  ;;  %v1191_v48 = vsel %vm1160_vm5, %v876_v56, %v1190_v38 }
  0xe3   :  { %v929_v32 = vrot.slane %v928_v58, 2  ;;  %v941_v57 = vrot.slane %v940_v46, 4  ;;  %v934_v21 = vrot.slane %v933_v40, 4  ;;  %v1192_v20 = vsel %vm1162_vm6, %v883_v31, %v1191_v48 }
  0xe4   :  { %v595_v43 = vmul.f32 %v447_v55, %v75_v19  ;;  %v594_v23 = vmul.f32 %v440_v39, %v74_v37  ;;  %v911_v28 = vadd.f32 %v910_v13, %v909_v16  ;;  %v922_v25 = vrot.slane %v921_v47, 2  ;;  %v83_v37 = vld [vmem:[%s5399_s0 + $0x1c8] sm:$0xff] }
  0xe5   :  { %v930_v33 = vadd.f32 %v929_v32, %v928_v58  ;;  %v942_v49 = vadd.f32 %v941_v57, %v940_v46  ;;  %v935_v34 = vadd.f32 %v934_v21, %v933_v40  ;;  %v1193_v56 = vsel %vm1164_vm7, %v890_v0, %v1192_v20  ;;  %v82_v57 = vld [vmem:[%s5399_s0 + $0x1c0] sm:$0xff] }
  0xe6   :  { %v954_v61 = vsel %vm610_vm0, %v595_v43, 0.0  ;;  %v947_v55 = vsel %vm610_vm0, %v594_v23, 0.0  ;;  %v503_v39 = vpop.permute.xlu1 %502  ;;  %v923_v62 = vadd.f32 %v922_v25, %v921_v47  ;;  %2717 = vmatmul.mubr.msk.f32.gmra.mrb[8].mxu0 %vm610_vm0, %v1193_v56  ;;  %2916 = vmatprep.mubr.msk.f32.mxu1 %vm610_vm0, %v1193_v56  ;;  %v496_v50 = vpop.permute.xlu0 %495  ;;  %v597_v22 = vmul.f32 %v461_v14, %v77_v18  ;;  %v78_v14 = vld [vmem:[%s5399_s0 + $0x1a0] sm:$0xff] }
  0xe7   :  { %v931_v52 = vrot.slane %v930_v33, 1  ;;  %v943_v63 = vrot.slane %v942_v49, 2  ;;  %v955_v1 = vrot.slane %v954_v61, 4  ;;  %v936_v59 = vrot.slane %v935_v34, 2  ;;  %1325 = vmatprep.mubr.f32.mxu0 %v3655_v53 }
  0xe8   :  { %v948_v60 = vrot.slane %v947_v55, 4  ;;  %v596_v7 = vmul.f32 %v454_v15, %v76_v54  ;;  %v1194_v0 = vsel %vm1152_vm1, %v904_v41, %v897_v45  ;;  %v924_v8 = vrot.slane %v923_v62, 1 }
  0xe9   :  { %v944_v24 = vadd.f32 %v943_v63, %v942_v49  ;;  %v956_v30 = vadd.f32 %v955_v1, %v954_v61  ;;  %v937_v26 = vadd.f32 %v936_v59, %v935_v34  ;;  %v968_v10 = vsel %vm610_vm0, %v597_v22, 0.0 }
  0xea   :  { %v949_v27 = vadd.f32 %v948_v60, %v947_v55  ;;  %v961_v9 = vsel %vm610_vm0, %v596_v7, 0.0  ;;  %v510_v15 = vpop.permute.xlu1 %509  ;;  %v1195_v16 = vsel %vm1154_vm2, %v911_v28, %v1194_v0  ;;  %v932_v11 = vadd.f32 %v931_v52, %v930_v33  ;;  %v4220_v45 = vpop.permute.xlu0 %481  ;;  %v84_v0 = vld [vmem:[%s5399_s0 + $0x1d0] sm:$0xff] }
  0xeb   :  { %v957_v29 = vrot.slane %v956_v30, 2  ;;  %v969_v31 = vrot.slane %v968_v10, 4  ;;  %v925_v35 = vadd.f32 %v924_v8, %v923_v62  ;;  %v962_v38 = vrot.slane %v961_v9, 4 }
  0xec   :  { %v950_v36 = vrot.slane %v949_v27, 2  ;;  %v599_v41 = vmul.f32 %v475_v2, %v79_v17  ;;  %v945_v13 = vrot.slane %v944_v24, 1  ;;  %v598_v19 = vmul.f32 %v468_v51, %v78_v14 }
  0xed   :  { %v958_v58 = vadd.f32 %v957_v29, %v956_v30  ;;  %v970_v42 = vadd.f32 %v969_v31, %v968_v10  ;;  %v938_v46 = vrot.slane %v937_v26, 1  ;;  %v963_v32 = vadd.f32 %v962_v38, %v961_v9 }
  0xee   :  { %v951_v40 = vadd.f32 %v950_v36, %v949_v27  ;;  %v982_v47 = vsel %vm610_vm0, %v599_v41, 0.0  ;;  %v975_v51 = vsel %vm610_vm0, %v598_v19, 0.0  ;;  %v603_v28 = vmul.f32 %v503_v39, %v83_v37  ;;  %v517_v33 = vpop.permute.xlu1 %516  ;;  %v489_v59 = vpop.permute.xlu0 %488  ;;  %v80_v36 = vld [vmem:[%s5399_s0 + $0x1b0] sm:$0xff]  ;;  %v86_v37 = vld [vmem:[%s5399_s0 + $0x1e0] sm:$0xff] }
  0xef   :  { %v959_v2 = vrot.slane %v958_v58, 1  ;;  %v971_v48 = vrot.slane %v970_v42, 2  ;;  %v983_v21 = vrot.slane %v982_v47, 4  ;;  %v964_v43 = vrot.slane %v963_v32, 2 }
  0xf0   :  { %v952_v20 = vrot.slane %v951_v40, 1  ;;  %v976_v23 = vrot.slane %v975_v51, 4  ;;  %v946_v25 = vadd.f32 %v945_v13, %v944_v24  ;;  %v602_v54 = vmul.f32 %v496_v50, %v82_v57 }
  0xf1   :  { %v972_v49 = vadd.f32 %v971_v48, %v970_v42  ;;  %v984_v18 = vadd.f32 %v983_v21, %v982_v47  ;;  %v939_v34 = vadd.f32 %v938_v46, %v937_v26  ;;  %v965_v56 = vadd.f32 %v964_v43, %v963_v32 }
  0xf2   :  { %v977_v61 = vadd.f32 %v976_v23, %v975_v51  ;;  %v1010_v55 = vsel %vm610_vm0, %v603_v28, 0.0  ;;  %v960_v52 = vadd.f32 %v959_v2, %v958_v58  ;;  %v1003_v1 = vsel %vm610_vm0, %v602_v54, 0.0  ;;  %v531_v9 = vpop.permute.xlu1 %530  ;;  %v524_v19 = vpop.permute.xlu0 %523 }
  0xf3   :  { %v985_v62 = vrot.slane %v984_v18, 2  ;;  %v1011_v63 = vrot.slane %v1010_v55, 4  ;;  %v953_v60 = vadd.f32 %v952_v20, %v951_v40  ;;  %v966_v22 = vrot.slane %v965_v56, 1 }
  0xf4   :  { %v978_v7 = vrot.slane %v977_v61, 2  ;;  %v1004_v39 = vrot.slane %v1003_v1, 4  ;;  %v973_v50 = vrot.slane %v972_v49, 1  ;;  %v1196_v30 = vsel %vm1156_vm3, %v4189_v44, %v1195_v16  ;;  %v85_v44 = vld [vmem:[%s5399_s0 + $0x1d8] sm:$0xff] }
  0xf5   :  { %v986_v8 = vadd.f32 %v985_v62, %v984_v18  ;;  %v1012_v24 = vadd.f32 %v1011_v63, %v1010_v55  ;;  %v967_v17 = vadd.f32 %v966_v22, %v965_v56  ;;  %v1197_v10 = vsel %vm1158_vm4, %v925_v35, %v1196_v30  ;;  %v81_v16 = vld [vmem:[%s5399_s0 + $0x1b8] sm:$0xff] }
  0xf6   :  { %v979_v26 = vadd.f32 %v978_v7, %v977_v61  ;;  %v1005_v27 = vadd.f32 %v1004_v39, %v1003_v1  ;;  %v1198_v29 = vsel %vm1160_vm5, %v932_v11, %v1197_v10  ;;  %v604_v31 = vmul.f32 %v510_v15, %v84_v0  ;;  %v87_v15 = vld [vmem:[%s5399_s0 + $0x1e8] sm:$0xff]  ;;  %v545_v28 = vpop.permute.xlu1 %544  ;;  %v88_v39 = vld [vmem:[%s5399_s0 + $0x1f0] sm:$0xff] }
  0xf7   :  { %v987_v14 = vrot.slane %v986_v8, 1  ;;  %v1201_v38 = vsel %vm1152_vm1, %v960_v52, %v953_v60  ;;  %v1013_v41 = vrot.slane %v1012_v24, 2  ;;  %v1199_v13 = vsel %vm1162_vm6, %v939_v34, %v1198_v29  ;;  %v538_v7 = vpop.permute.xlu0 %537 }
  0xf8   :  { %v4250_v11 = vadd.f32 %v973_v50, %v972_v49  ;;  %v980_v35 = vrot.slane %v979_v26, 1  ;;  %v1200_v58 = vsel %vm1164_vm7, %v946_v25, %v1199_v13  ;;  %v1017_v42 = vsel %vm610_vm0, %v604_v31, 0.0  ;;  %v89_v25 = vld [vmem:[%s5399_s0 + $0x1f8] sm:$0xff] }
  0xf9   :  { %v4258_v46 = vsel %vm1154_vm2, %v967_v17, %v1201_v38  ;;  %v1006_v40 = vrot.slane %v1005_v27, 2  ;;  %2718 = vmatmul.mubr.msk.f32.gmra.mrb[10].mxu0 %vm610_vm0, %v1200_v58  ;;  %2917 = vmatmul.mubr.msk.f32.gmra.mrb[4].mxu1 %vm610_vm0, %v1200_v58  ;;  %v1018_v32 = vrot.slane %v1017_v42, 4  ;;  %v600_v47 = vmul.f32 %v4220_v45, %v80_v36 }
  0xfa   :  { %v4263_v57 = vadd.f32 %v987_v14, %v986_v8  ;;  %v605_v2 = vmul.f32 %v517_v33, %v85_v44  ;;  %v601_v48 = vmul.f32 %v489_v59, %v81_v16  ;;  %v607_v21 = vmul.f32 %v531_v9, %v87_v15  ;;  %1331 = vmatprep.mubr.f32.mxu0 %v3655_v53 }
  0xfb   :  { %v1014_v51 = vadd.f32 %v1013_v41, %v1012_v24  ;;  %v1019_v20 = vadd.f32 %v1018_v32, %v1017_v42  ;;  %v989_v43 = vsel %vm610_vm0, %v600_v47, 0.0  ;;  %v606_v23 = vmul.f32 %v524_v19, %v86_v37 }
  0xfc   :  { %v981_v49 = vadd.f32 %v980_v35, %v979_v26  ;;  %v990_v18 = vrot.slane %v989_v43, 4  ;;  %v1024_v45 = vsel %vm610_vm0, %v605_v2, 0.0  ;;  %v996_v33 = vsel %vm610_vm0, %v601_v48, 0.0 }
  0xfd   :  { %v1007_v54 = vadd.f32 %v1006_v40, %v1005_v27  ;;  %v1020_v34 = vrot.slane %v1019_v20, 2  ;;  %v1025_v56 = vrot.slane %v1024_v45, 4  ;;  %v997_v61 = vrot.slane %v996_v33, 4 }
  0xfe   :  { %v991_v55 = vadd.f32 %v990_v18, %v989_v43  ;;  %v1038_v52 = vsel %vm610_vm0, %v607_v21, 0.0  ;;  %v1031_v62 = vsel %vm610_vm0, %v606_v23, 0.0  ;;  %v609_v63 = vmul.f32 %v545_v28, %v89_v25 }
  0xff   :  { %v1015_v1 = vrot.slane %v1014_v51, 1  ;;  %v1021_v59 = vadd.f32 %v1020_v34, %v1019_v20  ;;  %v1026_v60 = vadd.f32 %v1025_v56, %v1024_v45  ;;  %v998_v22 = vadd.f32 %v997_v61, %v996_v33 }
 0x100   :  { %v992_v0 = vrot.slane %v991_v55, 2  ;;  %v1039_v50 = vrot.slane %v1038_v52, 4  ;;  %v1032_v8 = vrot.slane %v1031_v62, 4  ;;  %v1052_v24 = vsel %vm610_vm0, %v609_v63, 0.0 }
 0x101   :  { %v1008_v30 = vrot.slane %v1007_v54, 1  ;;  %v1027_v17 = vrot.slane %v1026_v60, 2  ;;  %v999_v26 = vrot.slane %v998_v22, 2  ;;  %v1053_v27 = vrot.slane %v1052_v24, 4 }
 0x102   :  { %v993_v10 = vadd.f32 %v992_v0, %v991_v55  ;;  %v1040_v9 = vadd.f32 %v1039_v50, %v1038_v52  ;;  %v1033_v14 = vadd.f32 %v1032_v8, %v1031_v62  ;;  %v608_v29 = vmul.f32 %v538_v7, %v88_v39  ;;  %v1594_v7 = vld [vmem:[%s5400_s5 + $0x8] sm:$0xff]  ;;  %v1596_v39 = vld [vmem:[%s5400_s5 + $0x18] sm:$0xff]  ;;  %v1601_v50 = vld [vmem:[%s5400_s5 + $0x40] sm:$0xff] }
 0x103   :  { %v1022_v31 = vrot.slane %v1021_v59, 1  ;;  %v1028_v36 = vadd.f32 %v1027_v17, %v1026_v60  ;;  %v1000_v38 = vadd.f32 %v999_v26, %v998_v22  ;;  %v1054_v41 = vadd.f32 %v1053_v27, %v1052_v24  ;;  %v1593_v8 = vld [vmem:[%s5400_s5] sm:$0xff]  ;;  %v1598_v24 = vld [vmem:[%s5400_s5 + $0x28] sm:$0xff]  ;;  %v1595_v26 = vld [vmem:[%s5400_s5 + $0x10] sm:$0xff] }
 0x104   :  { %v994_v13 = vrot.slane %v993_v10, 1  ;;  %v1041_v44 = vrot.slane %v1040_v9, 2  ;;  %v1034_v16 = vrot.slane %v1033_v14, 2  ;;  %v1045_v15 = vsel %vm610_vm0, %v608_v29, 0.0  ;;  %v1600_v27 = vld [vmem:[%s5400_s5 + $0x38] sm:$0xff]  ;;  %v1606_v29 = vld [vmem:[%s5400_s5 + $0x68] sm:$0xff] }
 0x105   :  { %v1016_v35 = vadd.f32 %v1015_v1, %v1014_v51  ;;  %v1029_v58 = vrot.slane %v1028_v36, 1  ;;  %v1001_v42 = vrot.slane %v1000_v38, 1  ;;  %v1055_v19 = vrot.slane %v1054_v41, 2 }
 0x106   :  { %v995_v37 = vadd.f32 %v994_v13, %v993_v10  ;;  %v1042_v40 = vadd.f32 %v1041_v44, %v1040_v9  ;;  %v1035_v32 = vadd.f32 %v1034_v16, %v1033_v14  ;;  %v1046_v47 = vrot.slane %v1045_v15, 4  ;;  %v1604_v10 = vld [vmem:[%s5400_s5 + $0x58] sm:$0xff]  ;;  %v1609_v14 = vld [vmem:[%s5400_s5 + $0x80] sm:$0xff] }
 0x107   :  { %v1009_v2 = vadd.f32 %v1008_v30, %v1007_v54  ;;  %v1002_v48 = vadd.f32 %v1001_v42, %v1000_v38  ;;  %v1056_v21 = vadd.f32 %v1055_v19, %v1054_v41  ;;  %v1203_v20 = vsel %vm1156_vm3, %v4250_v11, %v4258_v46  ;;  %v1603_v41 = vld [vmem:[%s5400_s5 + $0x50] sm:$0xff]  ;;  %v1608_v13 = vld [vmem:[%s5400_s5 + $0x78] sm:$0xff]  ;;  %v1605_v44 = vld [vmem:[%s5400_s5 + $0x60] sm:$0xff] }
 0x108   :  { %v1023_v43 = vadd.f32 %v1022_v31, %v1021_v59  ;;  %v1036_v23 = vrot.slane %v1035_v32, 1  ;;  %v1047_v28 = vadd.f32 %v1046_v47, %v1045_v15  ;;  %v1204_v25 = vsel %vm1158_vm4, %v981_v49, %v1203_v20  ;;  %v1611_v31 = vld [vmem:[%s5400_s5 + $0x90] sm:$0xff]  ;;  %v1610_v15 = vld [vmem:[%s5400_s5 + $0x88] sm:$0xff]  ;;  %v1616_v19 = vld [vmem:[%s5400_s5 + $0xb8] sm:$0xff] }
 0x109   :  { %v1030_v51 = vadd.f32 %v1029_v58, %v1028_v36  ;;  %v1043_v18 = vrot.slane %v1042_v40, 1  ;;  %v1205_v45 = vsel %vm1160_vm5, %v4263_v57, %v1204_v25  ;;  %v1208_v56 = vsel %vm1152_vm1, %v1016_v35, %v1009_v2  ;;  %v1614_v58 = vld [vmem:[%s5400_s5 + $0xa8] sm:$0xff]  ;;  %v1619_v42 = vld [vmem:[%s5400_s5 + $0xd0] sm:$0xff]  ;;  %v1620_v20 = vld [vmem:[%s5400_s5 + $0xd8] sm:$0xff] }
 0x10a   :  { %v1037_v33 = vadd.f32 %v1036_v23, %v1035_v32  ;;  %v1048_v34 = vrot.slane %v1047_v28, 2  ;;  %v1206_v54 = vsel %vm1162_vm6, %v995_v37, %v1205_v45  ;;  %v1057_v61 = vrot.slane %v1056_v21, 1  ;;  %v1613_v32 = vld [vmem:[%s5400_s5 + $0xa0] sm:$0xff]  ;;  %v1618_v47 = vld [vmem:[%s5400_s5 + $0xc8] sm:$0xff]  ;;  %v1624_v23 = vld [vmem:[%s5400_s5 + $0xf8] sm:$0xff] }
 0x10b   :  { %v1207_v55 = vsel %vm1164_vm7, %v1002_v48, %v1206_v54  ;;  %v1209_v11 = vsel %vm1154_vm2, %v1023_v43, %v1208_v56  ;;  %v1044_v52 = vadd.f32 %v1043_v18, %v1042_v40  ;;  %v4319_v30 = vpack.c.bf16 %v1601_v50, %v1596_v39  ;;  %v1621_v40 = vld [vmem:[%s5400_s5 + $0xe0] sm:$0xff]  ;;  %v1626_v25 = vld [vmem:[%s5400_s5 + $0x108] sm:$0xff]  ;;  %v1631_v18 = vld [vmem:[%s5400_s5 + $0x130] sm:$0xff] }
 0x10c   :  { %v1049_v46 = vadd.f32 %v1048_v34, %v1047_v28  ;;  %2719 = vmatmul.mubr.msk.f32.gmra.mrb[12].mxu0 %vm610_vm0, %v1207_v55  ;;  %2919 = vmatprep.mubr.msk.f32.mxu1 %vm610_vm0, %v1207_v55  ;;  %v1210_v49 = vsel %vm1156_vm3, %v1030_v51, %v1209_v11  ;;  %v1058_v63 = vadd.f32 %v1057_v61, %v1056_v21  ;;  %v1615_v21 = vld [vmem:[%s5400_s5 + $0xb0] sm:$0xff]  ;;  %v1629_v28 = vld [vmem:[%s5400_s5 + $0x120] sm:$0xff]  ;;  %v1630_v61 = vld [vmem:[%s5400_s5 + $0x128] sm:$0xff] }
 0x10d   :  { %1337 = vmatprep.mubr.f32.mxu0 %v3655_v53  ;;  %v1211_v62 = vsel %vm1158_vm4, %v1037_v33, %v1210_v49  ;;  %v1599_v53 = vld [vmem:[%s5400_s5 + $0x30] sm:$0xff]  ;;  %v4321_v17 = vpack.c.bf16 %v1598_v24, %v1593_v8  ;;  %v4333_v9 = vpack.c.bf16 %v1600_v27, %v1595_v26  ;;  %3003 = vmatprep.subr.bf16.mxu1 %v4319_v30  ;;  %v1628_v33 = vld [vmem:[%s5400_s5 + $0x118] sm:$0xff]  ;;  %v1625_v56 = vld [vmem:[%s5400_s5 + $0x100] sm:$0xff] }
 0x10e   :  { %v1050_v57 = vrot.slane %v1049_v46, 1  ;;  %v1212_v59 = vsel %vm1160_vm5, %v1044_v52, %v1211_v62  ;;  %v4308_v0 = vpack.c.bf16 %v1599_v53, %v1594_v7  ;;  %v4346_v36 = vpack.c.bf16 %v1609_v14, %v1604_v10  ;;  %v1623_v45 = vld [vmem:[%s5400_s5 + $0xf0] sm:$0xff]  ;;  %v1634_v11 = vld [vmem:[%s5400_s5 + $0x148] sm:$0xff]  ;;  %v1636_v49 = vld [vmem:[%s5400_s5 + $0x158] sm:$0xff] }
 0x10f   :  { %v4348_v38 = vpack.c.bf16 %v1611_v31, %v1606_v29  ;;  %3005 = vmatpush1.bf16.msra.mxu1 %v4333_v9  ;;  %v4360_v16 = vpack.c.bf16 %v1608_v13, %v1603_v41  ;;  %v4367_v35 = vpack.c.bf16 %v1610_v15, %v1605_v44  ;;  %v4380_v37 = vpack.c.bf16 %v1619_v42, %v1614_v58  ;;  %v1633_v62 = vld [vmem:[%s5400_s5 + $0x140] sm:$0xff]  ;;  %v1644_v53 = vld [vmem:[%s5400_s5 + $0x198] sm:$0xff]  ;;  %v1646_v50 = vld [vmem:[%s5400_s5 + $0x1a8] sm:$0xff] }
 0x110   :  { %v1051_v1 = vadd.f32 %v1050_v57, %v1049_v46  ;;  %5505 = vst [vmem:[#allocation7_spill] sm:$0xff] %v4308_v0  ;;  %2939 = vmatprep.subr.bf16.mxu0 %v4308_v0  ;;  %v4391_v2 = vpack.c.bf16 %v1621_v40, %v1616_v19  ;;  %v4393_v48 = vpack.c.bf16 %v1618_v47, %v1613_v32  ;;  %v1639_v46 = vld [vmem:[%s5400_s5 + $0x170] sm:$0xff]  ;;  %v1641_v57 = vld [vmem:[%s5400_s5 + $0x180] sm:$0xff]  ;;  %v1648_v27 = vld [vmem:[%s5400_s5 + $0x1b8] sm:$0xff] }
 0x111   :  { %2941 = vmatpush1.bf16.msra.mxu0 %v4321_v17  ;;  %3007 = vmatprep.subr.bf16.mxu1 %v4348_v38  ;;  %v4402_v43 = vpack.c.bf16 %v1620_v20, %v1615_v21  ;;  %v4416_v51 = vpack.c.bf16 %v1629_v28, %v1624_v23  ;;  %v4427_v34 = vpack.c.bf16 %v1631_v18, %v1626_v25  ;;  %v1649_v39 = vld [vmem:[%s5400_s5 + $0x1c0] sm:$0xff]  ;;  %v1651_v24 = vld [vmem:[%s5400_s5 + $0x1d0] sm:$0xff]  ;;  %v1650_v31 = vld [vmem:[%s5400_s5 + $0x1c8] sm:$0xff] }
 0x112   :  { %v1213_v60 = vsel %vm1162_vm6, %v1051_v1, %v1212_v59  ;;  %2943 = vmatprep.subr.bf16.mxu0 %v4346_v36  ;;  %5506 = vst [vmem:[#allocation8_spill] sm:$0xff] %v4391_v2  ;;  %v4429_v54 = vpack.c.bf16 %v1628_v33, %v1623_v45  ;;  %v4438_v55 = vpack.c.bf16 %v1630_v61, %v1625_v56  ;;  %v1643_v26 = vld [vmem:[%s5400_s5 + $0x190] sm:$0xff]  ;;  %v1645_v29 = vld [vmem:[%s5400_s5 + $0x1a0] sm:$0xff]  ;;  %v1654_v13 = vld [vmem:[%s5400_s5 + $0x1e8] sm:$0xff] }
 0x113   :  { %v1214_v22 = vsel %vm1164_vm7, %v1058_v63, %v1213_v60  ;;  %3009 = vmatpush1.bf16.msra.mxu1 %v4367_v35  ;;  %5507 = vst [vmem:[#allocation9_spill] sm:$0xff] %v4402_v43  ;;  %5508 = vst [vmem:[#allocation10_spill] sm:$0xff] %v4427_v34  ;;  %v4452_v52 = vpack.c.bf16 %v1639_v46, %v1634_v11  ;;  %v1638_v63 = vld [vmem:[%s5400_s5 + $0x168] sm:$0xff]  ;;  %v4463_v1 = vpack.c.bf16 %v1641_v57, %v1636_v49  ;;  %v1635_v60 = vld [vmem:[%s5400_s5 + $0x150] sm:$0xff] }
 0x114   :  { %2720 = vmatmul.mubr.msk.f32.gmra.mrb[14].mxu0 %vm610_vm0, %v1214_v22  ;;  %2920 = vmatmul.mubr.msk.f32.gmra.mrb[6].mxu1 %vm610_vm0, %v1214_v22  ;;  %5509 = vst [vmem:[#allocation11_spill] sm:$0xff] %v4438_v55  ;;  %v4465_v59 = vpack.c.bf16 %v1638_v63, %v1633_v62  ;;  %v1640_v22 = vld [vmem:[%s5400_s5 + $0x178] sm:$0xff]  ;;  %v4488_v8 = vpack.c.bf16 %v1649_v39, %v1644_v53  ;;  %v1659_v44 = vld [vmem:[%s5400_s5 + $0x210] sm:$0xff]  ;;  %v1661_v42 = vld [vmem:[%s5400_s5 + $0x220] sm:$0xff] }
 0x115   :  { %2945 = vmatpush1.bf16.msra.mxu0 %v4360_v16  ;;  %3011 = vmatprep.subr.bf16.mxu1 %v4391_v2  ;;  %5510 = vst [vmem:[#allocation12_spill] sm:$0xff] %v4452_v52  ;;  %5511 = vst [vmem:[#allocation13_spill] sm:$0xff] %v4463_v1  ;;  %v4474_v7 = vpack.c.bf16 %v1640_v22, %v1635_v60  ;;  %v4499_v10 = vpack.c.bf16 %v1651_v24, %v1646_v50  ;;  %v1656_v15 = vld [vmem:[%s5400_s5 + $0x1f8] sm:$0xff]  ;;  %v1653_v19 = vld [vmem:[%s5400_s5 + $0x1e0] sm:$0xff] }
 0x116   :  { %2947 = vmatprep.subr.bf16.mxu0 %v4380_v37  ;;  %5512 = vst [vmem:[#allocation14_spill] sm:$0xff] %v4465_v59  ;;  %5514 = vst [vmem:[#allocation16_spill] sm:$0xff] %v4488_v8  ;;  %v4501_v14 = vpack.c.bf16 %v1648_v27, %v1643_v26  ;;  %v4510_v41 = vpack.c.bf16 %v1650_v31, %v1645_v29  ;;  %v4524_v58 = vpack.c.bf16 %v1659_v44, %v1654_v13  ;;  %v1658_v32 = vld [vmem:[%s5400_s5 + $0x208] sm:$0xff]  ;;  %v1655_v47 = vld [vmem:[%s5400_s5 + $0x1f0] sm:$0xff] }
 0x117   :  { %3013 = vmatpush1.bf16.msra.mxu1 %v4402_v43  ;;  %5513 = vst [vmem:[#allocation15_spill] sm:$0xff] %v4474_v7  ;;  %5515 = vst [vmem:[#allocation17_spill] sm:$0xff] %v4499_v10  ;;  %v4532_v40 = vpack.c.bf16 %v1661_v42, %v1656_v15  ;;  %v1660_v21 = vld [vmem:[%s5400_s5 + $0x218] sm:$0xff]  ;;  %v4544_v20 = vpack.c.bf16 %v1658_v32, %v1653_v19  ;;  %v1669_v25 = vld [vmem:[%s5400_s5 + $0x260] sm:$0xff] }
 0x118   :  { %3015 = vmatprep.subr.bf16.mxu1 %v4427_v34  ;;  %5516 = vst [vmem:[#allocation18_spill] sm:$0xff] %v4510_v41  ;;  %v4546_v23 = vpack.c.bf16 %v1660_v21, %v1655_v47  ;;  %v1664_v28 = vld [vmem:[%s5400_s5 + $0x238] sm:$0xff]  ;;  %v1666_v18 = vld [vmem:[%s5400_s5 + $0x248] sm:$0xff]  ;;  %v1671_v33 = vld [vmem:[%s5400_s5 + $0x270] sm:$0xff] }
 0x119   :  { %2949 = vmatpush1.bf16.msra.mxu0 %v4393_v48  ;;  %5517 = vst [vmem:[#allocation19_spill] sm:$0xff] %v4532_v40  ;;  %v4560_v45 = vpack.c.bf16 %v1669_v25, %v1664_v28  ;;  %v1663_v56 = vld [vmem:[%s5400_s5 + $0x230] sm:$0xff]  ;;  %v4568_v61 = vpack.c.bf16 %v1671_v33, %v1666_v18  ;;  %v1668_v11 = vld [vmem:[%s5400_s5 + $0x258] sm:$0xff]  ;;  %v1665_v46 = vld [vmem:[%s5400_s5 + $0x240] sm:$0xff] }
 0x11a   :  { %2951 = vmatprep.subr.bf16.mxu0 %v4416_v51  ;;  %5518 = vst [vmem:[#allocation20_spill] sm:$0xff] %v4546_v23  ;;  %v1670_v49 = vld [vmem:[%s5400_s5 + $0x268] sm:$0xff]  ;;  %v4580_v57 = vpack.c.bf16 %v1668_v11, %v1663_v56  ;;  %v1679_v60 = vld [vmem:[%s5400_s5 + $0x2b0] sm:$0xff]  ;;  %v1676_v22 = vld [vmem:[%s5400_s5 + $0x298] sm:$0xff] }
 0x11b   :  { %3017 = vmatpush1.bf16.msra.mxu1 %v4438_v55  ;;  %5519 = vst [vmem:[#allocation21_spill] sm:$0xff] %v4560_v45  ;;  %5520 = vst [vmem:[#allocation22_spill] sm:$0xff] %v4568_v61  ;;  %v4582_v62 = vpack.c.bf16 %v1670_v49, %v1665_v46  ;;  %v1674_v63 = vld [vmem:[%s5400_s5 + $0x288] sm:$0xff]  ;;  %v1681_v39 = vld [vmem:[%s5400_s5 + $0x2c0] sm:$0xff] }
 0x11c   :  { %3019 = vmatprep.subr.bf16.mxu1 %v4463_v1  ;;  %v4596_v53 = vpack.c.bf16 %v1679_v60, %v1674_v63  ;;  %v1673_v50 = vld [vmem:[%s5400_s5 + $0x280] sm:$0xff]  ;;  %v1678_v24 = vld [vmem:[%s5400_s5 + $0x2a8] sm:$0xff]  ;;  %v4607_v26 = vpack.c.bf16 %v1681_v39, %v1676_v22  ;;  %v1675_v29 = vld [vmem:[%s5400_s5 + $0x290] sm:$0xff] }
 0x11d   :  { %2953 = vmatpush1.bf16.msra.mxu0 %v4429_v54  ;;  %5521 = vst [vmem:[#allocation23_spill] sm:$0xff] %v4582_v62  ;;  %v4609_v27 = vpack.c.bf16 %v1678_v24, %v1673_v50  ;;  %v1680_v31 = vld [vmem:[%s5400_s5 + $0x2b8] sm:$0xff]  ;;  %v1689_v15 = vld [vmem:[%s5400_s5 + $0x300] sm:$0xff]  ;;  %v1686_v42 = vld [vmem:[%s5400_s5 + $0x2e8] sm:$0xff] }
 0x11e   :  { %2955 = vmatprep.subr.bf16.mxu0 %v4452_v52  ;;  %5522 = vst [vmem:[#allocation24_spill] sm:$0xff] %v4607_v26  ;;  %v4618_v13 = vpack.c.bf16 %v1680_v31, %v1675_v29  ;;  %v1684_v44 = vld [vmem:[%s5400_s5 + $0x2d8] sm:$0xff]  ;;  %v1691_v32 = vld [vmem:[%s5400_s5 + $0x310] sm:$0xff]  ;;  %v1685_v18 = vld [vmem:[%s5400_s5 + $0x2e0] sm:$0xff] }
 0x11f   :  { %3021 = vmatpush1.bf16.msra.mxu1 %v4474_v7  ;;  %v4632_v19 = vpack.c.bf16 %v1689_v15, %v1684_v44  ;;  %v1683_v47 = vld [vmem:[%s5400_s5 + $0x2d0] sm:$0xff]  ;;  %v1688_v21 = vld [vmem:[%s5400_s5 + $0x2f8] sm:$0xff]  ;;  %v4643_v28 = vpack.c.bf16 %v1691_v32, %v1686_v42  ;;  %v1690_v33 = vld [vmem:[%s5400_s5 + $0x308] sm:$0xff] }
 0x120   :  { %3023 = vmatprep.subr.bf16.mxu1 %v4499_v10  ;;  %5523 = vst [vmem:[#allocation25_spill] sm:$0xff] %v4618_v13  ;;  %v4645_v25 = vpack.c.bf16 %v1688_v21, %v1683_v47  ;;  %v4654_v56 = vpack.c.bf16 %v1690_v33, %v1685_v18  ;;  %v1694_v11 = vld [vmem:[%s5400_s5 + $0x328] sm:$0xff]  ;;  %v1699_v46 = vld [vmem:[%s5400_s5 + $0x350] sm:$0xff]  ;;  %v1696_v49 = vld [vmem:[%s5400_s5 + $0x338] sm:$0xff] }
 0x121   :  { %2957 = vmatpush1.bf16.msra.mxu0 %v4465_v59  ;;  %5524 = vst [vmem:[#allocation26_spill] sm:$0xff] %v4643_v28  ;;  %v4668_v63 = vpack.c.bf16 %v1699_v46, %v1694_v11  ;;  %v1701_v60 = vld [vmem:[%s5400_s5 + $0x360] sm:$0xff]  ;;  %v1698_v39 = vld [vmem:[%s5400_s5 + $0x348] sm:$0xff]  ;;  %v1695_v29 = vld [vmem:[%s5400_s5 + $0x330] sm:$0xff] }
 0x122   :  { %2959 = vmatprep.subr.bf16.mxu0 %v4488_v8  ;;  %5525 = vst [vmem:[#allocation27_spill] sm:$0xff] %v4645_v25  ;;  %5526 = vst [vmem:[#allocation28_spill] sm:$0xff] %v4654_v56  ;;  %v1693_v22 = vld [vmem:[%s5400_s5 + $0x320] sm:$0xff]  ;;  %v4679_v50 = vpack.c.bf16 %v1701_v60, %v1696_v49  ;;  %v1700_v31 = vld [vmem:[%s5400_s5 + $0x358] sm:$0xff] }
 0x123   :  { %3025 = vmatpush1.bf16.msra.mxu1 %v4510_v41  ;;  %5527 = vst [vmem:[#allocation29_spill] sm:$0xff] %v4668_v63  ;;  %v4681_v24 = vpack.c.bf16 %v1698_v39, %v1693_v22  ;;  %v4690_v44 = vpack.c.bf16 %v1700_v31, %v1695_v29  ;;  %v1704_v15 = vld [vmem:[%s5400_s5 + $0x378] sm:$0xff]  ;;  %v1709_v42 = vld [vmem:[%s5400_s5 + $0x3a0] sm:$0xff]  ;;  %v1706_v32 = vld [vmem:[%s5400_s5 + $0x388] sm:$0xff] }
 0x124   :  { %3027 = vmatprep.subr.bf16.mxu1 %v4532_v40  ;;  %5528 = vst [vmem:[#allocation30_spill] sm:$0xff] %v4679_v50  ;;  %v4704_v47 = vpack.c.bf16 %v1709_v42, %v1704_v15  ;;  %v1711_v21 = vld [vmem:[%s5400_s5 + $0x3b0] sm:$0xff]  ;;  %v1708_v33 = vld [vmem:[%s5400_s5 + $0x398] sm:$0xff]  ;;  %v1705_v49 = vld [vmem:[%s5400_s5 + $0x380] sm:$0xff] }
 0x125   :  { %2961 = vmatpush1.bf16.msra.mxu0 %v4501_v14  ;;  %5529 = vst [vmem:[#allocation31_spill] sm:$0xff] %v4681_v24  ;;  %5530 = vst [vmem:[#allocation32_spill] sm:$0xff] %v4690_v44  ;;  %v1703_v18 = vld [vmem:[%s5400_s5 + $0x370] sm:$0xff]  ;;  %v4715_v11 = vpack.c.bf16 %v1711_v21, %v1706_v32  ;;  %v1710_v60 = vld [vmem:[%s5400_s5 + $0x3a8] sm:$0xff] }
 0x126   :  { %2963 = vmatprep.subr.bf16.mxu0 %v4524_v58  ;;  %5531 = vst [vmem:[#allocation33_spill] sm:$0xff] %v4704_v47  ;;  %v4717_v46 = vpack.c.bf16 %v1708_v33, %v1703_v18  ;;  %v4726_v22 = vpack.c.bf16 %v1710_v60, %v1705_v49  ;;  %v1714_v39 = vld [vmem:[%s5400_s5 + $0x3c8] sm:$0xff]  ;;  %v1719_v29 = vld [vmem:[%s5400_s5 + $0x3f0] sm:$0xff]  ;;  %v1716_v31 = vld [vmem:[%s5400_s5 + $0x3d8] sm:$0xff] }
 0x127   :  { %3029 = vmatpush1.bf16.msra.mxu1 %v4546_v23  ;;  %5532 = vst [vmem:[#allocation34_spill] sm:$0xff] %v4715_v11  ;;  %v4740_v15 = vpack.c.bf16 %v1719_v29, %v1714_v39  ;;  %v1721_v42 = vld [vmem:[%s5400_s5 + $0x400] sm:$0xff]  ;;  %v1718_v21 = vld [vmem:[%s5400_s5 + $0x3e8] sm:$0xff]  ;;  %v1715_v49 = vld [vmem:[%s5400_s5 + $0x3d0] sm:$0xff] }
 0x128   :  { %3031 = vmatprep.subr.bf16.mxu1 %v4568_v61  ;;  %5533 = vst [vmem:[#allocation35_spill] sm:$0xff] %v4717_v46  ;;  %5534 = vst [vmem:[#allocation36_spill] sm:$0xff] %v4726_v22  ;;  %v1713_v32 = vld [vmem:[%s5400_s5 + $0x3c0] sm:$0xff]  ;;  %v4751_v18 = vpack.c.bf16 %v1721_v42, %v1716_v31  ;;  %v1720_v60 = vld [vmem:[%s5400_s5 + $0x3f8] sm:$0xff] }
 0x129   :  { %2965 = vmatpush1.bf16.msra.mxu0 %v4544_v20  ;;  %5535 = vst [vmem:[#allocation37_spill] sm:$0xff] %v4740_v15  ;;  %v4753_v33 = vpack.c.bf16 %v1718_v21, %v1713_v32  ;;  %v4762_v39 = vpack.c.bf16 %v1720_v60, %v1715_v49  ;;  %v1724_v29 = vld [vmem:[%s5400_s5 + $0x418] sm:$0xff]  ;;  %v1729_v31 = vld [vmem:[%s5400_s5 + $0x440] sm:$0xff]  ;;  %v1726_v42 = vld [vmem:[%s5400_s5 + $0x428] sm:$0xff] }
 0x12a   :  { %2967 = vmatprep.subr.bf16.mxu0 %v4560_v45  ;;  %5536 = vst [vmem:[#allocation38_spill] sm:$0xff] %v4751_v18  ;;  %v4776_v32 = vpack.c.bf16 %v1729_v31, %v1724_v29  ;;  %v1731_v21 = vld [vmem:[%s5400_s5 + $0x450] sm:$0xff]  ;;  %v1728_v60 = vld [vmem:[%s5400_s5 + $0x438] sm:$0xff]  ;;  %v1725_v29 = vld [vmem:[%s5400_s5 + $0x420] sm:$0xff] }
 0x12b   :  { %3033 = vmatpush1.bf16.msra.mxu1 %v4582_v62  ;;  %5537 = vst [vmem:[#allocation39_spill] sm:$0xff] %v4753_v33  ;;  %5538 = vst [vmem:[#allocation40_spill] sm:$0xff] %v4762_v39  ;;  %v1723_v49 = vld [vmem:[%s5400_s5 + $0x410] sm:$0xff]  ;;  %v4787_v12 = vpack.c.bf16 %v1731_v21, %v1726_v42  ;;  %v1730_v31 = vld [vmem:[%s5400_s5 + $0x448] sm:$0xff] }
 0x12c   :  { %3035 = vmatprep.subr.bf16.mxu1 %v4607_v26  ;;  %5539 = vst [vmem:[#allocation41_spill] sm:$0xff] %v4776_v32  ;;  %v4789_v5 = vpack.c.bf16 %v1728_v60, %v1723_v49  ;;  %v1734_v42 = vld [vmem:[%s5400_s5 + $0x468] sm:$0xff]  ;;  %v1739_v21 = vld [vmem:[%s5400_s5 + $0x490] sm:$0xff]  ;;  %v1736_v60 = vld [vmem:[%s5400_s5 + $0x478] sm:$0xff] }
 0x12d   :  { %2969 = vmatpush1.bf16.msra.mxu0 %v4580_v57  ;;  %5540 = vst [vmem:[#allocation42_spill] sm:$0xff] %v4787_v12  ;;  %v4809_v49 = vpack.c.bf16 %v1739_v21, %v1734_v42  ;;  %v1735_v42 = vld [vmem:[%s5400_s5 + $0x470] sm:$0xff]  ;;  %v1740_v21 = vld [vmem:[%s5400_s5 + $0x498] sm:$0xff] }
 0x12e   :  { %2971 = vmatprep.subr.bf16.mxu0 %v4596_v53  ;;  %5541 = vst [vmem:[#allocation43_spill] sm:$0xff] %v4789_v5 }
 0x12f   :  { %3037 = vmatpush1.bf16.msra.mxu1 %v4618_v13  ;;  %5543 = vst [vmem:[#allocation45_spill] sm:$0xff] %v4809_v49 }
 0x130   :  { %3039 = vmatprep.subr.bf16.mxu1 %v4643_v28 }
 0x131   :  { %2973 = vmatpush1.bf16.msra.mxu0 %v4609_v27 }
 0x132   :  { %2975 = vmatprep.subr.bf16.mxu0 %v4632_v19 }
 0x133   :  { %3041 = vmatpush1.bf16.msra.mxu1 %v4654_v56 }
 0x134   :  { %3043 = vmatprep.subr.bf16.mxu1 %v4679_v50 }
 0x135   :  { %2977 = vmatpush1.bf16.msra.mxu0 %v4645_v25 }
 0x136   :  { %2979 = vmatprep.subr.bf16.mxu0 %v4668_v63 }
 0x137   :  { %3045 = vmatpush1.bf16.msra.mxu1 %v4690_v44 }
 0x138   :  { %3047 = vmatprep.subr.bf16.mxu1 %v4715_v11  ;;  %v1746_v11 = vld [vmem:[%s5400_s5 + $0x4c8] sm:$0xff] }
 0x139   :  { %2981 = vmatpush1.bf16.msra.mxu0 %v4681_v24 }
 0x13a   :  { %2983 = vmatprep.subr.bf16.mxu0 %v4704_v47 }
 0x13b   :  { %3049 = vmatpush1.bf16.msra.mxu1 %v4726_v22  ;;  %v4834_v22 = vpack.c.bf16 %v1740_v21, %v1735_v42  ;;  %v1743_v42 = vld [vmem:[%s5400_s5 + $0x4b0] sm:$0xff]  ;;  %v1748_v21 = vld [vmem:[%s5400_s5 + $0x4d8] sm:$0xff] }
 0x13c   :  { %3051 = vmatprep.subr.bf16.mxu1 %v4751_v18  ;;  %v4861_v44 = vpack.c.bf16 %v1748_v21, %v1743_v42 }
 0x13d   :  { %2985 = vmatpush1.bf16.msra.mxu0 %v4717_v46  ;;  %5546 = vst [vmem:[#allocation48_spill] sm:$0xff] %v4834_v22 }
 0x13e   :  { %2987 = vmatprep.subr.bf16.mxu0 %v4740_v15  ;;  %5549 = vst [vmem:[#allocation51_spill] sm:$0xff] %v4861_v44 }
 0x13f   :  { %3053 = vmatpush1.bf16.msra.mxu1 %v4762_v39  ;;  %v4798_v39 = vpack.c.bf16 %v1730_v31, %v1725_v29  ;;  %v1741_v29 = vld [vmem:[%s5400_s5 + $0x4a0] sm:$0xff] }
 0x140   :  { %3055 = vmatprep.subr.bf16.mxu1 %v4787_v12  ;;  %v1733_v31 = vld [vmem:[%s5400_s5 + $0x460] sm:$0xff]  ;;  %v4820_v12 = vpack.c.bf16 %v1741_v29, %v1736_v60  ;;  %v1744_v60 = vld [vmem:[%s5400_s5 + $0x4b8] sm:$0xff] }
 0x141   :  { %2989 = vmatpush1.bf16.msra.mxu0 %v4753_v33  ;;  %5542 = vst [vmem:[#allocation44_spill] sm:$0xff] %v4798_v39  ;;  %v1749_v29 = vld [vmem:[%s5400_s5 + $0x4e0] sm:$0xff] }
 0x142   :  { %2991 = vmatprep.subr.bf16.mxu0 %v4776_v32  ;;  %5544 = vst [vmem:[#allocation46_spill] sm:$0xff] %v4820_v12 }
 0x143   :  { %3057 = vmatpush1.bf16.msra.mxu1 %v4798_v39  ;;  %v1738_v39 = vld [vmem:[%s5400_s5 + $0x488] sm:$0xff] }
 0x144   :  { %v4832_v18 = vpack.c.bf16 %v1738_v39, %v1733_v31  ;;  %3059 = vmatprep.subr.bf16.mxu1 %v4820_v12  ;;  %v4848_v39 = vpack.c.bf16 %v1749_v29, %v1744_v60  ;;  %v1751_v31 = vld [vmem:[%s5400_s5 + $0x4f0] sm:$0xff]  ;;  %v1745_v60 = vld [vmem:[%s5400_s5 + $0x4c0] sm:$0xff]  ;;  %v1750_v29 = vld [vmem:[%s5400_s5 + $0x4e8] sm:$0xff] }
 0x145   :  { %2993 = vmatpush1.bf16.msra.mxu0 %v4789_v5  ;;  %v4859_v12 = vpack.c.bf16 %v1751_v31, %v1746_v11  ;;  %v1071_v11 = vld [vmem:[%s5401_s4] sm:$0x7] }
 0x146   :  { %2995 = vmatprep.subr.bf16.mxu0 %v4809_v49  ;;  %5545 = vst [vmem:[#allocation47_spill] sm:$0xff] %v4832_v18  ;;  %5547 = vst [vmem:[#allocation49_spill] sm:$0xff] %v4848_v39  ;;  %v4880_v31 = vrot.slane %v1071_v11, %v3701_v4  ;;  %v4893_v56 = vrot.slane %v1071_v11, %v3699_v3  ;;  %v4916_v10 = vrot.slane %v1071_v11, %v3705_v6 }
 0x147   :  { %3061 = vmatpush1.bf16.msra.mxu1 %v4834_v22  ;;  %5548 = vst [vmem:[#allocation50_spill] sm:$0xff] %v4859_v12  ;;  %v4870_v22 = vpack.c.bf16 %v1750_v29, %v1745_v60 }
 0x148   :  { %3063 = vmatprep.subr.bf16.mxu1 %v4859_v12  ;;  %v1677_v12 = vld [vmem:[%s5400_s5 + $0x2a0] sm:$0xff] }
 0x149   :  { %2997 = vmatpush1.bf16.msra.mxu0 %v4832_v18  ;;  %5550 = vst [vmem:[#allocation52_spill] sm:$0xff] %v4870_v22 }
 0x14a   :  { %2999 = vmatprep.subr.bf16.mxu0 %v4848_v39 }
 0x14b   :  { %3065 = vmatpush1.bf16.msra.mxu1 %v4870_v22 }
 0x14c   :  { %3099 = vmatprep.subr.bf16.mxu1 %v4308_v0  ;;  %v1682_v0 = vld [vmem:[%s5400_s5 + $0x2c8] sm:$0xff] }
 0x14d   :  { %3001 = vmatpush1.bf16.msra.mxu0 %v4861_v44  ;;  %v4889_v22 = vpack.c.bf16 %v1682_v0, %v1677_v12 }
 0x14f   :  { %5551 = vst [vmem:[#allocation53_spill] sm:$0xff] %v4889_v22  ;;  %3067 = vmatprep.subr.bf16.mxu0 %v4889_v22 }
 0x17e   :  { %v1297_v42 = vpop.f32.mrb[0].mxu0 }
 0x17f   :  { %v1298_v21 = vadd.f32 %v1297_v42, %v4880_v31  ;;  %v1299_v60 = vpop.f32.mrb[1].mxu0 }
 0x181   :  { %v2729_v29 = vmul.f32 -1.442695, %v1298_v21 }
 0x183   :  { %3419 = vpow2.f32 %v2729_v29 }
 0x18d   :  { %v3420_v4 = vpop.eup %3419  ;;  %v1303_v50 = vpop.f32.mrb[2].mxu0 }
 0x18e   :  { %v2912_v42 = vpop.f32.mrb[0].mxu1  ;;  %v1304_v21 = vadd.f32 %v1303_v50, %v4880_v31  ;;  %v4896_v29 = vpop.f32.mrb[3].mxu0  ;;  %v1473_v13 = vadd.f32 1.0, %v3420_v4 }
 0x18f   :  { %v1410_v28 = vpop.f32.mrb[1].mxu1  ;;  %v1416_v12 = vadd.f32 %v2912_v42, %v4893_v56 }
 0x190   :  { %v2730_v26 = vmul.f32 -1.442695, %v1304_v21  ;;  %v1411_v62 = vadd.f32 %v1410_v28, %v4893_v56 }
 0x192   :  { %3421 = vpow2.f32 %v2730_v26 }
 0x193   :  { %3423 = vrcp.f32 %v1473_v13 }
 0x194   :  { %3425 = vtanh.f32 %v1411_v62 }
 0x195   :  { %3427 = vtanh.f32 %v1416_v12 }
 0x19c   :  { %v3422_v0 = vpop.eup %3421 }
 0x19d   :  { %v1474_v61 = vadd.f32 1.0, %v3422_v0  ;;  %v3424_v23 = vpop.eup %3423 }
 0x19e   :  { %v3426_v3 = vpop.eup %3425 }
 0x19f   :  { %3429 = vrcp.f32 %v1474_v61  ;;  %v4900_v22 = vmul.f32 %v3426_v3, %v3424_v23  ;;  %v3428_v26 = vpop.eup %3427 }
 0x1a0   :  { %v1309_v50 = vpop.f32.mrb[4].mxu0 }
 0x1a1   :  { %v1310_v44 = vadd.f32 %v1309_v50, %v4880_v31  ;;  %v4903_v4 = vpop.f32.mrb[5].mxu0 }
 0x1a3   :  { %v2731_v21 = vmul.f32 -1.442695, %v1310_v44 }
 0x1a5   :  { %3431 = vpow2.f32 %v2731_v21 }
 0x1a9   :  { %v3430_v13 = vpop.eup %3429 }
 0x1aa   :  { %v4905_v62 = vmul.f32 %v3430_v13, %v3428_v26 }
 0x1af   :  { %v3432_v28 = vpop.eup %3431 }
 0x1b0   :  { %v1475_v42 = vadd.f32 1.0, %v3432_v28 }
 0x1b1   :  { %v1315_v0 = vpop.f32.mrb[6].mxu0  ;;  %v2915_v40 = vpop.f32.mrb[2].mxu1 }
 0x1b2   :  { %v1316_v12 = vadd.f32 %v1315_v0, %v4880_v31  ;;  %v4908_v61 = vpop.f32.mrb[7].mxu0  ;;  %v1420_v3 = vpop.f32.mrb[3].mxu1  ;;  %3433 = vrcp.f32 %v1475_v42  ;;  %v1426_v28 = vadd.f32 %v2915_v40, %v4893_v56 }
 0x1b3   :  { %v1421_v23 = vadd.f32 %v1420_v3, %v4893_v56 }
 0x1b4   :  { %v2732_v50 = vmul.f32 -1.442695, %v1316_v12  ;;  %v1300_v12 = vadd.f32 %v1299_v60, %v4916_v10 }
 0x1b5   :  { %3435 = vtanh.f32 %v1421_v23 }
 0x1b6   :  { %3437 = vpow2.f32 %v2732_v50  ;;  %v2737_v50 = vmul.f32 -1.442695, %v1300_v12 }
 0x1b9   :  { %v1321_v44 = vpop.f32.mrb[8].mxu0 }
 0x1ba   :  { %v1322_v21 = vadd.f32 %v1321_v44, %v4880_v31  ;;  %v1323_v26 = vpop.f32.mrb[9].mxu0 }
 0x1bb   :  { %v1324_v3 = vadd.f32 %v1323_v26, %v4916_v10 }
 0x1bc   :  { %v2733_v13 = vmul.f32 -1.442695, %v1322_v21  ;;  %v3434_v41 = vpop.eup %3433 }
 0x1bd   :  { %v2741_v44 = vmul.f32 -1.442695, %v1324_v3  ;;  %v1561_v3 = vld [vmem:[%s5402_s2] sm:$0xff] }
 0x1be   :  { %3439 = vpow2.f32 %v2733_v13 }
 0x1bf   :  { %v3436_v39 = vpop.eup %3435  ;;  %3441 = vtanh.f32 %v1426_v28  ;;  %v1306_v28 = vadd.f32 %v4896_v29, %v4916_v10 }
 0x1c0   :  { %v3438_v0 = vpop.eup %3437  ;;  %v4913_v18 = vmul.f32 %v3436_v39, %v3434_v41 }
 0x1c1   :  { %v1476_v42 = vadd.f32 1.0, %v3438_v0  ;;  %v2738_v12 = vmul.f32 -1.442695, %v1306_v28 }
 0x1c3   :  { %3443 = vrcp.f32 %v1476_v42 }
 0x1c4   :  { %3445 = vpow2.f32 %v2737_v50 }
 0x1c5   :  { %3447 = vpow2.f32 %v2741_v44  ;;  %v4931_v44 = vadd.f32 %v1561_v3, %v4900_v22 }
 0x1c7   :  { %5552 = vst [vmem:[#allocation54_spill] sm:$0xff] %v4931_v44 }
 0x1c8   :  { %v3440_v23 = vpop.eup %3439 }
 0x1c9   :  { %v1477_v21 = vadd.f32 1.0, %v3440_v23  ;;  %v3442_v40 = vpop.eup %3441 }
 0x1cb   :  { %3449 = vrcp.f32 %v1477_v21 }
 0x1cc   :  { %v1327_v13 = vpop.f32.mrb[10].mxu0  ;;  %v2918_v7 = vpop.f32.mrb[4].mxu1 }
 0x1cd   :  { %v3444_v49 = vpop.eup %3443  ;;  %v1328_v41 = vadd.f32 %v1327_v13, %v4880_v31  ;;  %v1329_v39 = vpop.f32.mrb[11].mxu0  ;;  %v1565_v13 = vld [vmem:[%s5402_s2 + $0x20] sm:$0xff] }
 0x1ce   :  { %v1430_v11 = vpop.f32.mrb[5].mxu1  ;;  %v4921_v0 = vmul.f32 %v3444_v49, %v3442_v40  ;;  %v1330_v42 = vadd.f32 %v1329_v39, %v4916_v10  ;;  %v3446_v49 = vpop.eup %3445  ;;  %v1436_v40 = vadd.f32 %v2918_v7, %v4893_v56 }
 0x1cf   :  { %v1431_v60 = vadd.f32 %v1430_v11, %v4893_v56  ;;  %v2734_v26 = vmul.f32 -1.442695, %v1328_v41  ;;  %v3448_v50 = vpop.eup %3447 }
 0x1d0   :  { %v2742_v23 = vmul.f32 -1.442695, %v1330_v42  ;;  %v1525_v39 = vadd.f32 1.0, %v3448_v50 }
 0x1d1   :  { %3451 = vtanh.f32 %v1431_v60 }
 0x1d2   :  { %3453 = vpow2.f32 %v2734_v26  ;;  %v1521_v26 = vadd.f32 1.0, %v3446_v49 }
 0x1d3   :  { %3455 = vpow2.f32 %v2738_v12 }
 0x1d4   :  { %3457 = vpow2.f32 %v2742_v23  ;;  %v1562_v23 = vld [vmem:[%s5402_s2 + $0x8] sm:$0xff] }
 0x1d5   :  { %v3450_v21 = vpop.eup %3449  ;;  %3459 = vtanh.f32 %v4931_v44  ;;  %v1692_v44 = vld [vmem:[%s5400_s5 + $0x318] sm:$0xff] }
 0x1d6   :  { %3461 = vtanh.f32 %v1436_v40 }
 0x1db   :  { %v3452_v29 = vpop.eup %3451 }
 0x1dc   :  { %v3454_v41 = vpop.eup %3453  ;;  %v1557_v11 = vmul.f32 %v3452_v29, %v3450_v21  ;;  %v4947_v29 = vadd.f32 %v1562_v23, %v4905_v62  ;;  %v1566_v62 = vld [vmem:[%s5402_s2 + $0x28] sm:$0xff] }
 0x1dd   :  { %v1478_v60 = vadd.f32 1.0, %v3454_v41  ;;  %v3456_v12 = vpop.eup %3455  ;;  %v1312_v41 = vadd.f32 %v4903_v4, %v4916_v10 }
 0x1de   :  { %v4938_v28 = vadd.f32 %v1565_v13, %v1557_v11  ;;  %v3458_v50 = vpop.eup %3457  ;;  %v1522_v49 = vadd.f32 1.0, %v3456_v12 }
 0x1df   :  { %3463 = vrcp.f32 %v1478_v60  ;;  %v1333_v22 = vpop.f32.mrb[12].mxu0  ;;  %v3460_v40 = vpop.eup %3459 }
 0x1e0   :  { %5553 = vst [vmem:[#allocation55_spill] sm:$0xff] %v4938_v28  ;;  %3465 = vrcp.f32 %v1525_v39  ;;  %v1334_v7 = vadd.f32 %v1333_v22, %v4880_v31  ;;  %v1335_v42 = vpop.f32.mrb[13].mxu0  ;;  %v3462_v13 = vpop.eup %3461  ;;  %v1526_v39 = vadd.f32 1.0, %v3458_v50  ;;  %v1602_v22 = vld [vmem:[%s5400_s5 + $0x48] sm:$0xff] }
 0x1e1   :  { %3467 = vtanh.f32 %v4938_v28  ;;  %v1336_v21 = vadd.f32 %v1335_v42, %v4916_v10  ;;  %v1687_v28 = vld [vmem:[%s5400_s5 + $0x2f0] sm:$0xff] }
 0x1e2   :  { %3469 = vrcp.f32 %v1521_v26  ;;  %v2735_v3 = vmul.f32 -1.442695, %v1334_v7  ;;  %v1597_v26 = vld [vmem:[%s5400_s5 + $0x20] sm:$0xff] }
 0x1e3   :  { %v2743_v50 = vmul.f32 -1.442695, %v1336_v21  ;;  %v4968_v1 = vpack.c.bf16 %v1602_v22, %v1597_v26 }
 0x1e4   :  { %3471 = vpow2.f32 %v2735_v3 }
 0x1e5   :  { %3473 = vrcp.f32 %v1522_v49 }
 0x1e6   :  { %3475 = vtanh.f32 %v4947_v29 }
 0x1e7   :  { %v1339_v11 = vpop.f32.mrb[14].mxu0  ;;  %v2921_v60 = vpop.f32.mrb[6].mxu1  ;;  %3477 = vrcp.f32 %v1526_v39 }
 0x1e8   :  { %v1340_v42 = vadd.f32 %v1339_v11, %v4880_v31  ;;  %v1341_v12 = vpop.f32.mrb[15].mxu0  ;;  %v1440_v4 = vpop.f32.mrb[7].mxu1  ;;  %v2739_v11 = vmul.f32 -1.442695, %v1312_v41  ;;  %v1612_v41 = vld [vmem:[%s5400_s5 + $0x98] sm:$0xff] }
 0x1e9   :  { %v3464_v7 = vpop.eup %3463  ;;  %v1441_v21 = vadd.f32 %v1440_v4, %v4893_v56 }
 0x1ea   :  { %v3466_v3 = vpop.eup %3465  ;;  %v1558_v23 = vmul.f32 %v3464_v7, %v3462_v13  ;;  %v2736_v5 = vmul.f32 -1.442695, %v1340_v42  ;;  %v4977_v7 = vpack.c.bf16 %v1692_v44, %v1687_v28  ;;  %v1607_v42 = vld [vmem:[%s5400_s5 + $0x70] sm:$0xff]  ;;  %v1342_v28 = vadd.f32 %v1341_v12, %v4916_v10  ;;  %v1712_v12 = vld [vmem:[%s5400_s5 + $0x3b8] sm:$0xff] }
 0x1eb   :  { %v3468_v6 = vpop.eup %3467  ;;  %v5000_v26 = vpack.c.bf16 %v1612_v41, %v1607_v42 }
 0x1ec   :  { %v3470_v31 = vpop.eup %3469  ;;  %v4970_v55 = vadd.f32 %v1566_v62, %v1558_v23  ;;  %v4972_v49 = vmul.f32 %v3468_v6, %v3466_v3  ;;  %3479 = vpow2.f32 %v2736_v5  ;;  %v1697_v5 = vld [vmem:[%s5400_s5 + $0x340] sm:$0xff]  ;;  %v1702_v6 = vld [vmem:[%s5400_s5 + $0x368] sm:$0xff]  ;;  %v2744_v4 = vmul.f32 -1.442695, %v1342_v28 }
 0x1ed   :  { %v4975_v13 = vmul.f32 %v3470_v31, %v3460_v40  ;;  %3481 = vpow2.f32 %v2743_v50  ;;  %v1318_v40 = vadd.f32 %v4908_v61, %v4916_v10  ;;  %v5004_v22 = vpack.c.bf16 %v1702_v6, %v1697_v5  ;;  %v1617_v62 = vld [vmem:[%s5400_s5 + $0xc0] sm:$0xff]  ;;  %v1622_v10 = vld [vmem:[%s5400_s5 + $0xe8] sm:$0xff]  ;;  %v1707_v61 = vld [vmem:[%s5400_s5 + $0x390] sm:$0xff] }
 0x1ee   :  { %1844 = vmatprep.mubr.f32.mxu0 %v4972_v49  ;;  %1933 = vmatprep.mubr.f32.mxu1 %v4972_v49  ;;  %v3472_v44 = vpop.eup %3471  ;;  %3483 = vtanh.f32 %v4970_v55  ;;  %v5020_v50 = vpack.c.bf16 %v1622_v10, %v1617_v62  ;;  %v1627_v5 = vld [vmem:[%s5400_s5 + $0x110] sm:$0xff]  ;;  %v1632_v6 = vld [vmem:[%s5400_s5 + $0x138] sm:$0xff]  ;;  %v1717_v28 = vld [vmem:[%s5400_s5 + $0x3e0] sm:$0xff] }
 0x1ef   :  { %1845 = vmatmul.mubr.f32.vlgmr.msra.gmra.mrb[16].mxu0 %v4975_v13  ;;  %1934 = vmatmul.mubr.f32.vlgmr.msra.gmra.mrb[8].mxu1 %v4975_v13  ;;  %3485 = vpow2.f32 %v2739_v11  ;;  %v1479_v39 = vadd.f32 1.0, %v3472_v44  ;;  %v3474_v3 = vpop.eup %3473  ;;  %v2740_v23 = vmul.f32 -1.442695, %v1318_v40  ;;  %v1446_v11 = vadd.f32 %v2921_v60, %v4893_v56  ;;  %v1563_v56 = vld [vmem:[%s5402_s2 + $0x10] sm:$0xff]  ;;  %v1722_v40 = vld [vmem:[%s5400_s5 + $0x408] sm:$0xff] }
 0x1f0   :  { %3069 = vmatpush3.bf16.msra.mxu0 %v4968_v1  ;;  %3101 = vmatpush1.bf16.msra.mxu1 %v4321_v17  ;;  %3487 = vtanh.f32 %v1441_v21  ;;  %v3476_v31 = vpop.eup %3475  ;;  %v5025_v21 = vpack.c.bf16 %v1712_v12, %v1707_v61  ;;  %v5049_v61 = vpack.c.bf16 %v1632_v6, %v1627_v5  ;;  %v1567_v5 = vld [vmem:[%s5402_s2 + $0x30] sm:$0xff] }
 0x1f1   :  { %3071 = vmatprep.subr.bf16.mxu0 %v4977_v7  ;;  %3103 = vmatprep.subr.bf16.mxu1 %v4346_v36  ;;  %3489 = vrcp.f32 %v1479_v39  ;;  %v3478_v42 = vpop.eup %3477 }
 0x1f2   :  { %3491 = vpow2.f32 %v2744_v4  ;;  %v5052_v4 = vadd.f32 %v1563_v56, %v4913_v18  ;;  %v1727_v18 = vld [vmem:[%s5400_s5 + $0x430] sm:$0xff] }
 0x1f3   :  { %3493 = vpow2.f32 %v2740_v23  ;;  %v5054_v23 = vmul.f32 %v3476_v31, %v3474_v3  ;;  %v1732_v3 = vld [vmem:[%s5400_s5 + $0x458] sm:$0xff] }
 0x1f4   :  { %3073 = vmatpush3.bf16.msra.mxu0 %v5000_v26  ;;  %3105 = vmatpush1.bf16.msra.mxu1 %v4360_v16  ;;  %3495 = vtanh.f32 %v1446_v11  ;;  %v1637_v11 = vld [vmem:[%s5400_s5 + $0x160] sm:$0xff] }
 0x1f5   :  { %3075 = vmatprep.subr.bf16.mxu0 %v5004_v22  ;;  %3107 = vmatprep.subr.bf16.mxu1 %v4380_v37 }
 0x1f6   :  { %v3480_v41 = vpop.eup %3479 }
 0x1f7   :  { %v3482_v44 = vpop.eup %3481  ;;  %v1480_v60 = vadd.f32 1.0, %v3480_v41  ;;  %v5056_v41 = vpack.c.bf16 %v1722_v40, %v1717_v28  ;;  %v5085_v28 = vpack.c.bf16 %v1732_v3, %v1727_v18  ;;  %v1647_v40 = vld [vmem:[%s5400_s5 + $0x1b0] sm:$0xff] }
 0x1f8   :  { %3077 = vmatpush3.bf16.msra.mxu0 %v5020_v50  ;;  %3109 = vmatpush1.bf16.msra.mxu1 %v4393_v48  ;;  %v3484_v39 = vpop.eup %3483 }
 0x1f9   :  { %3079 = vmatprep.subr.bf16.mxu0 %v5025_v21  ;;  %3111 = vmatprep.subr.bf16.mxu1 %v4416_v51  ;;  %v3486_v62 = vpop.eup %3485  ;;  %3497 = vrcp.f32 %v1480_v60  ;;  %v5047_v10 = vmul.f32 %v3484_v39, %v3478_v42  ;;  %v1642_v60 = vld [vmem:[%s5400_s5 + $0x188] sm:$0xff]  ;;  %v1527_v39 = vadd.f32 1.0, %v3482_v44  ;;  %5555 = vst [vmem:[#allocation57_spill] sm:$0xff] %v5085_v28 }
 0x1fa   :  { %v3488_v12 = vpop.eup %3487  ;;  %v1523_v6 = vadd.f32 1.0, %v3486_v62  ;;  %v5078_v44 = vpack.c.bf16 %v1642_v60, %v1637_v11  ;;  %3499 = vtanh.f32 %v5052_v4  ;;  %v1652_v62 = vld [vmem:[%s5400_s5 + $0x1d8] sm:$0xff]  ;;  %v1737_v11 = vld [vmem:[%s5400_s5 + $0x480] sm:$0xff]  ;;  %v1742_v60 = vld [vmem:[%s5400_s5 + $0x4a8] sm:$0xff] }
 0x1fb   :  { %v3490_v42 = vpop.eup %3489  ;;  %1850 = vmatprep.mubr.f32.mxu0 %v5047_v10  ;;  %1939 = vmatprep.mubr.f32.mxu1 %v5047_v10  ;;  %3501 = vrcp.f32 %v1527_v39  ;;  %v5105_v18 = vpack.c.bf16 %v1652_v62, %v1647_v40 }
 0x1fc   :  { %v1559_v31 = vmul.f32 %v3490_v42, %v3488_v12  ;;  %1851 = vmatmul.mubr.f32.gmra.mrb[18].mxu0 %v5054_v23  ;;  %1940 = vmatmul.mubr.f32.gmra.mrb[10].mxu1 %v5054_v23  ;;  %5554 = vst [vmem:[#allocation56_spill] sm:$0xff] %v5078_v44  ;;  %v1564_v12 = vld [vmem:[%s5402_s2 + $0x18] sm:$0xff]  ;;  %v3492_v42 = vpop.eup %3491 }
 0x1fd   :  { %3081 = vmatpush3.bf16.msra.mxu0 %v5049_v61  ;;  %3113 = vmatpush1.bf16.msra.mxu1 %v4429_v54  ;;  %v5109_v3 = vadd.f32 %v1564_v12, %v4921_v0  ;;  %v1568_v0 = vld [vmem:[%s5402_s2 + $0x38] sm:$0xff]  ;;  %v1528_v62 = vadd.f32 1.0, %v3492_v42  ;;  %v1747_v12 = vld [vmem:[%s5400_s5 + $0x4d0] sm:$0xff] }
 0x1fe   :  { %v5081_v56 = vadd.f32 %v1567_v5, %v1559_v31  ;;  %3083 = vmatprep.subr.bf16.mxu0 %v5056_v41  ;;  %3115 = vmatprep.subr.bf16.mxu1 %v4452_v52  ;;  %v3494_v5 = vpop.eup %3493  ;;  %v5112_v31 = vpack.c.bf16 %v1742_v60, %v1737_v11  ;;  %v1657_v52 = vld [vmem:[%s5400_s5 + $0x200] sm:$0xff]  ;;  %v1752_v11 = vld [vmem:[%s5400_s5 + $0x4f8] sm:$0xff] }
 0x1ff   :  { %v3496_v39 = vpop.eup %3495  ;;  %v5138_v42 = vpack.c.bf16 %v1752_v11, %v1747_v12 }
 0x200   :  { %3503 = vtanh.f32 %v5081_v56 }
 0x201   :  { %3505 = vrcp.f32 %v1523_v6  ;;  %3085 = vmatpush3.bf16.msra.mxu0 %v5078_v44  ;;  %3117 = vmatpush1.bf16.msra.mxu1 %v4465_v59  ;;  %v1662_v6 = vld [vmem:[%s5400_s5 + $0x228] sm:$0xff]  ;;  %v1524_v59 = vadd.f32 1.0, %v3494_v5  ;;  %v1672_v5 = vld [vmem:[%s5400_s5 + $0x278] sm:$0xff] }
 0x202   :  { %3087 = vmatprep.subr.bf16.mxu0 %v5085_v28  ;;  %3119 = vmatprep.subr.bf16.mxu1 %v4488_v8  ;;  %v5131_v28 = vpack.c.bf16 %v1662_v6, %v1657_v52  ;;  %3507 = vtanh.f32 %v5109_v3  ;;  %v1667_v52 = vld [vmem:[%s5400_s5 + $0x250] sm:$0xff] }
 0x203   :  { %v3498_v40 = vpop.eup %3497  ;;  %3509 = vrcp.f32 %v1528_v62  ;;  %v5152_v62 = vpack.c.bf16 %v1672_v5, %v1667_v52  ;;  %v5561_v52 = vld [vmem:[#allocation17_spill] sm:$0xff]  ;;  %v5562_v5 = vld [vmem:[#allocation47_spill] sm:$0xff] }
 0x204   :  { %v1560_v60 = vmul.f32 %v3498_v40, %v3496_v39  ;;  %v3500_v44 = vpop.eup %3499 }
 0x205   :  { %3089 = vmatpush3.bf16.msra.mxu0 %v5105_v18  ;;  %3121 = vmatpush1.bf16.msra.mxu1 %v4501_v14  ;;  %v3502_v39 = vpop.eup %3501 }
 0x206   :  { %v5134_v8 = vadd.f32 %v1568_v0, %v1560_v60  ;;  %3091 = vmatprep.subr.bf16.mxu0 %v5112_v31  ;;  %3123 = vmatprep.subr.bf16.mxu1 %v4524_v58 }
 0x208   :  { %3511 = vtanh.f32 %v5134_v8 }
 0x209   :  { %3513 = vrcp.f32 %v1524_v59  ;;  %3093 = vmatpush3.bf16.msra.mxu0 %v5131_v28  ;;  %3125 = vmatpush1.bf16.msra.mxu1 %v4544_v20 }
 0x20a   :  { %v3504_v6 = vpop.eup %3503  ;;  %3095 = vmatprep.subr.bf16.mxu0 %v5138_v42  ;;  %3127 = vmatprep.subr.bf16.mxu1 %v4560_v45 }
 0x20b   :  { %v3506_v40 = vpop.eup %3505  ;;  %v1591_v0 = vmul.f32 %v3504_v6, %v3502_v39  ;;  %v5563_v6 = vld [vmem:[#allocation49_spill] sm:$0xff] }
 0x20c   :  { %v1587_v12 = vmul.f32 %v3506_v40, %v3500_v44  ;;  %v3508_v59 = vpop.eup %3507  ;;  %v5564_v40 = vld [vmem:[#allocation18_spill] sm:$0xff] }
 0x20d   :  { %1856 = vmatprep.mubr.f32.mxu0 %v1591_v0  ;;  %1945 = vmatprep.mubr.f32.mxu1 %v1591_v0  ;;  %v3510_v11 = vpop.eup %3509 }
 0x20e   :  { %1857 = vmatmul.mubr.f32.gmra.mrb[20].mxu0 %v1587_v12  ;;  %1946 = vmatmul.mubr.f32.gmra.mrb[12].mxu1 %v1587_v12 }
 0x20f   :  { %3097 = vmatpush3.bf16.msra.mxu0 %v5152_v62  ;;  %3129 = vmatpush1.bf16.msra.mxu1 %v4580_v57 }
 0x210   :  { %3163 = vmatprep.subr.bf16.mxu0 %v4319_v30  ;;  %3131 = vmatprep.subr.bf16.mxu1 %v4596_v53 }
 0x212   :  { %v3512_v60 = vpop.eup %3511 }
 0x213   :  { %v3514_v45 = vpop.eup %3513  ;;  %v1592_v39 = vmul.f32 %v3512_v60, %v3510_v11  ;;  %3133 = vmatpush1.bf16.msra.mxu1 %v4609_v27  ;;  %v5568_v11 = vld [vmem:[#allocation20_spill] sm:$0xff]  ;;  %v5569_v60 = vld [vmem:[#allocation22_spill] sm:$0xff] }
 0x214   :  { %v1588_v44 = vmul.f32 %v3514_v45, %v3508_v59  ;;  %3135 = vmatprep.subr.bf16.mxu1 %v4632_v19  ;;  %v5556_v45 = vld [vmem:[#allocation11_spill] sm:$0xff]  ;;  %v5567_v59 = vld [vmem:[#allocation53_spill] sm:$0xff] }
 0x215   :  { %1862 = vmatprep.mubr.f32.mxu0 %v1592_v39  ;;  %1951 = vmatprep.mubr.f32.mxu1 %v1592_v39 }
 0x216   :  { %1863 = vmatmul.mubr.f32.gmra.mrb[22].mxu0 %v1588_v44  ;;  %1952 = vmatmul.mubr.f32.gmra.mrb[14].mxu1 %v1588_v44 }
 0x217   :  { %2022 = vmatprep.mubr.f32.mxu0 %v4972_v49  ;;  %3137 = vmatpush1.bf16.msra.mxu1 %v4645_v25  ;;  %v5557_v49 = vld [vmem:[#allocation13_spill] sm:$0xff] }
 0x218   :  { %3139 = vmatprep.subr.bf16.mxu1 %v4668_v63 }
 0x21a   :  { %2023 = vmatmul.mubr.f32.vlgmr.msra.gmra.mrb[24].mxu0 %v4975_v13  ;;  %v5558_v13 = vld [vmem:[#allocation43_spill] sm:$0xff] }
 0x21b   :  { %2027 = vmatprep.mubr.f32.mxu0 %v5047_v10  ;;  %3165 = vmatpush1.bf16.msra.mxu0 %v4333_v9  ;;  %v5559_v10 = vld [vmem:[#allocation45_spill] sm:$0xff] }
 0x21c   :  { %3167 = vmatprep.subr.bf16.mxu0 %v4348_v38  ;;  %3141 = vmatpush1.bf16.msra.mxu1 %v4681_v24  ;;  %v5594_v24 = vld [vmem:[#allocation54_spill] sm:$0xff] }
 0x21d   :  { %3143 = vmatprep.subr.bf16.mxu1 %v4704_v47 }
 0x21e   :  { %2028 = vmatmul.mubr.f32.gmra.mrb[26].mxu0 %v5054_v23  ;;  %v5560_v23 = vld [vmem:[#allocation15_spill] sm:$0xff] }
 0x21f   :  { %2032 = vmatprep.mubr.f32.mxu0 %v1591_v0  ;;  %3169 = vmatpush1.bf16.msra.mxu0 %v4367_v35  ;;  %v5565_v0 = vld [vmem:[#allocation19_spill] sm:$0xff] }
 0x220   :  { %3171 = vmatprep.subr.bf16.mxu0 %v4391_v2  ;;  %3145 = vmatpush1.bf16.msra.mxu1 %v4717_v46 }
 0x221   :  { %3147 = vmatprep.subr.bf16.mxu1 %v4740_v15 }
 0x222   :  { %2033 = vmatmul.mubr.f32.gmra.mrb[28].mxu0 %v1587_v12  ;;  %v5566_v12 = vld [vmem:[#allocation51_spill] sm:$0xff] }
 0x223   :  { %2037 = vmatprep.mubr.f32.mxu0 %v1592_v39  ;;  %3173 = vmatpush1.bf16.msra.mxu0 %v4402_v43  ;;  %v5570_v39 = vld [vmem:[#allocation23_spill] sm:$0xff] }
 0x224   :  { %3175 = vmatprep.subr.bf16.mxu0 %v4427_v34  ;;  %3149 = vmatpush1.bf16.msra.mxu1 %v4753_v33 }
 0x225   :  { %3151 = vmatprep.subr.bf16.mxu1 %v4776_v32 }
 0x226   :  { %2038 = vmatmul.mubr.f32.gmra.mrb[30].mxu0 %v1588_v44  ;;  %v5571_v44 = vld [vmem:[#allocation24_spill] sm:$0xff] }
 0x227   :  { %3177 = vmatpush1.bf16.msra.mxu0 %v5556_v45 }
 0x228   :  { %3179 = vmatprep.subr.bf16.mxu0 %v5557_v49  ;;  %3153 = vmatpush1.bf16.msra.mxu1 %v5558_v13  ;;  %v5575_v13 = vld [vmem:[#allocation30_spill] sm:$0xff] }
 0x229   :  { %3155 = vmatprep.subr.bf16.mxu1 %v5559_v10  ;;  %v5572_v10 = vld [vmem:[#allocation25_spill] sm:$0xff] }
 0x22b   :  { %3181 = vmatpush1.bf16.msra.mxu0 %v5560_v23 }
 0x22c   :  { %3183 = vmatprep.subr.bf16.mxu0 %v5561_v52  ;;  %3157 = vmatpush1.bf16.msra.mxu1 %v5562_v5  ;;  %v5573_v5 = vld [vmem:[#allocation26_spill] sm:$0xff] }
 0x22d   :  { %3159 = vmatprep.subr.bf16.mxu1 %v5563_v6  ;;  %v5574_v6 = vld [vmem:[#allocation28_spill] sm:$0xff] }
 0x22f   :  { %3185 = vmatpush1.bf16.msra.mxu0 %v5564_v40 }
 0x230   :  { %3187 = vmatprep.subr.bf16.mxu0 %v5565_v0  ;;  %3161 = vmatpush1.bf16.msra.mxu1 %v5566_v12  ;;  %v5576_v0 = vld [vmem:[#allocation32_spill] sm:$0xff]  ;;  %v5577_v12 = vld [vmem:[#allocation34_spill] sm:$0xff] }
 0x231   :  { %3227 = vmatprep.subr.bf16.mxu1 %v5567_v59  ;;  %v5578_v59 = vld [vmem:[#allocation36_spill] sm:$0xff] }
 0x233   :  { %3189 = vmatpush1.bf16.msra.mxu0 %v5568_v11  ;;  %v5579_v11 = vld [vmem:[#allocation38_spill] sm:$0xff] }
 0x234   :  { %3191 = vmatprep.subr.bf16.mxu0 %v5569_v60  ;;  %v5580_v60 = vld [vmem:[#allocation40_spill] sm:$0xff] }
 0x237   :  { %3193 = vmatpush1.bf16.msra.mxu0 %v5570_v39  ;;  %v5581_v39 = vld [vmem:[#allocation42_spill] sm:$0xff] }
 0x238   :  { %3195 = vmatprep.subr.bf16.mxu0 %v5571_v44  ;;  %v5582_v44 = vld [vmem:[#allocation44_spill] sm:$0xff] }
 0x23b   :  { %3197 = vmatpush1.bf16.msra.mxu0 %v5572_v10  ;;  %v5583_v10 = vld [vmem:[#allocation46_spill] sm:$0xff] }
 0x23c   :  { %3199 = vmatprep.subr.bf16.mxu0 %v5573_v5  ;;  %v5584_v5 = vld [vmem:[#allocation48_spill] sm:$0xff] }
 0x23f   :  { %3201 = vmatpush1.bf16.msra.mxu0 %v5574_v6  ;;  %v5585_v6 = vld [vmem:[#allocation50_spill] sm:$0xff] }
 0x240   :  { %3203 = vmatprep.subr.bf16.mxu0 %v5575_v13  ;;  %v5586_v13 = vld [vmem:[#allocation52_spill] sm:$0xff] }
 0x243   :  { %3205 = vmatpush1.bf16.msra.mxu0 %v5576_v0  ;;  %v5587_v0 = vld [vmem:[#allocation7_spill] sm:$0xff] }
 0x244   :  { %3207 = vmatprep.subr.bf16.mxu0 %v5577_v12 }
 0x247   :  { %3209 = vmatpush1.bf16.msra.mxu0 %v5578_v59 }
 0x248   :  { %3211 = vmatprep.subr.bf16.mxu0 %v5579_v11  ;;  %v5213_v11 = vld [vmem:[%s5403_s6] sm:$0x1f] }
 0x24b   :  { %3213 = vmatpush1.bf16.msra.mxu0 %v5580_v60  ;;  %v5588_v60 = vld [vmem:[#allocation3_spill] sm:$0xff] }
 0x24c   :  { %3215 = vmatprep.subr.bf16.mxu0 %v5581_v39  ;;  %v5217_v39 = vrot.slane %v5213_v11, %v5588_v60 }
 0x24e   :  { %5589 = vst [vmem:[#allocation7_spill] sm:$0xff] %v5217_v39 }
 0x24f   :  { %3217 = vmatpush1.bf16.msra.mxu0 %v5582_v44  ;;  %v5590_v44 = vld [vmem:[#allocation5_spill] sm:$0xff] }
 0x250   :  { %3219 = vmatprep.subr.bf16.mxu0 %v5583_v10  ;;  %v5221_v10 = vrot.slane %v5213_v11, %v5590_v44 }
 0x252   :  { %5591 = vst [vmem:[#allocation3_spill] sm:$0xff] %v5221_v10 }
 0x253   :  { %3221 = vmatpush1.bf16.msra.mxu0 %v5584_v5 }
 0x254   :  { %3223 = vmatprep.subr.bf16.mxu0 %v5585_v6 }
 0x257   :  { %3225 = vmatpush1.bf16.msra.mxu0 %v5586_v13 }
 0x258   :  { %3259 = vmatprep.subr.bf16.mxu0 %v5587_v0 }
 0x2c2   :  { %v1846_v5 = vpop.f32.mrb[16].mxu0  ;;  %v1935_v59 = vpop.f32.mrb[8].mxu1 }
 0x2c3   :  { %v1847_v6 = vadd.f32 %v1846_v5, %v5217_v39  ;;  %v1848_v13 = vpop.f32.mrb[17].mxu0  ;;  %v1937_v12 = vpop.f32.mrb[9].mxu1 }
 0x2c4   :  { %v1849_v0 = vadd.f32 %v1848_v13, %v5221_v10  ;;  %v5592_v13 = vld [vmem:[#allocation2_spill] sm:$0xff] }
 0x2c5   :  { %v2745_v40 = vmul.f32 -1.442695, %v1847_v6  ;;  %v5231_v6 = vrot.slane %v5213_v11, %v5592_v13 }
 0x2c6   :  { %v2749_v32 = vmul.f32 -1.442695, %v1849_v0 }
 0x2c7   :  { %3515 = vpow2.f32 %v2745_v40  ;;  %5593 = vst [vmem:[#allocation5_spill] sm:$0xff] %v5231_v6  ;;  %v1936_v40 = vadd.f32 %v1935_v59, %v5231_v6 }
 0x2c8   :  { %3517 = vpow2.f32 %v2749_v32 }
 0x2c9   :  { %v2753_v0 = vmul.f32 -1.442695, %v1936_v40 }
 0x2cf   :  { %v1852_v33 = vpop.f32.mrb[18].mxu0  ;;  %v1941_v52 = vpop.f32.mrb[10].mxu1 }
 0x2d0   :  { %v1853_v23 = vadd.f32 %v1852_v33, %v5217_v39  ;;  %v1854_v15 = vpop.f32.mrb[19].mxu0  ;;  %v5226_v44 = vpop.f32.mrb[11].mxu1 }
 0x2d1   :  { %v3516_v60 = vpop.eup %3515  ;;  %v1855_v49 = vadd.f32 %v1854_v15, %v5221_v10 }
 0x2d2   :  { %v2055_v46 = vadd.f32 1.0, %v3516_v60  ;;  %v3518_v5 = vpop.eup %3517  ;;  %v2746_v47 = vmul.f32 -1.442695, %v1853_v23  ;;  %v1942_v60 = vadd.f32 %v1941_v52, %v5231_v6 }
 0x2d3   :  { %v2079_v45 = vadd.f32 1.0, %v3518_v5  ;;  %v2750_v32 = vmul.f32 -1.442695, %v1855_v49 }
 0x2d4   :  { %3519 = vrcp.f32 %v2055_v46  ;;  %v5595_v46 = vld [vmem:[#allocation55_spill] sm:$0xff]  ;;  %v2754_v43 = vmul.f32 -1.442695, %v1942_v60 }
 0x2d5   :  { %3521 = vrcp.f32 %v2079_v45 }
 0x2d6   :  { %3523 = vpow2.f32 %v2746_v47 }
 0x2d7   :  { %3525 = vpow2.f32 %v2750_v32 }
 0x2d8   :  { %3527 = vpow2.f32 %v2753_v0 }
 0x2de   :  { %v3520_v33 = vpop.eup %3519 }
 0x2df   :  { %v2143_v15 = vmul.f32 %v3520_v33, %v5594_v24  ;;  %v3522_v34 = vpop.eup %3521 }
 0x2e0   :  { %v2147_v5 = vmul.f32 %v3522_v34, %v5595_v46  ;;  %v3524_v23 = vpop.eup %3523  ;;  %v5596_v46 = vld [vmem:[#allocation4_spill] sm:$0xff] }
 0x2e1   :  { %v1858_v13 = vpop.f32.mrb[20].mxu0  ;;  %v1947_v63 = vpop.f32.mrb[12].mxu1  ;;  %v2056_v47 = vadd.f32 1.0, %v3524_v23 }
 0x2e2   :  { %v5237_v45 = vadd.f32 %v2147_v5, %v2143_v15  ;;  %v1859_v49 = vadd.f32 %v1858_v13, %v5217_v39  ;;  %v1860_v59 = vpop.f32.mrb[21].mxu0  ;;  %v1949_v32 = vpop.f32.mrb[13].mxu1  ;;  %v1948_v52 = vadd.f32 %v1947_v63, %v5231_v6  ;;  %v5244_v15 = vrot.slane %v5213_v11, %v5596_v46 }
 0x2e3   :  { %v3526_v40 = vpop.eup %3525  ;;  %v1861_v24 = vadd.f32 %v1860_v59, %v5221_v10  ;;  %3529 = vrcp.f32 %v2056_v47 }
 0x2e4   :  { %v2080_v33 = vadd.f32 1.0, %v3526_v40  ;;  %v2747_v34 = vmul.f32 -1.442695, %v1859_v49  ;;  %3531 = vpow2.f32 %v2754_v43  ;;  %v2755_v60 = vmul.f32 -1.442695, %v1948_v52  ;;  %v3528_v40 = vpop.eup %3527 }
 0x2e5   :  { %v2751_v0 = vmul.f32 -1.442695, %v1861_v24  ;;  %v1938_v49 = vadd.f32 %v1937_v12, %v5244_v15  ;;  %v1950_v12 = vadd.f32 %v1949_v32, %v5244_v15 }
 0x2e6   :  { %3533 = vrcp.f32 %v2080_v33 }
 0x2e7   :  { %3535 = vpow2.f32 %v2747_v34  ;;  %v5597_v34 = vld [vmem:[#allocation6_spill] sm:$0xff] }
 0x2e8   :  { %3537 = vpow2.f32 %v2751_v0  ;;  %v5252_v25 = vrot.slane %v5213_v11, %v5597_v34 }
 0x2e9   :  { %v1864_v5 = vpop.f32.mrb[22].mxu0  ;;  %v1953_v23 = vpop.f32.mrb[14].mxu1  ;;  %3539 = vpow2.f32 %v2755_v60 }
 0x2ea   :  { %v1865_v13 = vadd.f32 %v1864_v5, %v5217_v39  ;;  %v1954_v63 = vadd.f32 %v1953_v23, %v5231_v6  ;;  %v1866_v59 = vpop.f32.mrb[23].mxu0  ;;  %v1955_v47 = vpop.f32.mrb[15].mxu1  ;;  %v2103_v5 = vadd.f32 1.0, %v3528_v40 }
 0x2eb   :  { %v1867_v43 = vadd.f32 %v1866_v59, %v5221_v10  ;;  %v2757_v10 = vmul.f32 -1.442695, %v1938_v49  ;;  %v2759_v49 = vmul.f32 -1.442695, %v1950_v12  ;;  %v1944_v12 = vadd.f32 %v5226_v44, %v5244_v15 }
 0x2ec   :  { %v2748_v52 = vmul.f32 -1.442695, %v1865_v13  ;;  %v2756_v24 = vmul.f32 -1.442695, %v1954_v63 }
 0x2ed   :  { %v2752_v33 = vmul.f32 -1.442695, %v1867_v43  ;;  %v2817_v46 = vpop.f32.mrb[24].mxu0  ;;  %v3530_v0 = vpop.eup %3529 }
 0x2ee   :  { %3541 = vpow2.f32 %v2748_v52  ;;  %v2818_v23 = vpop.f32.mrb[25].mxu0  ;;  %v3532_v6 = vpop.eup %3531  ;;  %v2144_v39 = vmul.f32 %v3530_v0, %v4947_v29  ;;  %v1956_v52 = vadd.f32 %v1955_v47, %v5244_v15 }
 0x2ef   :  { %3543 = vpow2.f32 %v2756_v24  ;;  %v2819_v60 = vadd.f32 %v2818_v23, %v2817_v46  ;;  %v2104_v40 = vadd.f32 1.0, %v3532_v6 }
 0x2f0   :  { %v3534_v59 = vpop.eup %3533  ;;  %3545 = vpow2.f32 %v2752_v33  ;;  %v2760_v23 = vmul.f32 -1.442695, %v1956_v52 }
 0x2f1   :  { %v2148_v13 = vmul.f32 %v3534_v59, %v4970_v55  ;;  %v2025_v63 = vadd.f32 %v2819_v60, %v5252_v25  ;;  %v2820_v11 = vpop.f32.mrb[26].mxu0  ;;  %v3536_v43 = vpop.eup %3535  ;;  %3547 = vrcp.f32 %v2103_v5 }
 0x2f2   :  { %v2821_v34 = vpop.f32.mrb[27].mxu0  ;;  %v2057_v29 = vadd.f32 1.0, %v3536_v43  ;;  %v3538_v46 = vpop.eup %3537 }
 0x2f3   :  { %v2152_v2 = vadd.f32 %v2148_v13, %v2144_v39  ;;  %3549 = vtanh.f32 %v2025_v63  ;;  %v2822_v24 = vadd.f32 %v2821_v34, %v2820_v11  ;;  %v3540_v32 = vpop.eup %3539  ;;  %v2081_v33 = vadd.f32 1.0, %v3538_v46 }
 0x2f4   :  { %3551 = vpow2.f32 %v2757_v10  ;;  %v2105_v60 = vadd.f32 1.0, %v3540_v32 }
 0x2f5   :  { %3553 = vrcp.f32 %v2057_v29  ;;  %v2030_v55 = vadd.f32 %v2822_v24, %v5252_v25  ;;  %v2823_v0 = vpop.f32.mrb[28].mxu0 }
 0x2f6   :  { %3555 = vrcp.f32 %v2104_v40  ;;  %v2824_v5 = vpop.f32.mrb[29].mxu0 }
 0x2f7   :  { %3557 = vrcp.f32 %v2081_v33  ;;  %v2825_v6 = vadd.f32 %v2824_v5, %v2823_v0 }
 0x2f8   :  { %v3542_v47 = vpop.eup %3541  ;;  %3559 = vpow2.f32 %v2759_v49  ;;  %v2758_v49 = vmul.f32 -1.442695, %v1944_v12 }
 0x2f9   :  { %v3544_v39 = vpop.eup %3543  ;;  %v2058_v59 = vadd.f32 1.0, %v3542_v47  ;;  %3561 = vtanh.f32 %v2030_v55  ;;  %v2826_v13 = vpop.f32.mrb[30].mxu0  ;;  %v2035_v40 = vadd.f32 %v2825_v6, %v5252_v25 }
 0x2fa   :  { %v3546_v10 = vpop.eup %3545  ;;  %v2106_v63 = vadd.f32 1.0, %v3544_v39  ;;  %3563 = vpow2.f32 %v2760_v23  ;;  %v2827_v11 = vpop.f32.mrb[31].mxu0 }
 0x2fb   :  { %3565 = vrcp.f32 %v2058_v59  ;;  %v2082_v43 = vadd.f32 1.0, %v3546_v10  ;;  %v2828_v52 = vadd.f32 %v2827_v11, %v2826_v13  ;;  %v3548_v34 = vpop.eup %3547 }
 0x2fc   :  { %3567 = vrcp.f32 %v2105_v60 }
 0x2fd   :  { %v3550_v29 = vpop.eup %3549  ;;  %3569 = vrcp.f32 %v2082_v43  ;;  %v2040_v24 = vadd.f32 %v2828_v52, %v5252_v25 }
 0x2fe   :  { %v3552_v46 = vpop.eup %3551  ;;  %3571 = vrcp.f32 %v2106_v63  ;;  %v2155_v32 = vmul.f32 %v3550_v29, %v3548_v34 }
 0x2ff   :  { %v3554_v33 = vpop.eup %3553  ;;  %3573 = vtanh.f32 %v2035_v40  ;;  %v2127_v12 = vadd.f32 1.0, %v3552_v46 }
 0x300   :  { %v3556_v44 = vpop.eup %3555  ;;  %v2145_v55 = vmul.f32 %v3554_v33, %v5052_v4  ;;  %v5266_v0 = vadd.f32 %v2155_v32, %v5237_v45  ;;  %3575 = vtanh.f32 %v2040_v24 }
 0x301   :  { %v3558_v23 = vpop.eup %3557  ;;  %3577 = vpow2.f32 %v2758_v49 }
 0x302   :  { %v3560_v5 = vpop.eup %3559  ;;  %v2149_v6 = vmul.f32 %v3558_v23, %v5081_v56  ;;  %3579 = vrcp.f32 %v2127_v12  ;;  %v5617_v12 = vld [vmem:[#allocation39_spill] sm:$0xff] }
 0x303   :  { %v3562_v47 = vpop.eup %3561  ;;  %v2129_v45 = vadd.f32 1.0, %v3560_v5 }
 0x304   :  { %v3564_v60 = vpop.eup %3563  ;;  %v2153_v39 = vadd.f32 %v2149_v6, %v2145_v55  ;;  %v2156_v59 = vmul.f32 %v3562_v47, %v3556_v44 }
 0x305   :  { %v3566_v13 = vpop.eup %3565  ;;  %v2130_v52 = vadd.f32 1.0, %v3564_v60  ;;  %3581 = vrcp.f32 %v2129_v45  ;;  %v5620_v45 = vld [vmem:[#allocation19_spill] sm:$0xff] }
 0x306   :  { %v3568_v10 = vpop.eup %3567  ;;  %v2146_v63 = vmul.f32 %v3566_v13, %v5109_v3  ;;  %v5270_v11 = vadd.f32 %v2156_v59, %v2152_v2 }
 0x307   :  { %v3570_v4 = vpop.eup %3569  ;;  %3583 = vrcp.f32 %v2130_v52  ;;  %v5623_v52 = vld [vmem:[#allocation20_spill] sm:$0xff] }
 0x308   :  { %v3572_v43 = vpop.eup %3571  ;;  %v2150_v40 = vmul.f32 %v3570_v4, %v5134_v8  ;;  %3585 = vtanh.f32 %v5266_v0  ;;  %v5619_v4 = vld [vmem:[#allocation18_spill] sm:$0xff] }
 0x309   :  { %v3574_v34 = vpop.eup %3573 }
 0x30a   :  { %v3576_v29 = vpop.eup %3575  ;;  %v2154_v56 = vadd.f32 %v2150_v40, %v2146_v63  ;;  %v2157_v24 = vmul.f32 %v3574_v34, %v3568_v10  ;;  %v5602_v10 = vld [vmem:[#allocation16_spill] sm:$0xff]  ;;  %v5618_v63 = vld [vmem:[#allocation41_spill] sm:$0xff]  ;;  %v5624_v34 = vld [vmem:[#allocation22_spill] sm:$0xff] }
 0x30b   :  { %v2158_v49 = vmul.f32 %v3576_v29, %v3572_v43  ;;  %v3578_v32 = vpop.eup %3577  ;;  %v5621_v43 = vld [vmem:[#allocation43_spill] sm:$0xff]  ;;  %v5622_v40 = vld [vmem:[#allocation45_spill] sm:$0xff] }
 0x30c   :  { %v5273_v46 = vadd.f32 %v2157_v24, %v2153_v39  ;;  %v2128_v3 = vadd.f32 1.0, %v3578_v32  ;;  %v3580_v8 = vpop.eup %3579  ;;  %v5625_v29 = vld [vmem:[#allocation47_spill] sm:$0xff] }
 0x30d   :  { %v5276_v2 = vadd.f32 %v2158_v49, %v2154_v56  ;;  %v5626_v56 = vld [vmem:[#allocation49_spill] sm:$0xff]  ;;  %v5627_v24 = vld [vmem:[#allocation23_spill] sm:$0xff]  ;;  %v5628_v49 = vld [vmem:[#allocation24_spill] sm:$0xff] }
 0x30e   :  { %3587 = vtanh.f32 %v5273_v46  ;;  %v5629_v32 = vld [vmem:[#allocation51_spill] sm:$0xff] }
 0x30f   :  { %3589 = vtanh.f32 %v5276_v2  ;;  %v3582_v33 = vpop.eup %3581 }
 0x310   :  { %3591 = vtanh.f32 %v5270_v11 }
 0x311   :  { %3593 = vrcp.f32 %v2128_v3  ;;  %v3584_v44 = vpop.eup %3583  ;;  %v5630_v3 = vld [vmem:[#allocation53_spill] sm:$0xff] }
 0x312   :  { %v3586_v55 = vpop.eup %3585 }
 0x313   :  { %v2167_v47 = vmul.f32 %v3586_v55, %v3580_v8  ;;  %v5631_v8 = vld [vmem:[#allocation25_spill] sm:$0xff]  ;;  %v5634_v55 = vld [vmem:[#allocation30_spill] sm:$0xff] }
 0x318   :  { %v3588_v23 = vpop.eup %3587 }
 0x319   :  { %v3590_v5 = vpop.eup %3589  ;;  %v2169_v6 = vmul.f32 %v3588_v23, %v3582_v33  ;;  %v5632_v33 = vld [vmem:[#allocation26_spill] sm:$0xff]  ;;  %v5635_v23 = vld [vmem:[#allocation32_spill] sm:$0xff] }
 0x31a   :  { %v2170_v60 = vmul.f32 %v3590_v5, %v3584_v44  ;;  %v3592_v39 = vpop.eup %3591  ;;  %v5633_v44 = vld [vmem:[#allocation28_spill] sm:$0xff]  ;;  %v5636_v5 = vld [vmem:[#allocation34_spill] sm:$0xff] }
 0x31b   :  { %2235 = vmatprep.mubr.f32.mxu1 %v2169_v6  ;;  %2312 = vmatprep.mubr.f32.mxu0 %v2169_v6  ;;  %v3594_v59 = vpop.eup %3593 }
 0x31c   :  { %2236 = vmatmul.mubr.f32.vlgmr.msra.gmra.mrb[16].mxu1 %v2167_v47  ;;  %2313 = vmatmul.mubr.f32.vlgmr.msra.gmra.mrb[32].mxu0 %v2167_v47  ;;  %v2168_v13 = vmul.f32 %v3594_v59, %v3592_v39  ;;  %v5640_v39 = vld [vmem:[#allocation42_spill] sm:$0xff]  ;;  %v5641_v59 = vld [vmem:[#allocation44_spill] sm:$0xff] }
 0x31d   :  { %3229 = vmatpush3.bf16.msra.mxu1 %v4968_v1  ;;  %2241 = vmatprep.mubr.f32.mxu1 %v2170_v60 }
 0x31e   :  { %2318 = vmatprep.mubr.f32.mxu0 %v2170_v60  ;;  %3231 = vmatprep.subr.bf16.mxu1 %v4977_v7 }
 0x31f   :  { %3261 = vmatpush1.bf16.msra.mxu0 %v4321_v17  ;;  %v5598_v17 = vld [vmem:[#allocation12_spill] sm:$0xff] }
 0x320   :  { %2242 = vmatmul.mubr.f32.gmra.mrb[18].mxu1 %v2168_v13  ;;  %2319 = vmatmul.mubr.f32.gmra.mrb[34].mxu0 %v2168_v13 }
 0x321   :  { %3233 = vmatpush3.bf16.msra.mxu1 %v5000_v26  ;;  %2389 = vmatprep.mubr.f32.mxu1 %v2169_v6  ;;  %v5637_v6 = vld [vmem:[#allocation36_spill] sm:$0xff] }
 0x322   :  { %3235 = vmatprep.subr.bf16.mxu1 %v5004_v22  ;;  %3263 = vmatprep.subr.bf16.mxu0 %v4346_v36  ;;  %v5599_v36 = vld [vmem:[#allocation56_spill] sm:$0xff] }
 0x323   :  { %3265 = vmatpush1.bf16.msra.mxu0 %v4360_v16  ;;  %v5600_v16 = vld [vmem:[#allocation57_spill] sm:$0xff] }
 0x324   :  { %3267 = vmatprep.subr.bf16.mxu0 %v4380_v37  ;;  %v5601_v37 = vld [vmem:[#allocation14_spill] sm:$0xff] }
 0x325   :  { %3237 = vmatpush3.bf16.msra.mxu1 %v5020_v50 }
 0x326   :  { %3239 = vmatprep.subr.bf16.mxu1 %v5025_v21 }
 0x327   :  { %3269 = vmatpush1.bf16.msra.mxu0 %v4393_v48  ;;  %v5603_v48 = vld [vmem:[#allocation21_spill] sm:$0xff] }
 0x328   :  { %3271 = vmatprep.subr.bf16.mxu0 %v4416_v51  ;;  %v5604_v51 = vld [vmem:[#allocation8_spill] sm:$0xff] }
 0x329   :  { %3241 = vmatpush3.bf16.msra.mxu1 %v5049_v61 }
 0x32a   :  { %3243 = vmatprep.subr.bf16.mxu1 %v5056_v41 }
 0x32b   :  { %3273 = vmatpush1.bf16.msra.mxu0 %v4429_v54  ;;  %v5606_v54 = vld [vmem:[#allocation29_spill] sm:$0xff] }
 0x32c   :  { %3275 = vmatprep.subr.bf16.mxu0 %v5598_v17  ;;  %v5643_v17 = vld [vmem:[#allocation48_spill] sm:$0xff] }
 0x32d   :  { %3245 = vmatpush3.bf16.msra.mxu1 %v5599_v36 }
 0x32e   :  { %3247 = vmatprep.subr.bf16.mxu1 %v5600_v16 }
 0x32f   :  { %3277 = vmatpush1.bf16.msra.mxu0 %v5601_v37  ;;  %v5644_v37 = vld [vmem:[#allocation50_spill] sm:$0xff] }
 0x330   :  { %3279 = vmatprep.subr.bf16.mxu0 %v5602_v10  ;;  %v5645_v10 = vld [vmem:[#allocation52_spill] sm:$0xff] }
 0x331   :  { %3249 = vmatpush3.bf16.msra.mxu1 %v5105_v18 }
 0x332   :  { %3251 = vmatprep.subr.bf16.mxu1 %v5112_v31 }
 0x333   :  { %3281 = vmatpush1.bf16.msra.mxu0 %v4501_v14  ;;  %v5607_v14 = vld [vmem:[#allocation9_spill] sm:$0xff] }
 0x334   :  { %3283 = vmatprep.subr.bf16.mxu0 %v4524_v58  ;;  %v5608_v58 = vld [vmem:[#allocation10_spill] sm:$0xff] }
 0x335   :  { %3253 = vmatpush3.bf16.msra.mxu1 %v5131_v28 }
 0x336   :  { %3255 = vmatprep.subr.bf16.mxu1 %v5138_v42 }
 0x337   :  { %3285 = vmatpush1.bf16.msra.mxu0 %v4544_v20  ;;  %v5611_v20 = vld [vmem:[#allocation11_spill] sm:$0xff] }
 0x338   :  { %3287 = vmatprep.subr.bf16.mxu0 %v5603_v48 }
 0x339   :  { %3257 = vmatpush3.bf16.msra.mxu1 %v5152_v62 }
 0x33a   :  { %3323 = vmatprep.subr.bf16.mxu1 %v4319_v30  ;;  %v5605_v30 = vld [vmem:[#allocation27_spill] sm:$0xff] }
 0x33b   :  { %3289 = vmatpush1.bf16.msra.mxu0 %v4580_v57  ;;  %v5612_v57 = vld [vmem:[#allocation13_spill] sm:$0xff] }
 0x33c   :  { %2390 = vmatmul.mubr.f32.vlgmr.msra.gmra.mrb[20].mxu1 %v2167_v47  ;;  %3291 = vmatprep.subr.bf16.mxu0 %v4596_v53  ;;  %v5613_v53 = vld [vmem:[#allocation35_spill] sm:$0xff]  ;;  %v5638_v47 = vld [vmem:[#allocation38_spill] sm:$0xff] }
 0x33d   :  { %2394 = vmatprep.mubr.f32.mxu1 %v2170_v60  ;;  %3325 = vmatpush1.bf16.msra.mxu1 %v4333_v9  ;;  %v5609_v9 = vld [vmem:[#allocation31_spill] sm:$0xff]  ;;  %v5639_v60 = vld [vmem:[#allocation40_spill] sm:$0xff] }
 0x33e   :  { %3327 = vmatprep.subr.bf16.mxu1 %v4348_v38  ;;  %v5610_v38 = vld [vmem:[#allocation33_spill] sm:$0xff] }
 0x33f   :  { %3293 = vmatpush1.bf16.msra.mxu0 %v4609_v27  ;;  %v5615_v27 = vld [vmem:[#allocation15_spill] sm:$0xff] }
 0x340   :  { %2395 = vmatmul.mubr.f32.gmra.mrb[22].mxu1 %v2168_v13  ;;  %3295 = vmatprep.subr.bf16.mxu0 %v4632_v19  ;;  %v5616_v19 = vld [vmem:[#allocation17_spill] sm:$0xff]  ;;  %v5642_v13 = vld [vmem:[#allocation46_spill] sm:$0xff] }
 0x341   :  { %3329 = vmatpush1.bf16.msra.mxu1 %v4367_v35  ;;  %v5614_v35 = vld [vmem:[#allocation37_spill] sm:$0xff] }
 0x342   :  { %3331 = vmatprep.subr.bf16.mxu1 %v5604_v51 }
 0x343   :  { %3297 = vmatpush1.bf16.msra.mxu0 %v5605_v30  ;;  %v5646_v30 = vld [vmem:[#allocation7_spill] sm:$0xff] }
 0x344   :  { %3299 = vmatprep.subr.bf16.mxu0 %v5606_v54 }
 0x345   :  { %3333 = vmatpush1.bf16.msra.mxu1 %v5607_v14 }
 0x346   :  { %3335 = vmatprep.subr.bf16.mxu1 %v5608_v58 }
 0x347   :  { %3301 = vmatpush1.bf16.msra.mxu0 %v5609_v9  ;;  %v5647_v9 = vld [vmem:[#allocation3_spill] sm:$0xff] }
 0x348   :  { %3303 = vmatprep.subr.bf16.mxu0 %v5610_v38 }
 0x349   :  { %3337 = vmatpush1.bf16.msra.mxu1 %v5611_v20 }
 0x34a   :  { %3339 = vmatprep.subr.bf16.mxu1 %v5612_v57 }
 0x34b   :  { %3305 = vmatpush1.bf16.msra.mxu0 %v5613_v53 }
 0x34c   :  { %3307 = vmatprep.subr.bf16.mxu0 %v5614_v35 }
 0x34d   :  { %3341 = vmatpush1.bf16.msra.mxu1 %v5615_v27 }
 0x34e   :  { %3343 = vmatprep.subr.bf16.mxu1 %v5616_v19 }
 0x34f   :  { %3309 = vmatpush1.bf16.msra.mxu0 %v5617_v12 }
 0x350   :  { %3311 = vmatprep.subr.bf16.mxu0 %v5618_v63 }
 0x351   :  { %3345 = vmatpush1.bf16.msra.mxu1 %v5619_v4 }
 0x352   :  { %3347 = vmatprep.subr.bf16.mxu1 %v5620_v45 }
 0x353   :  { %3313 = vmatpush1.bf16.msra.mxu0 %v5621_v43  ;;  %v5648_v43 = vld [vmem:[#allocation5_spill] sm:$0xff] }
 0x354   :  { %3315 = vmatprep.subr.bf16.mxu0 %v5622_v40 }
 0x355   :  { %3349 = vmatpush1.bf16.msra.mxu1 %v5623_v52 }
 0x356   :  { %3351 = vmatprep.subr.bf16.mxu1 %v5624_v34 }
 0x357   :  { %3317 = vmatpush1.bf16.msra.mxu0 %v5625_v29 }
 0x358   :  { %3319 = vmatprep.subr.bf16.mxu0 %v5626_v56 }
 0x359   :  { %3353 = vmatpush1.bf16.msra.mxu1 %v5627_v24 }
 0x35a   :  { %3355 = vmatprep.subr.bf16.mxu1 %v5628_v49 }
 0x35b   :  { %3321 = vmatpush1.bf16.msra.mxu0 %v5629_v32 }
 0x35c   :  { %3387 = vmatprep.subr.bf16.mxu0 %v5630_v3 }
 0x35d   :  { %3357 = vmatpush1.bf16.msra.mxu1 %v5631_v8 }
 0x35e   :  { %3359 = vmatprep.subr.bf16.mxu1 %v5632_v33 }
 0x361   :  { %3361 = vmatpush1.bf16.msra.mxu1 %v5633_v44 }
 0x362   :  { %3363 = vmatprep.subr.bf16.mxu1 %v5634_v55 }
 0x365   :  { %3365 = vmatpush1.bf16.msra.mxu1 %v5635_v23 }
 0x366   :  { %3367 = vmatprep.subr.bf16.mxu1 %v5636_v5 }
 0x369   :  { %3369 = vmatpush1.bf16.msra.mxu1 %v5637_v6 }
 0x36a   :  { %3371 = vmatprep.subr.bf16.mxu1 %v5638_v47 }
 0x36d   :  { %3373 = vmatpush1.bf16.msra.mxu1 %v5639_v60 }
 0x36e   :  { %3375 = vmatprep.subr.bf16.mxu1 %v5640_v39 }
 0x371   :  { %3377 = vmatpush1.bf16.msra.mxu1 %v5641_v59 }
 0x372   :  { %3379 = vmatprep.subr.bf16.mxu1 %v5642_v13 }
 0x375   :  { %3381 = vmatpush1.bf16.msra.mxu1 %v5643_v17 }
 0x376   :  { %3383 = vmatprep.subr.bf16.mxu1 %v5644_v37 }
 0x379   :  { %3385 = vmatpush1.bf16.msra.mxu1 %v5645_v10 }
 0x3ef   :  { %v2237_v48 = vpop.f32.mrb[16].mxu1  ;;  %v2314_v51 = vpop.f32.mrb[32].mxu0 }
 0x3f0   :  { %v2238_v54 = vadd.f32 %v2237_v48, %v5646_v30  ;;  %v2239_v14 = vpop.f32.mrb[17].mxu1  ;;  %v2316_v58 = vpop.f32.mrb[33].mxu0  ;;  %v2315_v40 = vadd.f32 %v2314_v51, %v5648_v43 }
 0x3f1   :  { %v2240_v38 = vadd.f32 %v2239_v14, %v5647_v9  ;;  %v2317_v59 = vadd.f32 %v2316_v58, %v5244_v15 }
 0x3f2   :  { %v2761_v20 = vmul.f32 -1.442695, %v2238_v54  ;;  %v2765_v34 = vmul.f32 -1.442695, %v2315_v40 }
 0x3f3   :  { %v2763_v57 = vmul.f32 -1.442695, %v2240_v38  ;;  %v2243_v53 = vpop.f32.mrb[18].mxu1  ;;  %v2320_v35 = vpop.f32.mrb[34].mxu0 }
 0x3f4   :  { %3595 = vpow2.f32 %v2761_v20  ;;  %v2244_v27 = vadd.f32 %v2243_v53, %v5646_v30  ;;  %v2245_v19 = vpop.f32.mrb[19].mxu1  ;;  %v2322_v12 = vpop.f32.mrb[35].mxu0  ;;  %v2321_v29 = vadd.f32 %v2320_v35, %v5648_v43 }
 0x3f5   :  { %v2246_v63 = vadd.f32 %v2245_v19, %v5647_v9  ;;  %3597 = vpow2.f32 %v2763_v57  ;;  %v2323_v23 = vadd.f32 %v2322_v12, %v5244_v15  ;;  %v2767_v57 = vmul.f32 -1.442695, %v2317_v59 }
 0x3f6   :  { %v2762_v4 = vmul.f32 -1.442695, %v2244_v27  ;;  %v2766_v3 = vmul.f32 -1.442695, %v2321_v29 }
 0x3f7   :  { %v2764_v45 = vmul.f32 -1.442695, %v2246_v63  ;;  %v2768_v13 = vmul.f32 -1.442695, %v2323_v23 }
 0x3f8   :  { %3599 = vpow2.f32 %v2762_v4 }
 0x3f9   :  { %3601 = vpow2.f32 %v2764_v45 }
 0x3fe   :  { %v3596_v52 = vpop.eup %3595 }
 0x3ff   :  { %v2406_v56 = vadd.f32 1.0, %v3596_v52  ;;  %v3598_v24 = vpop.eup %3597 }
 0x400   :  { %v2418_v49 = vadd.f32 1.0, %v3598_v24 }
 0x401   :  { %3603 = vrcp.f32 %v2406_v56 }
 0x402   :  { %v3600_v32 = vpop.eup %3599  ;;  %3605 = vpow2.f32 %v2765_v34 }
 0x403   :  { %3607 = vrcp.f32 %v2418_v49  ;;  %v2407_v8 = vadd.f32 1.0, %v3600_v32  ;;  %v3602_v33 = vpop.eup %3601 }
 0x404   :  { %v2419_v44 = vadd.f32 1.0, %v3602_v33 }
 0x405   :  { %3609 = vrcp.f32 %v2407_v8 }
 0x406   :  { %3611 = vpow2.f32 %v2766_v3 }
 0x407   :  { %3613 = vrcp.f32 %v2419_v44 }
 0x408   :  { %3615 = vpow2.f32 %v2768_v13 }
 0x40b   :  { %v3604_v55 = vpop.eup %3603 }
 0x40c   :  { %v3606_v5 = vpop.eup %3605  ;;  %v2450_v6 = vmul.f32 %v3604_v55, %v5266_v0 }
 0x40d   :  { %v3608_v47 = vpop.eup %3607  ;;  %v2430_v10 = vadd.f32 1.0, %v3606_v5 }
 0x40e   :  { %v2452_v60 = vmul.f32 %v3608_v47, %v5273_v46 }
 0x40f   :  { %v3610_v39 = vpop.eup %3609  ;;  %v2861_v17 = vpop.f32.mrb[20].mxu1  ;;  %3617 = vrcp.f32 %v2430_v10 }
 0x410   :  { %v3612_v37 = vpop.eup %3611  ;;  %v2454_v48 = vadd.f32 %v2452_v60, %v2450_v6  ;;  %v2451_v51 = vmul.f32 %v3610_v39, %v5270_v11  ;;  %v2862_v54 = vpop.f32.mrb[21].mxu1 }
 0x411   :  { %v3614_v14 = vpop.eup %3613  ;;  %v2863_v38 = vadd.f32 %v2862_v54, %v2861_v17  ;;  %v2431_v53 = vadd.f32 1.0, %v3612_v37 }
 0x412   :  { %v2453_v20 = vmul.f32 %v3614_v14, %v5276_v2  ;;  %v3616_v11 = vpop.eup %3615 }
 0x413   :  { %v2392_v0 = vadd.f32 %v2863_v38, %v5252_v25  ;;  %v2864_v46 = vpop.f32.mrb[22].mxu1  ;;  %v2443_v40 = vadd.f32 1.0, %v3616_v11 }
 0x414   :  { %v2455_v58 = vadd.f32 %v2453_v20, %v2451_v51  ;;  %v2865_v35 = vpop.f32.mrb[23].mxu1 }
 0x415   :  { %3619 = vtanh.f32 %v2392_v0  ;;  %v2866_v27 = vadd.f32 %v2865_v35, %v2864_v46 }
 0x416   :  { %3621 = vpow2.f32 %v2767_v57 }
 0x417   :  { %v2397_v19 = vadd.f32 %v2866_v27, %v5252_v25  ;;  %3623 = vrcp.f32 %v2431_v53 }
 0x419   :  { %3625 = vtanh.f32 %v2397_v19  ;;  %v3618_v12 = vpop.eup %3617 }
 0x41a   :  { %3627 = vrcp.f32 %v2443_v40 }
 0x41f   :  { %v3620_v63 = vpop.eup %3619 }
 0x420   :  { %v2456_v2 = vmul.f32 %v3620_v63, %v3618_v12  ;;  %v3622_v4 = vpop.eup %3621 }
 0x421   :  { %v3624_v45 = vpop.eup %3623  ;;  %v2442_v56 = vadd.f32 1.0, %v3622_v4 }
 0x422   :  { %v2458_v52 = vadd.f32 %v2456_v2, %v2454_v48 }
 0x423   :  { %v3626_v34 = vpop.eup %3625 }
 0x424   :  { %v2457_v29 = vmul.f32 %v3626_v34, %v3624_v45  ;;  %3629 = vtanh.f32 %v2458_v52  ;;  %v3628_v49 = vpop.eup %3627 }
 0x426   :  { %v2459_v24 = vadd.f32 %v2457_v29, %v2455_v58 }
 0x428   :  { %3631 = vtanh.f32 %v2459_v24 }
 0x429   :  { %3633 = vrcp.f32 %v2442_v56 }
 0x42e   :  { %v3630_v32 = vpop.eup %3629 }
 0x432   :  { %v3632_v3 = vpop.eup %3631 }
 0x433   :  { %v3634_v8 = vpop.eup %3633  ;;  %v2463_v33 = vmul.f32 %v3632_v3, %v3628_v49 }
 0x434   :  { %v2462_v44 = vmul.f32 %v3634_v8, %v3630_v32 }
 0x435   :  { %2528 = vmatprep.mubr.f32.mxu0 %v2463_v33  ;;  %2599 = vmatprep.mubr.f32.mxu1 %v2463_v33 }
 0x436   :  { %2529 = vmatmul.mubr.f32.vlgmr.msra.gmra.mrb[36].mxu0 %v2462_v44  ;;  %2600 = vmatmul.mubr.f32.vlgmr.msra.gmra.mrb[24].mxu1 %v2462_v44 }
 0x437   :  { %3389 = vmatpush3.bf16.msra.mxu0 %v4968_v1  ;;  %2670 = vmatprep.mubr.f32.mxu0 %v2463_v33 }
 0x438   :  { %3391 = vmatprep.subr.bf16.mxu0 %v4977_v7 }
 0x43b   :  { %3393 = vmatpush3.bf16.msra.mxu0 %v5000_v26 }
 0x43c   :  { %3395 = vmatprep.subr.bf16.mxu0 %v5004_v22 }
 0x43f   :  { %3397 = vmatpush3.bf16.msra.mxu0 %v5020_v50 }
 0x440   :  { %3399 = vmatprep.subr.bf16.mxu0 %v5025_v21 }
 0x443   :  { %3401 = vmatpush3.bf16.msra.mxu0 %v5049_v61 }
 0x444   :  { %3403 = vmatprep.subr.bf16.mxu0 %v5056_v41 }
 0x447   :  { %3405 = vmatpush3.bf16.msra.mxu0 %v5599_v36 }
 0x448   :  { %3407 = vmatprep.subr.bf16.mxu0 %v5600_v16 }
 0x44b   :  { %3409 = vmatpush3.bf16.msra.mxu0 %v5105_v18 }
 0x44c   :  { %3411 = vmatprep.subr.bf16.mxu0 %v5112_v31 }
 0x44f   :  { %3413 = vmatpush3.bf16.msra.mxu0 %v5131_v28 }
 0x450   :  { %3415 = vmatprep.subr.bf16.mxu0 %v5138_v42 }
 0x453   :  { %3417 = vmatpush3.bf16.msra.mxu0 %v5152_v62 }
 0x456   :  { %2671 = vmatmul.mubr.f32.vlgmr.msra.gmra.mrb[38].mxu0 %v2462_v44 }
 0x509   :  { %v2530_v1 = vpop.f32.mrb[36].mxu0  ;;  %v2601_v7 = vpop.f32.mrb[24].mxu1 }
 0x50a   :  { %v2531_v26 = vadd.f32 %v2530_v1, %v5646_v30  ;;  %v2532_v22 = vpop.f32.mrb[37].mxu0  ;;  %v2603_v50 = vpop.f32.mrb[25].mxu1  ;;  %v2602_v18 = vadd.f32 %v2601_v7, %v5648_v43 }
 0x50b   :  { %v2533_v21 = vadd.f32 %v2532_v22, %v5647_v9  ;;  %v2604_v16 = vadd.f32 %v2603_v50, %v5244_v15 }
 0x50c   :  { %v2769_v61 = vmul.f32 -1.442695, %v2531_v26  ;;  %v2771_v31 = vmul.f32 -1.442695, %v2602_v18 }
 0x50d   :  { %v2770_v41 = vmul.f32 -1.442695, %v2533_v21  ;;  %v2772_v6 = vmul.f32 -1.442695, %v2604_v16 }
 0x50e   :  { %3635 = vpow2.f32 %v2769_v61 }
 0x50f   :  { %3637 = vpow2.f32 %v2770_v41 }
 0x518   :  { %v3636_v28 = vpop.eup %3635 }
 0x519   :  { %v2679_v42 = vadd.f32 1.0, %v3636_v28  ;;  %v3638_v36 = vpop.eup %3637 }
 0x51a   :  { %v2685_v62 = vadd.f32 1.0, %v3638_v36 }
 0x51b   :  { %3639 = vrcp.f32 %v2679_v42 }
 0x51c   :  { %3641 = vpow2.f32 %v2771_v31 }
 0x51d   :  { %3643 = vrcp.f32 %v2685_v62 }
 0x51e   :  { %3645 = vpow2.f32 %v2772_v6 }
 0x525   :  { %v3640_v30 = vpop.eup %3639 }
 0x526   :  { %v3642_v55 = vpop.eup %3641  ;;  %v2701_v23 = vmul.f32 %v3640_v30, %v2458_v52 }
 0x527   :  { %v3644_v9 = vpop.eup %3643  ;;  %v2691_v60 = vadd.f32 1.0, %v3642_v55 }
 0x528   :  { %v2702_v5 = vmul.f32 %v3644_v9, %v2459_v24  ;;  %v3646_v17 = vpop.eup %3645 }
 0x529   :  { %v2899_v47 = vpop.f32.mrb[38].mxu0  ;;  %3647 = vrcp.f32 %v2691_v60  ;;  %v2697_v15 = vadd.f32 1.0, %v3646_v17 }
 0x52a   :  { %v2703_v39 = vadd.f32 %v2702_v5, %v2701_v23  ;;  %v2900_v43 = vpop.f32.mrb[39].mxu0 }
 0x52b   :  { %v2901_v59 = vadd.f32 %v2900_v43, %v2899_v47 }
 0x52d   :  { %v2673_v13 = vadd.f32 %v2901_v59, %v5252_v25 }
 0x52f   :  { %3649 = vtanh.f32 %v2673_v13 }
 0x530   :  { %3651 = vrcp.f32 %v2697_v15 }
 0x533   :  { %v3648_v37 = vpop.eup %3647 }
 0x539   :  { %v3650_v10 = vpop.eup %3649 }
 0x53a   :  { %v2704_v48 = vmul.f32 %v3650_v10, %v3648_v37  ;;  %v3652_v54 = vpop.eup %3651 }
 0x53c   :  { %v2705_v51 = vadd.f32 %v2704_v48, %v2703_v39 }
 0x53e   :  { %3653 = vtanh.f32 %v2705_v51 }
 0x548   :  { %v3654_v14 = vpop.eup %3653 }
 0x549   :  { %v2707_v38 = vmul.f32 %v3654_v14, %v3652_v54 }
 0x54b   :  { %2708 = vst [vmem:[%s5404_s7] sm:$0xff] %v2707_v38 }

</bundles_post_ra>
